<compile_context>
chip_gen: v5e
topology: v5e:2x2
jax: 0.10.0
libtpu: 0.0.40
codegen_flags: <defaults>
</compile_context>

<pallas_src>
import jax
import jax.numpy as jnp
import numpy as np
from jax import lax
from jax.experimental import pallas as pl
from jax.experimental.pallas import tpu as pltpu


def _make_encoder_gru_kernel(T, H, V):
    """Build the fused embedding-gather + T-step GRU kernel (T, H, V static)."""

    def kernel(tok_ref,      # (T,)   int32 token ids, SMEM
               emb_ref,      # (V, H) embedding table, resident in VMEM (bf16)
               h0_ref,       # (1, H) initial hidden (f32)
               wih_ref,      # (H, 3H) input->hidden weights (transposed, bf16)
               whh_ref,      # (H, 3H) hidden->hidden weights (transposed, bf16)
               bgi_ref,      # (1, 3H) b_ih with b_hh[r,z] folded in (f32)
               bhn_ref,      # (1, H)  b_hh_n (f32)
               out_ref):     # (T, H)  per-step GRU outputs (f32)
        # ---- embedding gather: one-hot MXU gather from the resident table ------
        iota_v = lax.broadcasted_iota(jnp.int32, (1, V), 1)
        rows = []
        for i in range(T):
            tok = jnp.clip(tok_ref[i], 0, V - 1)          # guard OOB token ids
            rows.append((iota_v == tok).astype(emb_ref.dtype))
        onehot = jnp.concatenate(rows, axis=0)            # (T, V) bf16
        x = jnp.dot(onehot, emb_ref[...],
                    preferred_element_type=jnp.float32)   # (T, H) == exact rows

        # ---- hoisted non-recurrent projection: one (T,H)x(H,3H) MXU matmul -----
        # bgi already folds b_hh's r/z slices (they add linearly before sigmoid).
        gi = (jnp.dot(x.astype(wih_ref.dtype), wih_ref[...],
                      preferred_element_type=jnp.float32)
              + bgi_ref[...])                             # (T, 3H) f32

        # ---- fully-unrolled sequential recurrence -------------------------------
        h = h0_ref[...]                                   # (1, H) f32
        b_hn = bhn_ref[...]                               # (1, H) f32
        outs = []
        for t in range(T):
            gh = jnp.dot(h.astype(whh_ref.dtype), whh_ref[...],
                         preferred_element_type=jnp.float32)   # (1, 3H) f32
            gi_t = gi[t:t + 1, :]
            r = jax.nn.sigmoid(gi_t[:, 0:H] + gh[:, 0:H])
            z = jax.nn.sigmoid(gi_t[:, H:2 * H] + gh[:, H:2 * H])
            n = jnp.tanh(gi_t[:, 2 * H:3 * H] + r * (gh[:, 2 * H:3 * H] + b_hn))
            h = n + z * (h - n)                           # == (1-z)*n + z*h
            outs.append(h)

        # Single unmasked, lane-dense (T, H) store.
        out_ref[...] = jnp.concatenate(outs, axis=0)

    return kernel


def encoder_rnn_forward(tokens, hidden, params):
    """EncoderRNN forward.

    tokens: int32 scalar (single EncoderRNN.forward step) or (T,) int32 array
            (== T consecutive forward steps fused in one kernel call).
    hidden: (1, 1, H) float32 previous hidden state.
    Returns (outputs, hidden): outputs is (T, 1, H), hidden is (1, 1, H).
    For a scalar token this matches the torch module exactly: ((1,1,H), (1,1,H)).
    """
    emb = params["embedding"]            # (V, H)  bf16
    w_ih = params["w_ih_t"]              # (H, 3H) bf16
    w_hh = params["w_hh_t"]              # (H, 3H) bf16
    b_ih = params["b_ih"]                # (1, 3H) f32
    b_hh = params["b_hh"]                # (1, 3H) f32

    V, H = emb.shape
    toks = jnp.atleast_1d(jnp.asarray(tokens, dtype=jnp.int32))
    T = int(toks.shape[0])
    h0 = jnp.reshape(hidden, (1, H)).astype(jnp.float32)

    # Fold the r/z hidden-bias slices into the input bias (added before the
    # sigmoids, so numerically equivalent); keep b_hh_n separate because torch
    # applies it inside r * (h @ W_hn + b_hn).
    b_gi = b_ih.at[:, :2 * H].add(b_hh[:, :2 * H])        # (1, 3H) f32
    b_hn = b_hh[:, 2 * H:3 * H]                           # (1, H)  f32

    kernel = _make_encoder_gru_kernel(T, H, V)

    itemsize = lambda a: a.size * a.dtype.itemsize
    cost = pl.CostEstimate(
        flops=2 * T * V * H            # one-hot gather matmul
              + 2 * T * H * 3 * H      # hoisted GI projection
              + 2 * T * H * 3 * H,     # recurrent h @ W_hh
        transcendentals=3 * T * H,     # 2 sigmoids + 1 tanh per hidden unit/step
        bytes_accessed=(itemsize(emb) + itemsize(w_ih) + itemsize(w_hh)
                        + itemsize(b_gi) + itemsize(b_hn) + itemsize(h0)
                        + T * 4 + T * H * 4))

    outs = pl.pallas_call(
        kernel,
        out_shape=jax.ShapeDtypeStruct((T, H), jnp.float32),
        in_specs=[
            pl.BlockSpec(memory_space=pltpu.MemorySpace.SMEM),   # token ids
            pl.BlockSpec(memory_space=pltpu.MemorySpace.VMEM),   # embedding (resident)
            pl.BlockSpec(memory_space=pltpu.MemorySpace.VMEM),   # h0
            pl.BlockSpec(memory_space=pltpu.MemorySpace.VMEM),   # W_ih
            pl.BlockSpec(memory_space=pltpu.MemorySpace.VMEM),   # W_hh
            pl.BlockSpec(memory_space=pltpu.MemorySpace.VMEM),   # b_gi
            pl.BlockSpec(memory_space=pltpu.MemorySpace.VMEM),   # b_hn
        ],
        out_specs=pl.BlockSpec(memory_space=pltpu.MemorySpace.VMEM),
        cost_estimate=cost,
    )(toks, emb, h0, w_ih, w_hh, b_gi, b_hn)

    outputs = outs.reshape(T, 1, H)                # (seq, batch=1, H), torch GRU layout
    hidden_out = outs[T - 1:T].reshape(1, 1, H)    # final hidden == last output
    return outputs, hidden_out


def init_params(key, input_size, hidden_size, weight_dtype=jnp.bfloat16):
    """Parameter init matching torch module shapes.

    nn.Embedding(V, H) -> (V, H), N(0, 1)
    nn.GRU(H, H): weight_ih_l0 (3H, H), weight_hh_l0 (3H, H),
                  bias_ih_l0 (3H,), bias_hh_l0 (3H,), U(-1/sqrt(H), 1/sqrt(H)).
    Weight matrices are stored transposed ((H, 3H)) and in bf16 for the MXU;
    biases stay f32 (gate math is f32 on the VPU).
    """
    k_emb, k_wih, k_whh, k_bih, k_bhh = jax.random.split(key, 5)
    H = hidden_size
    bound = 1.0 / jnp.sqrt(H)
    emb = jax.random.normal(k_emb, (input_size, H), dtype=jnp.float32)
    w_ih = jax.random.uniform(k_wih, (3 * H, H), minval=-bound, maxval=bound,
                              dtype=jnp.float32)
    w_hh = jax.random.uniform(k_whh, (3 * H, H), minval=-bound, maxval=bound,
                              dtype=jnp.float32)
    b_ih = jax.random.uniform(k_bih, (3 * H,), minval=-bound, maxval=bound,
                              dtype=jnp.float32)
    b_hh = jax.random.uniform(k_bhh, (3 * H,), minval=-bound, maxval=bound,
                              dtype=jnp.float32)
    return {
        "embedding": emb.astype(weight_dtype),           # (V, H)
        "w_ih_t": w_ih.T.astype(weight_dtype),           # (H, 3H)
        "w_hh_t": w_hh.T.astype(weight_dtype),           # (H, 3H)
        "b_ih": b_ih.reshape(1, 3 * H),                  # f32
        "b_hh": b_hh.reshape(1, 3 * H),                  # f32
    }


def _reference_forward(tokens, hidden0, params):
    """Pure-JAX step-by-step reference (torch.nn.GRU semantics, same dtypes)."""
    emb, wih, whh = params["embedding"], params["w_ih_t"], params["w_hh_t"]
    bih, bhh = params["b_ih"], params["b_hh"]
    H = whh.shape[0]
    h = hidden0.reshape(1, H).astype(jnp.float32)
    outs = []
    for tok in np.asarray(tokens).reshape(-1):
        x = emb[int(tok)].reshape(1, H)
        gi = jnp.dot(x, wih, preferred_element_type=jnp.float32) + bih
        gh = jnp.dot(h.astype(whh.dtype), whh,
                     preferred_element_type=jnp.float32) + bhh
        i_r, i_z, i_n = gi[:, :H], gi[:, H:2 * H], gi[:, 2 * H:]
        h_r, h_z, h_n = gh[:, :H], gh[:, H:2 * H], gh[:, 2 * H:]
        r = jax.nn.sigmoid(i_r + h_r)
        z = jax.nn.sigmoid(i_z + h_z)
        n = jnp.tanh(i_n + r * h_n)
        h = (1.0 - z) * n + z * h
        outs.append(h)
    T = len(outs)
    return jnp.stack(outs, axis=0).reshape(T, 1, H), h.reshape(1, 1, H)


if __name__ == "__main__":
    VOCAB = 64          # input_size (vocabulary)
    HIDDEN = 256        # hidden_size (lane-aligned, matches the torch script)
    SEQ = 8             # fused sequence length

    key = jax.random.PRNGKey(0)
    k_params, k_tok = jax.random.split(key)
    params = init_params(k_params, VOCAB, HIDDEN)

    tokens = jax.random.randint(k_tok, (SEQ,), 0, VOCAB, dtype=jnp.int32)
    hidden0 = jnp.zeros((1, 1, HIDDEN), dtype=jnp.float32)   # initHidden()

    # Fused whole-sequence encode (== SEQ consecutive EncoderRNN.forward calls).
    outs, h_final = encoder_rnn_forward(tokens, hidden0, params)
    outs = jax.block_until_ready(outs)
    h_final = jax.block_until_ready(h_final)

    ref_outs, ref_h = _reference_forward(tokens, hidden0, params)
    assert outs.shape == (SEQ, 1, HIDDEN) and h_final.shape == (1, 1, HIDDEN)
    assert jnp.allclose(outs, ref_outs, atol=2e-3, rtol=2e-3), "sequence output mismatch"
    assert jnp.allclose(h_final, ref_h, atol=2e-3, rtol=2e-3), "final hidden mismatch"

    # Single-step call matching the original module.forward signature exactly.
    out1, h1 = encoder_rnn_forward(tokens[0], hidden0, params)
    out1 = jax.block_until_ready(out1)
    assert out1.shape == (1, 1, HIDDEN) and h1.shape == (1, 1, HIDDEN)
    assert jnp.allclose(out1, ref_outs[0:1], atol=2e-3, rtol=2e-3), "single-step mismatch"

    print("KERNEL_OK")
</pallas_src>

<mosaic_0001>
module attributes {stable_mosaic.version = 11 : i64} {
  func.func @kernel(%arg0: memref<8xi32, #tpu.memory_space<smem>>, %arg1: memref<64x256xbf16, #tpu.memory_space<vmem>>, %arg2: memref<1x256xf32, #tpu.memory_space<vmem>>, %arg3: memref<256x768xbf16, #tpu.memory_space<vmem>>, %arg4: memref<256x768xbf16, #tpu.memory_space<vmem>>, %arg5: memref<1x768xf32, #tpu.memory_space<vmem>>, %arg6: memref<1x256xf32, #tpu.memory_space<vmem>>, %arg7: memref<8x256xf32, #tpu.memory_space<vmem>>) attributes {dimension_semantics = [], scalar_prefetch = 0 : i64, scratch_operands = 0 : i64, tpu.core_type = #tpu.core_type<tc>} {
    %0 = tpu.iota {dimensions = array<i32: 1>} : vector<1x64xi32>
    %c0 = arith.constant 0 : index
    %1 = memref.load %arg0[%c0] : memref<8xi32, #tpu.memory_space<smem>>
    %c0_i32 = arith.constant 0 : i32
    %c63_i32 = arith.constant 63 : i32
    %2 = arith.maxsi %c0_i32, %1 : i32
    %3 = arith.minsi %c63_i32, %2 : i32
    %4 = vector.broadcast %3 : i32 to vector<1x64xi32>
    %5 = arith.cmpi eq, %0, %4 : vector<1x64xi32>
    %6 = arith.extui %5 : vector<1x64xi1> to vector<1x64xi32>
    %7 = arith.sitofp %6 : vector<1x64xi32> to vector<1x64xf32>
    %8 = arith.truncf %7 : vector<1x64xf32> to vector<1x64xbf16>
    %c1 = arith.constant 1 : index
    %9 = memref.load %arg0[%c1] : memref<8xi32, #tpu.memory_space<smem>>
    %c0_i32_0 = arith.constant 0 : i32
    %c63_i32_1 = arith.constant 63 : i32
    %10 = arith.maxsi %c0_i32_0, %9 : i32
    %11 = arith.minsi %c63_i32_1, %10 : i32
    %12 = vector.broadcast %11 : i32 to vector<1x64xi32>
    %13 = arith.cmpi eq, %0, %12 : vector<1x64xi32>
    %14 = arith.extui %13 : vector<1x64xi1> to vector<1x64xi32>
    %15 = arith.sitofp %14 : vector<1x64xi32> to vector<1x64xf32>
    %16 = arith.truncf %15 : vector<1x64xf32> to vector<1x64xbf16>
    %c2 = arith.constant 2 : index
    %17 = memref.load %arg0[%c2] : memref<8xi32, #tpu.memory_space<smem>>
    %c0_i32_2 = arith.constant 0 : i32
    %c63_i32_3 = arith.constant 63 : i32
    %18 = arith.maxsi %c0_i32_2, %17 : i32
    %19 = arith.minsi %c63_i32_3, %18 : i32
    %20 = vector.broadcast %19 : i32 to vector<1x64xi32>
    %21 = arith.cmpi eq, %0, %20 : vector<1x64xi32>
    %22 = arith.extui %21 : vector<1x64xi1> to vector<1x64xi32>
    %23 = arith.sitofp %22 : vector<1x64xi32> to vector<1x64xf32>
    %24 = arith.truncf %23 : vector<1x64xf32> to vector<1x64xbf16>
    %c3 = arith.constant 3 : index
    %25 = memref.load %arg0[%c3] : memref<8xi32, #tpu.memory_space<smem>>
    %c0_i32_4 = arith.constant 0 : i32
    %c63_i32_5 = arith.constant 63 : i32
    %26 = arith.maxsi %c0_i32_4, %25 : i32
    %27 = arith.minsi %c63_i32_5, %26 : i32
    %28 = vector.broadcast %27 : i32 to vector<1x64xi32>
    %29 = arith.cmpi eq, %0, %28 : vector<1x64xi32>
    %30 = arith.extui %29 : vector<1x64xi1> to vector<1x64xi32>
    %31 = arith.sitofp %30 : vector<1x64xi32> to vector<1x64xf32>
    %32 = arith.truncf %31 : vector<1x64xf32> to vector<1x64xbf16>
    %c4 = arith.constant 4 : index
    %33 = memref.load %arg0[%c4] : memref<8xi32, #tpu.memory_space<smem>>
    %c0_i32_6 = arith.constant 0 : i32
    %c63_i32_7 = arith.constant 63 : i32
    %34 = arith.maxsi %c0_i32_6, %33 : i32
    %35 = arith.minsi %c63_i32_7, %34 : i32
    %36 = vector.broadcast %35 : i32 to vector<1x64xi32>
    %37 = arith.cmpi eq, %0, %36 : vector<1x64xi32>
    %38 = arith.extui %37 : vector<1x64xi1> to vector<1x64xi32>
    %39 = arith.sitofp %38 : vector<1x64xi32> to vector<1x64xf32>
    %40 = arith.truncf %39 : vector<1x64xf32> to vector<1x64xbf16>
    %c5 = arith.constant 5 : index
    %41 = memref.load %arg0[%c5] : memref<8xi32, #tpu.memory_space<smem>>
    %c0_i32_8 = arith.constant 0 : i32
    %c63_i32_9 = arith.constant 63 : i32
    %42 = arith.maxsi %c0_i32_8, %41 : i32
    %43 = arith.minsi %c63_i32_9, %42 : i32
    %44 = vector.broadcast %43 : i32 to vector<1x64xi32>
    %45 = arith.cmpi eq, %0, %44 : vector<1x64xi32>
    %46 = arith.extui %45 : vector<1x64xi1> to vector<1x64xi32>
    %47 = arith.sitofp %46 : vector<1x64xi32> to vector<1x64xf32>
    %48 = arith.truncf %47 : vector<1x64xf32> to vector<1x64xbf16>
    %c6 = arith.constant 6 : index
    %49 = memref.load %arg0[%c6] : memref<8xi32, #tpu.memory_space<smem>>
    %c0_i32_10 = arith.constant 0 : i32
    %c63_i32_11 = arith.constant 63 : i32
    %50 = arith.maxsi %c0_i32_10, %49 : i32
    %51 = arith.minsi %c63_i32_11, %50 : i32
    %52 = vector.broadcast %51 : i32 to vector<1x64xi32>
    %53 = arith.cmpi eq, %0, %52 : vector<1x64xi32>
    %54 = arith.extui %53 : vector<1x64xi1> to vector<1x64xi32>
    %55 = arith.sitofp %54 : vector<1x64xi32> to vector<1x64xf32>
    %56 = arith.truncf %55 : vector<1x64xf32> to vector<1x64xbf16>
    %c7 = arith.constant 7 : index
    %57 = memref.load %arg0[%c7] : memref<8xi32, #tpu.memory_space<smem>>
    %c0_i32_12 = arith.constant 0 : i32
    %c63_i32_13 = arith.constant 63 : i32
    %58 = arith.maxsi %c0_i32_12, %57 : i32
    %59 = arith.minsi %c63_i32_13, %58 : i32
    %60 = vector.broadcast %59 : i32 to vector<1x64xi32>
    %61 = arith.cmpi eq, %0, %60 : vector<1x64xi32>
    %62 = arith.extui %61 : vector<1x64xi1> to vector<1x64xi32>
    %63 = arith.sitofp %62 : vector<1x64xi32> to vector<1x64xf32>
    %64 = arith.truncf %63 : vector<1x64xf32> to vector<1x64xbf16>
    %65 = tpu.concatenate %8, %16, %24, %32, %40, %48, %56, %64 in 0 : vector<1x64xbf16>, vector<1x64xbf16>, vector<1x64xbf16>, vector<1x64xbf16>, vector<1x64xbf16>, vector<1x64xbf16>, vector<1x64xbf16>, vector<1x64xbf16> -> vector<8x64xbf16>
    %c0_14 = arith.constant 0 : index
    %c0_15 = arith.constant 0 : index
    %66 = vector.load %arg1[%c0_14, %c0_15] : memref<64x256xbf16, #tpu.memory_space<vmem>>, vector<64x256xbf16>
    %cst = arith.constant dense<0.000000e+00> : vector<8x256xf32>
    %67 = tpu.matmul %65, %66, %cst {dimension_numbers = #tpu.dot_dimension_numbers<[1], [0], [0], [1], [0, 0, 1, 1], [], []>} : vector<8x64xbf16>, vector<64x256xbf16>, vector<8x256xf32> -> vector<8x256xf32>
    %68 = arith.truncf %67 : vector<8x256xf32> to vector<8x256xbf16>
    %c0_16 = arith.constant 0 : index
    %c0_17 = arith.constant 0 : index
    %69 = vector.load %arg3[%c0_16, %c0_17] : memref<256x768xbf16, #tpu.memory_space<vmem>>, vector<256x768xbf16>
    %cst_18 = arith.constant dense<0.000000e+00> : vector<8x768xf32>
    %70 = tpu.matmul %68, %69, %cst_18 {dimension_numbers = #tpu.dot_dimension_numbers<[1], [0], [0], [1], [0, 0, 1, 1], [], []>} : vector<8x256xbf16>, vector<256x768xbf16>, vector<8x768xf32> -> vector<8x768xf32>
    %c0_19 = arith.constant 0 : index
    %c0_20 = arith.constant 0 : index
    %71 = vector.load %arg5[%c0_19, %c0_20] : memref<1x768xf32, #tpu.memory_space<vmem>>, vector<1x768xf32>
    %72 = vector.broadcast %71 : vector<1x768xf32> to vector<8x768xf32>
    %73 = arith.addf %70, %72 : vector<8x768xf32>
    %c0_21 = arith.constant 0 : index
    %c0_22 = arith.constant 0 : index
    %74 = vector.load %arg2[%c0_21, %c0_22] : memref<1x256xf32, #tpu.memory_space<vmem>>, vector<1x256xf32>
    %c0_23 = arith.constant 0 : index
    %c0_24 = arith.constant 0 : index
    %75 = vector.load %arg6[%c0_23, %c0_24] : memref<1x256xf32, #tpu.memory_space<vmem>>, vector<1x256xf32>
    %76 = arith.truncf %74 : vector<1x256xf32> to vector<1x256xbf16>
    %c0_25 = arith.constant 0 : index
    %c0_26 = arith.constant 0 : index
    %77 = vector.load %arg4[%c0_25, %c0_26] : memref<256x768xbf16, #tpu.memory_space<vmem>>, vector<256x768xbf16>
    %cst_27 = arith.constant dense<0.000000e+00> : vector<1x768xf32>
    %78 = tpu.matmul %76, %77, %cst_27 {dimension_numbers = #tpu.dot_dimension_numbers<[1], [0], [0], [1], [0, 0, 1, 1], [], []>} : vector<1x256xbf16>, vector<256x768xbf16>, vector<1x768xf32> -> vector<1x768xf32>
    %79 = vector.extract_strided_slice %73 {offsets = [0, 0], sizes = [1, 768], strides = [1, 1]} : vector<8x768xf32> to vector<1x768xf32>
    %80 = vector.extract_strided_slice %79 {offsets = [0, 0], sizes = [1, 256], strides = [1, 1]} : vector<1x768xf32> to vector<1x256xf32>
    %81 = vector.extract_strided_slice %78 {offsets = [0, 0], sizes = [1, 256], strides = [1, 1]} : vector<1x768xf32> to vector<1x256xf32>
    %82 = arith.addf %80, %81 : vector<1x256xf32>
    %83 = arith.negf %82 : vector<1x256xf32>
    %84 = math.exp %83 : vector<1x256xf32>
    %cst_28 = arith.constant 1.000000e+00 : f32
    %85 = vector.broadcast %cst_28 : f32 to vector<1x256xf32>
    %86 = arith.addf %85, %84 : vector<1x256xf32>
    %87 = arith.divf %85, %86 : vector<1x256xf32>
    %88 = vector.extract_strided_slice %79 {offsets = [0, 256], sizes = [1, 256], strides = [1, 1]} : vector<1x768xf32> to vector<1x256xf32>
    %89 = vector.extract_strided_slice %78 {offsets = [0, 256], sizes = [1, 256], strides = [1, 1]} : vector<1x768xf32> to vector<1x256xf32>
    %90 = arith.addf %88, %89 : vector<1x256xf32>
    %91 = arith.negf %90 : vector<1x256xf32>
    %92 = math.exp %91 : vector<1x256xf32>
    %cst_29 = arith.constant 1.000000e+00 : f32
    %93 = vector.broadcast %cst_29 : f32 to vector<1x256xf32>
    %94 = arith.addf %93, %92 : vector<1x256xf32>
    %95 = arith.divf %93, %94 : vector<1x256xf32>
    %96 = vector.extract_strided_slice %79 {offsets = [0, 512], sizes = [1, 256], strides = [1, 1]} : vector<1x768xf32> to vector<1x256xf32>
    %97 = vector.extract_strided_slice %78 {offsets = [0, 512], sizes = [1, 256], strides = [1, 1]} : vector<1x768xf32> to vector<1x256xf32>
    %98 = arith.addf %97, %75 : vector<1x256xf32>
    %99 = arith.mulf %87, %98 : vector<1x256xf32>
    %100 = arith.addf %96, %99 : vector<1x256xf32>
    %101 = math.tanh %100 : vector<1x256xf32>
    %102 = arith.subf %74, %101 : vector<1x256xf32>
    %103 = arith.mulf %95, %102 : vector<1x256xf32>
    %104 = arith.addf %101, %103 : vector<1x256xf32>
    %105 = arith.truncf %104 : vector<1x256xf32> to vector<1x256xbf16>
    %c0_30 = arith.constant 0 : index
    %c0_31 = arith.constant 0 : index
    %106 = vector.load %arg4[%c0_30, %c0_31] : memref<256x768xbf16, #tpu.memory_space<vmem>>, vector<256x768xbf16>
    %cst_32 = arith.constant dense<0.000000e+00> : vector<1x768xf32>
    %107 = tpu.matmul %105, %106, %cst_32 {dimension_numbers = #tpu.dot_dimension_numbers<[1], [0], [0], [1], [0, 0, 1, 1], [], []>} : vector<1x256xbf16>, vector<256x768xbf16>, vector<1x768xf32> -> vector<1x768xf32>
    %108 = vector.extract_strided_slice %73 {offsets = [1, 0], sizes = [1, 768], strides = [1, 1]} : vector<8x768xf32> to vector<1x768xf32>
    %109 = vector.extract_strided_slice %108 {offsets = [0, 0], sizes = [1, 256], strides = [1, 1]} : vector<1x768xf32> to vector<1x256xf32>
    %110 = vector.extract_strided_slice %107 {offsets = [0, 0], sizes = [1, 256], strides = [1, 1]} : vector<1x768xf32> to vector<1x256xf32>
    %111 = arith.addf %109, %110 : vector<1x256xf32>
    %112 = arith.negf %111 : vector<1x256xf32>
    %113 = math.exp %112 : vector<1x256xf32>
    %cst_33 = arith.constant 1.000000e+00 : f32
    %114 = vector.broadcast %cst_33 : f32 to vector<1x256xf32>
    %115 = arith.addf %114, %113 : vector<1x256xf32>
    %116 = arith.divf %114, %115 : vector<1x256xf32>
    %117 = vector.extract_strided_slice %108 {offsets = [0, 256], sizes = [1, 256], strides = [1, 1]} : vector<1x768xf32> to vector<1x256xf32>
    %118 = vector.extract_strided_slice %107 {offsets = [0, 256], sizes = [1, 256], strides = [1, 1]} : vector<1x768xf32> to vector<1x256xf32>
    %119 = arith.addf %117, %118 : vector<1x256xf32>
    %120 = arith.negf %119 : vector<1x256xf32>
    %121 = math.exp %120 : vector<1x256xf32>
    %cst_34 = arith.constant 1.000000e+00 : f32
    %122 = vector.broadcast %cst_34 : f32 to vector<1x256xf32>
    %123 = arith.addf %122, %121 : vector<1x256xf32>
    %124 = arith.divf %122, %123 : vector<1x256xf32>
    %125 = vector.extract_strided_slice %108 {offsets = [0, 512], sizes = [1, 256], strides = [1, 1]} : vector<1x768xf32> to vector<1x256xf32>
    %126 = vector.extract_strided_slice %107 {offsets = [0, 512], sizes = [1, 256], strides = [1, 1]} : vector<1x768xf32> to vector<1x256xf32>
    %127 = arith.addf %126, %75 : vector<1x256xf32>
    %128 = arith.mulf %116, %127 : vector<1x256xf32>
    %129 = arith.addf %125, %128 : vector<1x256xf32>
    %130 = math.tanh %129 : vector<1x256xf32>
    %131 = arith.subf %104, %130 : vector<1x256xf32>
    %132 = arith.mulf %124, %131 : vector<1x256xf32>
    %133 = arith.addf %130, %132 : vector<1x256xf32>
    %134 = arith.truncf %133 : vector<1x256xf32> to vector<1x256xbf16>
    %c0_35 = arith.constant 0 : index
    %c0_36 = arith.constant 0 : index
    %135 = vector.load %arg4[%c0_35, %c0_36] : memref<256x768xbf16, #tpu.memory_space<vmem>>, vector<256x768xbf16>
    %cst_37 = arith.constant dense<0.000000e+00> : vector<1x768xf32>
    %136 = tpu.matmul %134, %135, %cst_37 {dimension_numbers = #tpu.dot_dimension_numbers<[1], [0], [0], [1], [0, 0, 1, 1], [], []>} : vector<1x256xbf16>, vector<256x768xbf16>, vector<1x768xf32> -> vector<1x768xf32>
    %137 = vector.extract_strided_slice %73 {offsets = [2, 0], sizes = [1, 768], strides = [1, 1]} : vector<8x768xf32> to vector<1x768xf32>
    %138 = vector.extract_strided_slice %137 {offsets = [0, 0], sizes = [1, 256], strides = [1, 1]} : vector<1x768xf32> to vector<1x256xf32>
    %139 = vector.extract_strided_slice %136 {offsets = [0, 0], sizes = [1, 256], strides = [1, 1]} : vector<1x768xf32> to vector<1x256xf32>
    %140 = arith.addf %138, %139 : vector<1x256xf32>
    %141 = arith.negf %140 : vector<1x256xf32>
    %142 = math.exp %141 : vector<1x256xf32>
    %cst_38 = arith.constant 1.000000e+00 : f32
    %143 = vector.broadcast %cst_38 : f32 to vector<1x256xf32>
    %144 = arith.addf %143, %142 : vector<1x256xf32>
    %145 = arith.divf %143, %144 : vector<1x256xf32>
    %146 = vector.extract_strided_slice %137 {offsets = [0, 256], sizes = [1, 256], strides = [1, 1]} : vector<1x768xf32> to vector<1x256xf32>
    %147 = vector.extract_strided_slice %136 {offsets = [0, 256], sizes = [1, 256], strides = [1, 1]} : vector<1x768xf32> to vector<1x256xf32>
    %148 = arith.addf %146, %147 : vector<1x256xf32>
    %149 = arith.negf %148 : vector<1x256xf32>
    %150 = math.exp %149 : vector<1x256xf32>
    %cst_39 = arith.constant 1.000000e+00 : f32
    %151 = vector.broadcast %cst_39 : f32 to vector<1x256xf32>
    %152 = arith.addf %151, %150 : vector<1x256xf32>
    %153 = arith.divf %151, %152 : vector<1x256xf32>
    %154 = vector.extract_strided_slice %137 {offsets = [0, 512], sizes = [1, 256], strides = [1, 1]} : vector<1x768xf32> to vector<1x256xf32>
    %155 = vector.extract_strided_slice %136 {offsets = [0, 512], sizes = [1, 256], strides = [1, 1]} : vector<1x768xf32> to vector<1x256xf32>
    %156 = arith.addf %155, %75 : vector<1x256xf32>
    %157 = arith.mulf %145, %156 : vector<1x256xf32>
    %158 = arith.addf %154, %157 : vector<1x256xf32>
    %159 = math.tanh %158 : vector<1x256xf32>
    %160 = arith.subf %133, %159 : vector<1x256xf32>
    %161 = arith.mulf %153, %160 : vector<1x256xf32>
    %162 = arith.addf %159, %161 : vector<1x256xf32>
    %163 = arith.truncf %162 : vector<1x256xf32> to vector<1x256xbf16>
    %c0_40 = arith.constant 0 : index
    %c0_41 = arith.constant 0 : index
    %164 = vector.load %arg4[%c0_40, %c0_41] : memref<256x768xbf16, #tpu.memory_space<vmem>>, vector<256x768xbf16>
    %cst_42 = arith.constant dense<0.000000e+00> : vector<1x768xf32>
    %165 = tpu.matmul %163, %164, %cst_42 {dimension_numbers = #tpu.dot_dimension_numbers<[1], [0], [0], [1], [0, 0, 1, 1], [], []>} : vector<1x256xbf16>, vector<256x768xbf16>, vector<1x768xf32> -> vector<1x768xf32>
    %166 = vector.extract_strided_slice %73 {offsets = [3, 0], sizes = [1, 768], strides = [1, 1]} : vector<8x768xf32> to vector<1x768xf32>
    %167 = vector.extract_strided_slice %166 {offsets = [0, 0], sizes = [1, 256], strides = [1, 1]} : vector<1x768xf32> to vector<1x256xf32>
    %168 = vector.extract_strided_slice %165 {offsets = [0, 0], sizes = [1, 256], strides = [1, 1]} : vector<1x768xf32> to vector<1x256xf32>
    %169 = arith.addf %167, %168 : vector<1x256xf32>
    %170 = arith.negf %169 : vector<1x256xf32>
    %171 = math.exp %170 : vector<1x256xf32>
    %cst_43 = arith.constant 1.000000e+00 : f32
    %172 = vector.broadcast %cst_43 : f32 to vector<1x256xf32>
    %173 = arith.addf %172, %171 : vector<1x256xf32>
    %174 = arith.divf %172, %173 : vector<1x256xf32>
    %175 = vector.extract_strided_slice %166 {offsets = [0, 256], sizes = [1, 256], strides = [1, 1]} : vector<1x768xf32> to vector<1x256xf32>
    %176 = vector.extract_strided_slice %165 {offsets = [0, 256], sizes = [1, 256], strides = [1, 1]} : vector<1x768xf32> to vector<1x256xf32>
    %177 = arith.addf %175, %176 : vector<1x256xf32>
    %178 = arith.negf %177 : vector<1x256xf32>
    %179 = math.exp %178 : vector<1x256xf32>
    %cst_44 = arith.constant 1.000000e+00 : f32
    %180 = vector.broadcast %cst_44 : f32 to vector<1x256xf32>
    %181 = arith.addf %180, %179 : vector<1x256xf32>
    %182 = arith.divf %180, %181 : vector<1x256xf32>
    %183 = vector.extract_strided_slice %166 {offsets = [0, 512], sizes = [1, 256], strides = [1, 1]} : vector<1x768xf32> to vector<1x256xf32>
    %184 = vector.extract_strided_slice %165 {offsets = [0, 512], sizes = [1, 256], strides = [1, 1]} : vector<1x768xf32> to vector<1x256xf32>
    %185 = arith.addf %184, %75 : vector<1x256xf32>
    %186 = arith.mulf %174, %185 : vector<1x256xf32>
    %187 = arith.addf %183, %186 : vector<1x256xf32>
    %188 = math.tanh %187 : vector<1x256xf32>
    %189 = arith.subf %162, %188 : vector<1x256xf32>
    %190 = arith.mulf %182, %189 : vector<1x256xf32>
    %191 = arith.addf %188, %190 : vector<1x256xf32>
    %192 = arith.truncf %191 : vector<1x256xf32> to vector<1x256xbf16>
    %c0_45 = arith.constant 0 : index
    %c0_46 = arith.constant 0 : index
    %193 = vector.load %arg4[%c0_45, %c0_46] : memref<256x768xbf16, #tpu.memory_space<vmem>>, vector<256x768xbf16>
    %cst_47 = arith.constant dense<0.000000e+00> : vector<1x768xf32>
    %194 = tpu.matmul %192, %193, %cst_47 {dimension_numbers = #tpu.dot_dimension_numbers<[1], [0], [0], [1], [0, 0, 1, 1], [], []>} : vector<1x256xbf16>, vector<256x768xbf16>, vector<1x768xf32> -> vector<1x768xf32>
    %195 = vector.extract_strided_slice %73 {offsets = [4, 0], sizes = [1, 768], strides = [1, 1]} : vector<8x768xf32> to vector<1x768xf32>
    %196 = vector.extract_strided_slice %195 {offsets = [0, 0], sizes = [1, 256], strides = [1, 1]} : vector<1x768xf32> to vector<1x256xf32>
    %197 = vector.extract_strided_slice %194 {offsets = [0, 0], sizes = [1, 256], strides = [1, 1]} : vector<1x768xf32> to vector<1x256xf32>
    %198 = arith.addf %196, %197 : vector<1x256xf32>
    %199 = arith.negf %198 : vector<1x256xf32>
    %200 = math.exp %199 : vector<1x256xf32>
    %cst_48 = arith.constant 1.000000e+00 : f32
    %201 = vector.broadcast %cst_48 : f32 to vector<1x256xf32>
    %202 = arith.addf %201, %200 : vector<1x256xf32>
    %203 = arith.divf %201, %202 : vector<1x256xf32>
    %204 = vector.extract_strided_slice %195 {offsets = [0, 256], sizes = [1, 256], strides = [1, 1]} : vector<1x768xf32> to vector<1x256xf32>
    %205 = vector.extract_strided_slice %194 {offsets = [0, 256], sizes = [1, 256], strides = [1, 1]} : vector<1x768xf32> to vector<1x256xf32>
    %206 = arith.addf %204, %205 : vector<1x256xf32>
    %207 = arith.negf %206 : vector<1x256xf32>
    %208 = math.exp %207 : vector<1x256xf32>
    %cst_49 = arith.constant 1.000000e+00 : f32
    %209 = vector.broadcast %cst_49 : f32 to vector<1x256xf32>
    %210 = arith.addf %209, %208 : vector<1x256xf32>
    %211 = arith.divf %209, %210 : vector<1x256xf32>
    %212 = vector.extract_strided_slice %195 {offsets = [0, 512], sizes = [1, 256], strides = [1, 1]} : vector<1x768xf32> to vector<1x256xf32>
    %213 = vector.extract_strided_slice %194 {offsets = [0, 512], sizes = [1, 256], strides = [1, 1]} : vector<1x768xf32> to vector<1x256xf32>
    %214 = arith.addf %213, %75 : vector<1x256xf32>
    %215 = arith.mulf %203, %214 : vector<1x256xf32>
    %216 = arith.addf %212, %215 : vector<1x256xf32>
    %217 = math.tanh %216 : vector<1x256xf32>
    %218 = arith.subf %191, %217 : vector<1x256xf32>
    %219 = arith.mulf %211, %218 : vector<1x256xf32>
    %220 = arith.addf %217, %219 : vector<1x256xf32>
    %221 = arith.truncf %220 : vector<1x256xf32> to vector<1x256xbf16>
    %c0_50 = arith.constant 0 : index
    %c0_51 = arith.constant 0 : index
    %222 = vector.load %arg4[%c0_50, %c0_51] : memref<256x768xbf16, #tpu.memory_space<vmem>>, vector<256x768xbf16>
    %cst_52 = arith.constant dense<0.000000e+00> : vector<1x768xf32>
    %223 = tpu.matmul %221, %222, %cst_52 {dimension_numbers = #tpu.dot_dimension_numbers<[1], [0], [0], [1], [0, 0, 1, 1], [], []>} : vector<1x256xbf16>, vector<256x768xbf16>, vector<1x768xf32> -> vector<1x768xf32>
    %224 = vector.extract_strided_slice %73 {offsets = [5, 0], sizes = [1, 768], strides = [1, 1]} : vector<8x768xf32> to vector<1x768xf32>
    %225 = vector.extract_strided_slice %224 {offsets = [0, 0], sizes = [1, 256], strides = [1, 1]} : vector<1x768xf32> to vector<1x256xf32>
    %226 = vector.extract_strided_slice %223 {offsets = [0, 0], sizes = [1, 256], strides = [1, 1]} : vector<1x768xf32> to vector<1x256xf32>
    %227 = arith.addf %225, %226 : vector<1x256xf32>
    %228 = arith.negf %227 : vector<1x256xf32>
    %229 = math.exp %228 : vector<1x256xf32>
    %cst_53 = arith.constant 1.000000e+00 : f32
    %230 = vector.broadcast %cst_53 : f32 to vector<1x256xf32>
    %231 = arith.addf %230, %229 : vector<1x256xf32>
    %232 = arith.divf %230, %231 : vector<1x256xf32>
    %233 = vector.extract_strided_slice %224 {offsets = [0, 256], sizes = [1, 256], strides = [1, 1]} : vector<1x768xf32> to vector<1x256xf32>
    %234 = vector.extract_strided_slice %223 {offsets = [0, 256], sizes = [1, 256], strides = [1, 1]} : vector<1x768xf32> to vector<1x256xf32>
    %235 = arith.addf %233, %234 : vector<1x256xf32>
    %236 = arith.negf %235 : vector<1x256xf32>
    %237 = math.exp %236 : vector<1x256xf32>
    %cst_54 = arith.constant 1.000000e+00 : f32
    %238 = vector.broadcast %cst_54 : f32 to vector<1x256xf32>
    %239 = arith.addf %238, %237 : vector<1x256xf32>
    %240 = arith.divf %238, %239 : vector<1x256xf32>
    %241 = vector.extract_strided_slice %224 {offsets = [0, 512], sizes = [1, 256], strides = [1, 1]} : vector<1x768xf32> to vector<1x256xf32>
    %242 = vector.extract_strided_slice %223 {offsets = [0, 512], sizes = [1, 256], strides = [1, 1]} : vector<1x768xf32> to vector<1x256xf32>
    %243 = arith.addf %242, %75 : vector<1x256xf32>
    %244 = arith.mulf %232, %243 : vector<1x256xf32>
    %245 = arith.addf %241, %244 : vector<1x256xf32>
    %246 = math.tanh %245 : vector<1x256xf32>
    %247 = arith.subf %220, %246 : vector<1x256xf32>
    %248 = arith.mulf %240, %247 : vector<1x256xf32>
    %249 = arith.addf %246, %248 : vector<1x256xf32>
    %250 = arith.truncf %249 : vector<1x256xf32> to vector<1x256xbf16>
    %c0_55 = arith.constant 0 : index
    %c0_56 = arith.constant 0 : index
    %251 = vector.load %arg4[%c0_55, %c0_56] : memref<256x768xbf16, #tpu.memory_space<vmem>>, vector<256x768xbf16>
    %cst_57 = arith.constant dense<0.000000e+00> : vector<1x768xf32>
    %252 = tpu.matmul %250, %251, %cst_57 {dimension_numbers = #tpu.dot_dimension_numbers<[1], [0], [0], [1], [0, 0, 1, 1], [], []>} : vector<1x256xbf16>, vector<256x768xbf16>, vector<1x768xf32> -> vector<1x768xf32>
    %253 = vector.extract_strided_slice %73 {offsets = [6, 0], sizes = [1, 768], strides = [1, 1]} : vector<8x768xf32> to vector<1x768xf32>
    %254 = vector.extract_strided_slice %253 {offsets = [0, 0], sizes = [1, 256], strides = [1, 1]} : vector<1x768xf32> to vector<1x256xf32>
    %255 = vector.extract_strided_slice %252 {offsets = [0, 0], sizes = [1, 256], strides = [1, 1]} : vector<1x768xf32> to vector<1x256xf32>
    %256 = arith.addf %254, %255 : vector<1x256xf32>
    %257 = arith.negf %256 : vector<1x256xf32>
    %258 = math.exp %257 : vector<1x256xf32>
    %cst_58 = arith.constant 1.000000e+00 : f32
    %259 = vector.broadcast %cst_58 : f32 to vector<1x256xf32>
    %260 = arith.addf %259, %258 : vector<1x256xf32>
    %261 = arith.divf %259, %260 : vector<1x256xf32>
    %262 = vector.extract_strided_slice %253 {offsets = [0, 256], sizes = [1, 256], strides = [1, 1]} : vector<1x768xf32> to vector<1x256xf32>
    %263 = vector.extract_strided_slice %252 {offsets = [0, 256], sizes = [1, 256], strides = [1, 1]} : vector<1x768xf32> to vector<1x256xf32>
    %264 = arith.addf %262, %263 : vector<1x256xf32>
    %265 = arith.negf %264 : vector<1x256xf32>
    %266 = math.exp %265 : vector<1x256xf32>
    %cst_59 = arith.constant 1.000000e+00 : f32
    %267 = vector.broadcast %cst_59 : f32 to vector<1x256xf32>
    %268 = arith.addf %267, %266 : vector<1x256xf32>
    %269 = arith.divf %267, %268 : vector<1x256xf32>
    %270 = vector.extract_strided_slice %253 {offsets = [0, 512], sizes = [1, 256], strides = [1, 1]} : vector<1x768xf32> to vector<1x256xf32>
    %271 = vector.extract_strided_slice %252 {offsets = [0, 512], sizes = [1, 256], strides = [1, 1]} : vector<1x768xf32> to vector<1x256xf32>
    %272 = arith.addf %271, %75 : vector<1x256xf32>
    %273 = arith.mulf %261, %272 : vector<1x256xf32>
    %274 = arith.addf %270, %273 : vector<1x256xf32>
    %275 = math.tanh %274 : vector<1x256xf32>
    %276 = arith.subf %249, %275 : vector<1x256xf32>
    %277 = arith.mulf %269, %276 : vector<1x256xf32>
    %278 = arith.addf %275, %277 : vector<1x256xf32>
    %279 = arith.truncf %278 : vector<1x256xf32> to vector<1x256xbf16>
    %c0_60 = arith.constant 0 : index
    %c0_61 = arith.constant 0 : index
    %280 = vector.load %arg4[%c0_60, %c0_61] : memref<256x768xbf16, #tpu.memory_space<vmem>>, vector<256x768xbf16>
    %cst_62 = arith.constant dense<0.000000e+00> : vector<1x768xf32>
    %281 = tpu.matmul %279, %280, %cst_62 {dimension_numbers = #tpu.dot_dimension_numbers<[1], [0], [0], [1], [0, 0, 1, 1], [], []>} : vector<1x256xbf16>, vector<256x768xbf16>, vector<1x768xf32> -> vector<1x768xf32>
    %282 = vector.extract_strided_slice %73 {offsets = [7, 0], sizes = [1, 768], strides = [1, 1]} : vector<8x768xf32> to vector<1x768xf32>
    %283 = vector.extract_strided_slice %282 {offsets = [0, 0], sizes = [1, 256], strides = [1, 1]} : vector<1x768xf32> to vector<1x256xf32>
    %284 = vector.extract_strided_slice %281 {offsets = [0, 0], sizes = [1, 256], strides = [1, 1]} : vector<1x768xf32> to vector<1x256xf32>
    %285 = arith.addf %283, %284 : vector<1x256xf32>
    %286 = arith.negf %285 : vector<1x256xf32>
    %287 = math.exp %286 : vector<1x256xf32>
    %cst_63 = arith.constant 1.000000e+00 : f32
    %288 = vector.broadcast %cst_63 : f32 to vector<1x256xf32>
    %289 = arith.addf %288, %287 : vector<1x256xf32>
    %290 = arith.divf %288, %289 : vector<1x256xf32>
    %291 = vector.extract_strided_slice %282 {offsets = [0, 256], sizes = [1, 256], strides = [1, 1]} : vector<1x768xf32> to vector<1x256xf32>
    %292 = vector.extract_strided_slice %281 {offsets = [0, 256], sizes = [1, 256], strides = [1, 1]} : vector<1x768xf32> to vector<1x256xf32>
    %293 = arith.addf %291, %292 : vector<1x256xf32>
    %294 = arith.negf %293 : vector<1x256xf32>
    %295 = math.exp %294 : vector<1x256xf32>
    %cst_64 = arith.constant 1.000000e+00 : f32
    %296 = vector.broadcast %cst_64 : f32 to vector<1x256xf32>
    %297 = arith.addf %296, %295 : vector<1x256xf32>
    %298 = arith.divf %296, %297 : vector<1x256xf32>
    %299 = vector.extract_strided_slice %282 {offsets = [0, 512], sizes = [1, 256], strides = [1, 1]} : vector<1x768xf32> to vector<1x256xf32>
    %300 = vector.extract_strided_slice %281 {offsets = [0, 512], sizes = [1, 256], strides = [1, 1]} : vector<1x768xf32> to vector<1x256xf32>
    %301 = arith.addf %300, %75 : vector<1x256xf32>
    %302 = arith.mulf %290, %301 : vector<1x256xf32>
    %303 = arith.addf %299, %302 : vector<1x256xf32>
    %304 = math.tanh %303 : vector<1x256xf32>
    %305 = arith.subf %278, %304 : vector<1x256xf32>
    %306 = arith.mulf %298, %305 : vector<1x256xf32>
    %307 = arith.addf %304, %306 : vector<1x256xf32>
    %308 = tpu.concatenate %104, %133, %162, %191, %220, %249, %278, %307 in 0 : vector<1x256xf32>, vector<1x256xf32>, vector<1x256xf32>, vector<1x256xf32>, vector<1x256xf32>, vector<1x256xf32>, vector<1x256xf32>, vector<1x256xf32> -> vector<8x256xf32>
    %c0_65 = arith.constant 0 : index
    %c0_66 = arith.constant 0 : index
    %309 = vector.load %arg7[%c0_65, %c0_66] : memref<8x256xf32, #tpu.memory_space<vmem>>, vector<8x256xf32>
    tpu.vector_store %arg7[%c0_65, %c0_66], %308 {strides = array<i32>} : memref<8x256xf32, #tpu.memory_space<vmem>>, vector<8x256xf32>,
    return
  }
}

</mosaic_0001>

<bundles_post_ra>
// kernel: tpu_custom_call.1
= control target key start
LH: loop header
LB: loop body
LE: loop exit
PB: predicated region body
PF: predicated region fallthrough
CT: control target
= control target key end

     0   :  { %12 = vsyncpa [#allocation5], 0  ;;  %s6953_s0 = inlined_call_operand.hbm [shape: s32[8], index: 0, kind: input, shape index: {}]   ;;  %s6954_s1 = inlined_call_operand.hbm [shape: bf16[64,256], index: 1, kind: input, shape index: {}]   ;;  %s6955_s2 = inlined_call_operand.hbm [shape: f32[1,256], index: 2, kind: input, shape index: {}]   ;;  %s6956_s3 = inlined_call_operand.hbm [shape: bf16[256,768], index: 3, kind: input, shape index: {}]   ;;  %s6957_s4 = inlined_call_operand.hbm [shape: bf16[256,768], index: 4, kind: input, shape index: {}]   ;;  %s6958_s5 = inlined_call_operand.hbm [shape: f32[1,768], index: 5, kind: input, shape index: {}]   ;;  %s6959_s6 = inlined_call_operand.vmem [shape: f32[1,256], index: 6, kind: input, shape index: {}]   ;;  %s6960_s7 = inlined_call_operand.hbm [shape: f32[8,256], index: 7, kind: output, shape index: {}]  }
   0x1   :  { %13 = vsyncpa [#allocation3], 0 }
   0x2   :  { %14 = vsyncpa [#allocation8], 0 }
   0x3   :  { %15 = vsyncpa [#allocation11], 0  ;;  %s44_s26 = sshll.u32 %s6955_s2, 4  ;;  %s45_s26 = int_to_ptr.hbm [resolvable:$true] %s44_s26 }
   0x4   :  { %16 = vsyncpa [#allocation4], 0  ;;  %s5406_s27 = smov [#allocation7]   ;;  %s67_s8 = sshll.u32 %s6957_s4, 4  ;;  %s68_s8 = int_to_ptr.hbm [resolvable:$true] %s67_s8 }
   0x5   :  { %s46_s28 = sshll.u32 %s5406_s27, 4  ;;  %s5407_s9 = smov [#allocation10]   ;;  %s47_s28 = int_to_ptr.vmem [resolvable:$true] %s46_s28 }
   0x6   :  { %49 = dma.hbm_to_vmem [thread:$0]  %s45_s26, 32, %s47_s28, [#allocation8]  }
   0x7   :  { %s69_s10 = sshll.u32 %s5407_s9, 4  ;;  %s22_s13 = sshll.u32 %s6953_s0, 4  ;;  %s70_s10 = int_to_ptr.vmem [resolvable:$true] %s69_s10  ;;  %s23_s13 = int_to_ptr.hbm [resolvable:$true] %s22_s13 }
   0x8   :  { %s5408_s2 = smov 384   ;;  %s5409_s14 = smov 24  }
   0x9   :  { %75 = dma.hbm_to_vmem [thread:$0]  %s68_s8, 12288, %s70_s10, [#allocation11], %s5408_s2, %s5408_s2, %s5409_s14  }
   0xa   :  { %s30_s17 = sshll.u32 %s6954_s1, 4  ;;  %s5410_s18 = smov [#allocation2]   ;;  %s31_s17 = int_to_ptr.hbm [resolvable:$true] %s30_s17 }
   0xb   :  { %25 = dma.hbm_to_smem %s23_s13, 16, %s5410_s18, [#allocation5]  }
   0xc   :  { %s5411_s4 = smov [#allocation6]   ;;  %s5412_s20 = smov 128  }
   0xd   :  { %s32_s19 = sshll.u32 %s5411_s4, 4  ;;  %s5413_s21 = smov 8   ;;  %s33_s19 = int_to_ptr.vmem [resolvable:$true] %s32_s19 }
   0xe   :  { %38 = dma.hbm_to_vmem [thread:$0]  %s31_s17, 1024, %s33_s19, [#allocation3], %s5412_s20, %s5412_s20, %s5413_s21  }
   0xf   :  { %s54_s23 = sshll.u32 %s6956_s3, 4  ;;  %s5414_s24 = smov [#allocation9]   ;;  %s55_s23 = int_to_ptr.hbm [resolvable:$true] %s54_s23 }
  0x10   :  { %s56_s25 = sshll.u32 %s5414_s24, 4  ;;  %s81_s1 = sshll.u32 %s6958_s5, 4  ;;  %s57_s25 = int_to_ptr.vmem [resolvable:$true] %s56_s25  ;;  %s82_s1 = int_to_ptr.hbm [resolvable:$true] %s81_s1 }
  0x11   :  { %62 = dma.hbm_to_vmem [thread:$0]  %s55_s23, 12288, %s57_s25, [#allocation8], %s5408_s2, %s5408_s2, %s5409_s14  }
  0x12   :  { %s5415_s28 = smov [#allocation12]  }
  0x13   :  { %s83_s29 = sshll.u32 %s5415_s28, 4  ;;  %s84_s29 = int_to_ptr.vmem [resolvable:$true] %s83_s29 }
  0x14   :  { %86 = dma.hbm_to_vmem [thread:$0]  %s82_s1, 96, %s84_s29, [#allocation11]  }
  0x15   :  { %5396 = dma.done.wait [#allocation5], 16  }
  0x16   :  { %5397 = vsyncadd [#allocation5], 4294967280 }
  0x17   :  { %5398 = dma.done.wait [#allocation3], 1024  }
  0x18   :  { %5399 = vsyncadd [#allocation3], 4294966272 }
  0x19   :  { %5400 = dma.done.wait [#allocation8], 12320  }
  0x1a   :  { %5401 = vsyncadd [#allocation8], 4294954976 }
  0x1b   :  { %5402 = dma.done.wait [#allocation11], 12384  }
  0x1c   :  { %5403 = vsyncadd [#allocation11], 4294954912 }
  0x1d   :  { %113 = sfence }
  0x1e   :  { %v4044_v0 = vld [vmem:[#allocation6 + $0x30] sm:$0xf]  ;;  %v4875_v1 = vld [vmem:[#allocation6 + $0x34] sm:$0xf0]  ;;  %v4874_v2 = vld [vmem:[#allocation6 + $0x34] sm:$0xf]  ;;  %v115_v22 = vlaneseq }
  0x1f   :  { %v4045_v3 = vor.u32 %v4875_v1, %v4044_v0  ;;  %v4046_v4 = vld [vmem:[#allocation6 + $0x38] sm:$0xf0]  ;;  %v4036_v5 = vld [vmem:[#allocation6 + $0x20] sm:$0xf]  ;;  %v4873_v6 = vld [vmem:[#allocation6 + $0x24] sm:$0xf0] }
  0x20   :  { %v4049_v7 = vor.u32 %v4874_v2, %v4046_v4  ;;  %v4872_v8 = vld [vmem:[#allocation6 + $0x24] sm:$0xf]  ;;  %v4038_v9 = vld [vmem:[#allocation6 + $0x28] sm:$0xf0]  ;;  %v4037_v10 = vor.u32 %v4873_v6, %v4036_v5  ;;  %v4028_v12 = vld [vmem:[#allocation6 + $0x10] sm:$0xf] }
  0x21   :  { %284 = vmatpush.bf16.msra.mxu0 %v4045_v3  ;;  %v4041_v11 = vor.u32 %v4872_v8, %v4038_v9  ;;  %v4871_v13 = vld [vmem:[#allocation6 + $0x14] sm:$0xf0]  ;;  %v4870_v14 = vld [vmem:[#allocation6 + $0x14] sm:$0xf]  ;;  %v4030_v15 = vld [vmem:[#allocation6 + $0x18] sm:$0xf0] }
  0x22   :  { %297 = vmatpush.bf16.msra.mxu1 %v4049_v7  ;;  %s117_s3 = sld [smem:[#allocation2]]  ;;  %v4029_v16 = vor.u32 %v4871_v13, %v4028_v12  ;;  %v4033_v17 = vor.u32 %v4870_v14, %v4030_v15  ;;  %v4020_v18 = vld [vmem:[#allocation6] sm:$0xf]  ;;  %v4869_v19 = vld [vmem:[#allocation6 + $0x4] sm:$0xf0]  ;;  %v5484_v25 = vand.u32 127, %v115_v22 }
  0x23   :  { %s3969_s5 = sld [smem:[#allocation2 + $0x1]]  ;;  %v4868_v20 = vld [vmem:[#allocation6 + $0x4] sm:$0xf]  ;;  %v4022_v21 = vld [vmem:[#allocation6 + $0x8] sm:$0xf0]  ;;  %v4021_v23 = vor.u32 %v4869_v19, %v4020_v18  ;;  %vm197_vm3 = vcmask 1040384  }
  0x24   :  { %s5476_s30 = sld [smem:[#allocation2 + $0x2]]  ;;  %v4025_v24 = vor.u32 %v4868_v20, %v4022_v21  ;;  %vm198_vm0 = vsmask.f32 256  ;;  %v4222_v26 = vld [vmem:[#allocation9 + $0x150] sm:$0xf]  ;;  %v5416_v44 = vmov 0.0  }
  0x25   :  { %285 = vmatpush.bf16.msra.mxu0 %v4037_v10  ;;  %s5478_s8 = sld [smem:[#allocation2 + $0x3]]  ;;  %v4921_v27 = vld [vmem:[#allocation9 + $0x164] sm:$0xf0]  ;;  %v4414_v30 = vld [vmem:[#allocation9 + $0x2d0] sm:$0xf]  ;;  %vm5543_vm7 = vmand %vm197_vm3, %vm198_vm0  ;;  %vm206_vm8 = vcmask 1041408  }
  0x26   :  { %298 = vmatpush.bf16.msra.mxu1 %v4041_v11  ;;  %s5480_s9 = sld [smem:[#allocation2 + $0x4]]  ;;  %v4223_v29 = vor.u32 %v4921_v27, %v4222_v26  ;;  %v4969_v31 = vld [vmem:[#allocation9 + $0x2e4] sm:$0xf0]  ;;  %v4918_v35 = vld [vmem:[#allocation9 + $0x154] sm:$0xf]  ;;  %vm215_vm9 = vcmask 1042432  }
  0x27   :  { %s5482_s10 = sld [smem:[#allocation2 + $0x5]]  ;;  %v4415_v34 = vor.u32 %v4969_v31, %v4414_v30  ;;  %v4224_v36 = vld [vmem:[#allocation9 + $0x168] sm:$0xf0]  ;;  %v4966_v39 = vld [vmem:[#allocation9 + $0x2d4] sm:$0xf]  ;;  %vm224_vm0 = vcmask 1043456  }
  0x28   :  { %p118_p0 = scmp.gt.s32.totalorder %s117_s3, 0  ;;  %p3963_p1 = scmp.lt.s32.totalorder %s117_s3, 63  ;;  %898 = vmatpush.bf16.msra.mxu2 %v4223_v29  ;;  %v4227_v38 = vor.u32 %v4918_v35, %v4224_v36  ;;  %v4416_v40 = vld [vmem:[#allocation9 + $0x2e8] sm:$0xf0]  ;;  %v4198_v42 = vld [vmem:[#allocation9 + $0x120] sm:$0xf] }
  0x29   :  { %286 = vmatpush.bf16.msra.mxu0 %v4029_v16  ;;  %p128_p2 = scmp.gt.s32.totalorder %s3969_s5, 0  ;;  %p3970_p3 = scmp.lt.s32.totalorder %s3969_s5, 63  ;;  %911 = vmatpush.bf16.msra.mxu3 %v4415_v34  ;;  %v4419_v41 = vor.u32 %v4966_v39, %v4416_v40  ;;  %v4915_v43 = vld [vmem:[#allocation9 + $0x134] sm:$0xf0]  ;;  %vm207_vm4 = vsmask.f32 1280 }
  0x2a   :  { %299 = vmatpush.bf16.msra.mxu1 %v4033_v17  ;;  %s7719_s3 = smov (!%p118_p0, %s117_s3), 0  ;;  %p138_p4 = scmp.gt.s32.totalorder %s5476_s30, 0  ;;  %v4199_v46 = vor.u32 %v4915_v43, %v4198_v42  ;;  %v4390_v47 = vld [vmem:[#allocation9 + $0x2a0] sm:$0xf]  ;;  %v4963_v48 = vld [vmem:[#allocation9 + $0x2b4] sm:$0xf0]  ;;  %vm5566_vm13 = vmand %vm206_vm8, %vm207_vm4 }
  0x2b   :  { %s7721_s5 = smov (!%p128_p2, %s3969_s5), 0  ;;  %s7723_s3 = smov (!%p3963_p1, %s7719_s3), 63  ;;  %v4391_v50 = vor.u32 %v4963_v48, %v4390_v47  ;;  %v4912_v51 = vld [vmem:[#allocation9 + $0x124] sm:$0xf]  ;;  %v4200_v52 = vld [vmem:[#allocation9 + $0x138] sm:$0xf0] }
  0x2c   :  { %s7725_s5 = smov (!%p3970_p3, %s7721_s5), 63  ;;  %v122_v28 = vstv %s7723_s3  ;;  %p3977_p5 = scmp.lt.s32.totalorder %s5476_s30, 63  ;;  %899 = vmatpush.bf16.msra.mxu2 %v4199_v46  ;;  %v4203_v54 = vor.u32 %v4912_v51, %v4200_v52  ;;  %v4960_v55 = vld [vmem:[#allocation9 + $0x2a4] sm:$0xf]  ;;  %v4392_v56 = vld [vmem:[#allocation9 + $0x2b8] sm:$0xf0] }
  0x2d   :  { %287 = vmatpush.bf16.msra.mxu0 %v4021_v23  ;;  %vm5489_vm1 = vcmp.eq.s32.totalorder %v5484_v25, %v122_v28  ;;  %v132_v33 = vstv %s7725_s5  ;;  %p148_p6 = scmp.gt.s32.totalorder %s5478_s8, 0  ;;  %p3984_p7 = scmp.lt.s32.totalorder %s5478_s8, 63  ;;  %912 = vmatpush.bf16.msra.mxu3 %v4391_v50  ;;  %v4395_v59 = vor.u32 %v4960_v55, %v4392_v56  ;;  %v4174_v60 = vld [vmem:[#allocation9 + $0xf0] sm:$0xf]  ;;  %v4909_v61 = vld [vmem:[#allocation9 + $0x104] sm:$0xf0] }
  0x2e   :  { %300 = vmatpush.bf16.msra.mxu1 %v4025_v24  ;;  %vm5496_vm2 = vcmp.eq.s32.totalorder %v5484_v25, %v132_v33  ;;  %s139_s11 = scalar_select %p138_p4, %s5476_s30, 0  ;;  %v5505_v45 = vsel %vm5489_vm1, 1.0, %v5416_v44  ;;  %v4175_v63 = vor.u32 %v4909_v61, %v4174_v60  ;;  %v4366_v0 = vld [vmem:[#allocation9 + $0x270] sm:$0xf]  ;;  %v4957_v1 = vld [vmem:[#allocation9 + $0x284] sm:$0xf0] }
  0x2f   :  { %s149_s12 = scalar_select %p148_p6, %s5478_s8, 0  ;;  %v3975_v49 = vsel %vm5496_vm2, 1.0, %v5416_v44  ;;  %v126_v2 = vpack.c.bf16 %v5505_v45, %v5505_v45  ;;  %v4367_v5 = vor.u32 %v4957_v1, %v4366_v0  ;;  %v4906_v6 = vld [vmem:[#allocation9 + $0xf4] sm:$0xf]  ;;  %v4176_v7 = vld [vmem:[#allocation9 + $0x108] sm:$0xf0] }
  0x30   :  { %s7727_s11 = smov (!%p3977_p5, %s139_s11), 63  ;;  %p158_p8 = scmp.gt.s32.totalorder %s5480_s9, 0  ;;  %v136_v3 = vpack.c.bf16 %v3975_v49, %v3975_v49  ;;  %900 = vmatpush.bf16.msra.mxu2 %v4175_v63  ;;  %v4179_v9 = vor.u32 %v4906_v6, %v4176_v7  ;;  %v4954_v10 = vld [vmem:[#allocation9 + $0x274] sm:$0xf]  ;;  %v4368_v11 = vld [vmem:[#allocation9 + $0x288] sm:$0xf0] }
  0x31   :  { %924 = vmatpush.bf16.msrb.mxu0 %v4227_v38  ;;  %s7729_s12 = smov (!%p3984_p7, %s149_s12), 63  ;;  %v142_v53 = vstv %s7727_s11  ;;  %p3991_p9 = scmp.lt.s32.totalorder %s5480_s9, 63  ;;  %913 = vmatpush.bf16.msra.mxu3 %v4367_v5  ;;  %v4371_v13 = vor.u32 %v4954_v10, %v4368_v11  ;;  %v4150_v14 = vld [vmem:[#allocation9 + $0xc0] sm:$0xf]  ;;  %v4903_v15 = vld [vmem:[#allocation9 + $0xd4] sm:$0xf0] }
  0x32   :  { %937 = vmatpush.bf16.msrb.mxu1 %v4419_v41  ;;  %vm5517_vm5 = vcmp.eq.s32.totalorder %v5484_v25, %v142_v53  ;;  %v152_v58 = vstv %s7729_s12  ;;  %p168_p10 = scmp.gt.s32.totalorder %s5482_s10, 0  ;;  %p3998_p11 = scmp.lt.s32.totalorder %s5482_s10, 63  ;;  %v4151_v18 = vor.u32 %v4903_v15, %v4150_v14  ;;  %v4342_v19 = vld [vmem:[#allocation9 + $0x240] sm:$0xf]  ;;  %v4951_v20 = vld [vmem:[#allocation9 + $0x254] sm:$0xf0]  ;;  %v200_v22 = vsel %vm5543_vm7, %v126_v2, %v136_v3 }
  0x33   :  { %vm5524_vm6 = vcmp.eq.s32.totalorder %v5484_v25, %v152_v58  ;;  %s159_s13 = scalar_select %p158_p8, %s5480_s9, 0  ;;  %v3982_v4 = vsel %vm5517_vm5, 1.0, %v5416_v44  ;;  %v4343_v23 = vor.u32 %v4951_v20, %v4342_v19  ;;  %v4900_v24 = vld [vmem:[#allocation9 + $0xc4] sm:$0xf]  ;;  %v4152_v26 = vld [vmem:[#allocation9 + $0xd8] sm:$0xf0] }
  0x34   :  { %s169_s2 = scalar_select %p168_p10, %s5482_s10, 0  ;;  %v3989_v12 = vsel %vm5524_vm6, 1.0, %v5416_v44  ;;  %v146_v16 = vpack.c.bf16 %v3982_v4, %v3982_v4  ;;  %vm216_vm12 = vsmask.f32 2304  ;;  %901 = vmatpush.bf16.msra.mxu2 %v4151_v18  ;;  %v4155_v27 = vor.u32 %v4900_v24, %v4152_v26  ;;  %v4948_v28 = vld [vmem:[#allocation9 + $0x244] sm:$0xf] }
  0x35   :  { %925 = vmatpush.bf16.msrb.mxu0 %v4203_v54  ;;  %s7731_s13 = smov (!%p3991_p9, %s159_s13), 63  ;;  %s5552_s14 = sld [smem:[#allocation2 + $0x6]]  ;;  %v4344_v29 = vld [vmem:[#allocation9 + $0x258] sm:$0xf0]  ;;  %v156_v30 = vpack.c.bf16 %v3989_v12, %v3989_v12  ;;  %914 = vmatpush.bf16.msra.mxu3 %v4343_v23  ;;  %v4126_v35 = vld [vmem:[#allocation9 + $0x90] sm:$0xf]  ;;  %vm5588_vm15 = vmand %vm215_vm9, %vm216_vm12 }
  0x36   :  { %938 = vmatpush.bf16.msrb.mxu1 %v4395_v59  ;;  %s7733_s2 = smov (!%p3998_p11, %s169_s2), 63  ;;  %v162_v17 = vstv %s7731_s13  ;;  %s5555_s15 = sld [smem:[#allocation2 + $0x7]]  ;;  %v4347_v34 = vor.u32 %v4948_v28, %v4344_v29  ;;  %v4897_v36 = vld [vmem:[#allocation9 + $0xa4] sm:$0xf0]  ;;  %v204_v37 = vsel %vm197_vm3, %v200_v22, %v146_v16  ;;  %vm225_vm14 = vsmask.f32 3328 }
  0x37   :  { %vm163_vm10 = vcmp.eq.s32.totalorder %v5484_v25, %v162_v17  ;;  %v172_v21 = vstv %s7733_s2  ;;  %v4127_v38 = vor.u32 %v4897_v36, %v4126_v35  ;;  %v4318_v39 = vld [vmem:[#allocation9 + $0x210] sm:$0xf]  ;;  %v4945_v40 = vld [vmem:[#allocation9 + $0x224] sm:$0xf0]  ;;  %v4894_v41 = vld [vmem:[#allocation9 + $0x94] sm:$0xf]  ;;  %v209_v52 = vsel %vm5566_vm13, %v204_v37, %v156_v30 }
  0x38   :  { %vm173_vm11 = vcmp.eq.s32.totalorder %v5484_v25, %v172_v21  ;;  %v3996_v31 = vsel %vm163_vm10, 1.0, %v5416_v44  ;;  %v4319_v42 = vor.u32 %v4945_v40, %v4318_v39  ;;  %v4128_v43 = vld [vmem:[#allocation9 + $0xa8] sm:$0xf0]  ;;  %v4942_v45 = vld [vmem:[#allocation9 + $0x214] sm:$0xf]  ;;  %vm5602_vm4 = vmand %vm224_vm0, %vm225_vm14  ;;  %vm276_vm5 = vcmask 523264  }
  0x39   :  { %926 = vmatpush.bf16.msrb.mxu0 %v4179_v9  ;;  %v5562_v32 = vsel %vm173_vm11, 1.0, %v5416_v44  ;;  %v4320_v46 = vld [vmem:[#allocation9 + $0x228] sm:$0xf0]  ;;  %v166_v47 = vpack.c.bf16 %v3996_v31, %v3996_v31  ;;  %902 = vmatpush.bf16.msra.mxu2 %v4127_v38  ;;  %v4131_v48 = vor.u32 %v4894_v41, %v4128_v43  ;;  %v4102_v50 = vld [vmem:[#allocation9 + $0x60] sm:$0xf]  ;;  %s3950_s22 = sshll.u32 %s6960_s7, 4  ;;  %s3951_s22 = int_to_ptr.hbm [resolvable:$true] %s3950_s22 }
  0x3a   :  { %939 = vmatpush.bf16.msrb.mxu1 %v4371_v13  ;;  %v4323_v49 = vor.u32 %v4942_v45, %v4320_v46  ;;  %v4891_v51 = vld [vmem:[#allocation9 + $0x74] sm:$0xf0]  ;;  %915 = vmatpush.bf16.msra.mxu3 %v4319_v42  ;;  %v4294_v54 = vld [vmem:[#allocation9 + $0x1e0] sm:$0xf]  ;;  %v4888_v57 = vld [vmem:[#allocation9 + $0x64] sm:$0xf]  ;;  %v176_v59 = vpack.c.bf16 %v5562_v32, %v5562_v32 }
  0x3b   :  { %p178_p12 = scmp.gt.s32.totalorder %s5552_s14, 0  ;;  %p4005_p13 = scmp.lt.s32.totalorder %s5552_s14, 63  ;;  %v4103_v53 = vor.u32 %v4891_v51, %v4102_v50  ;;  %v4939_v55 = vld [vmem:[#allocation9 + $0x1f4] sm:$0xf0]  ;;  %v4104_v58 = vld [vmem:[#allocation9 + $0x78] sm:$0xf0]  ;;  %v213_v63 = vsel %vm206_vm8, %v209_v52, %v166_v47 }
  0x3c   :  { %p188_p0 = scmp.gt.s32.totalorder %s5555_s15, 0  ;;  %p4012_p1 = scmp.lt.s32.totalorder %s5555_s15, 63  ;;  %v4295_v56 = vor.u32 %v4939_v55, %v4294_v54  ;;  %v4107_v60 = vor.u32 %v4888_v57, %v4104_v58  ;;  %v4936_v61 = vld [vmem:[#allocation9 + $0x1e4] sm:$0xf]  ;;  %v4296_v62 = vld [vmem:[#allocation9 + $0x1f8] sm:$0xf0]  ;;  %v218_v13 = vsel %vm5588_vm15, %v213_v63, %v176_v59 }
  0x3d   :  { %927 = vmatpush.bf16.msrb.mxu0 %v4155_v27  ;;  %s179_s16 = scalar_select %p178_p12, %s5552_s14, 0  ;;  %903 = vmatpush.bf16.msra.mxu2 %v4103_v53  ;;  %v4299_v1 = vor.u32 %v4936_v61, %v4296_v62  ;;  %v4078_v2 = vld [vmem:[#allocation9 + $0x30] sm:$0xf]  ;;  %v4885_v3 = vld [vmem:[#allocation9 + $0x44] sm:$0xf0] }
  0x3e   :  { %940 = vmatpush.bf16.msrb.mxu1 %v4347_v34  ;;  %s189_s17 = scalar_select %p188_p0, %s5555_s15, 0  ;;  %916 = vmatpush.bf16.msra.mxu3 %v4295_v56  ;;  %v4079_v4 = vor.u32 %v4885_v3, %v4078_v2  ;;  %v4270_v5 = vld [vmem:[#allocation9 + $0x1b0] sm:$0xf]  ;;  %v4933_v6 = vld [vmem:[#allocation9 + $0x1c4] sm:$0xf0] }
  0x3f   :  { %s7735_s16 = smov (!%p4005_p13, %s179_s16), 63  ;;  %v4271_v8 = vor.u32 %v4933_v6, %v4270_v5  ;;  %v4882_v9 = vld [vmem:[#allocation9 + $0x34] sm:$0xf]  ;;  %v4080_v10 = vld [vmem:[#allocation9 + $0x48] sm:$0xf0] }
  0x40   :  { %s7737_s17 = smov (!%p4012_p1, %s189_s17), 63  ;;  %v182_v7 = vstv %s7735_s16  ;;  %v4930_v11 = vld [vmem:[#allocation9 + $0x1b4] sm:$0xf]  ;;  %v4083_v14 = vor.u32 %v4882_v9, %v4080_v10  ;;  %v4272_v15 = vld [vmem:[#allocation9 + $0x1c8] sm:$0xf0] }
  0x41   :  { %928 = vmatpush.bf16.msrb.mxu0 %v4131_v48  ;;  %vm183_vm1 = vcmp.eq.s32.totalorder %v5484_v25, %v182_v7  ;;  %v192_v12 = vstv %s7737_s17  ;;  %v4054_v16 = vld [vmem:[#allocation9] sm:$0xf]  ;;  %v4879_v17 = vld [vmem:[#allocation9 + $0x14] sm:$0xf0]  ;;  %904 = vmatpush.bf16.msra.mxu2 %v4079_v4  ;;  %v4275_v19 = vor.u32 %v4930_v11, %v4272_v15  ;;  %v4876_v27 = vld [vmem:[#allocation9 + $0x4] sm:$0xf] }
  0x42   :  { %941 = vmatpush.bf16.msrb.mxu1 %v4323_v49  ;;  %v4010_v18 = vsel %vm183_vm1, 1.0, %v5416_v44  ;;  %vm193_vm2 = vcmp.eq.s32.totalorder %v5484_v25, %v192_v12  ;;  %v4055_v20 = vor.u32 %v4879_v17, %v4054_v16  ;;  %v4246_v21 = vld [vmem:[#allocation9 + $0x180] sm:$0xf]  ;;  %v4927_v22 = vld [vmem:[#allocation9 + $0x194] sm:$0xf0]  ;;  %917 = vmatpush.bf16.msra.mxu3 %v4271_v8 }
  0x43   :  { %v186_v23 = vpack.c.bf16 %v4010_v18, %v4010_v18  ;;  %v4017_v24 = vsel %vm193_vm2, 1.0, %v5416_v44  ;;  %v4056_v28 = vld [vmem:[#allocation9 + $0x18] sm:$0xf0]  ;;  %v4247_v25 = vor.u32 %v4927_v22, %v4246_v21  ;;  %v4924_v31 = vld [vmem:[#allocation9 + $0x184] sm:$0xf] }
  0x44   :  { %v196_v29 = vpack.c.bf16 %v4017_v24, %v4017_v24  ;;  %v4059_v30 = vor.u32 %v4876_v27, %v4056_v28  ;;  %v4248_v32 = vld [vmem:[#allocation9 + $0x198] sm:$0xf0]  ;;  %v4230_v33 = vld [vmem:[#allocation9 + $0x158] sm:$0xf]  ;;  %v4922_v35 = vld [vmem:[#allocation9 + $0x16c] sm:$0xf0] }
  0x45   :  { %929 = vmatpush.bf16.msrb.mxu0 %v4107_v60  ;;  %v222_v34 = vsel %vm215_vm9, %v218_v13, %v186_v23  ;;  %v4251_v44 = vor.u32 %v4924_v31, %v4248_v32  ;;  %v4422_v36 = vld [vmem:[#allocation9 + $0x2d8] sm:$0xf]  ;;  %v4970_v37 = vld [vmem:[#allocation9 + $0x2ec] sm:$0xf0]  ;;  %905 = vmatpush.bf16.msra.mxu2 %v4055_v20  ;;  %v4231_v39 = vor.u32 %v4922_v35, %v4230_v33  ;;  %v4919_v41 = vld [vmem:[#allocation9 + $0x15c] sm:$0xf] }
  0x46   :  { %942 = vmatpush.bf16.msrb.mxu1 %v4299_v1  ;;  %v227_v38 = vsel %vm5602_vm4, %v222_v34, %v196_v29  ;;  %v4423_v40 = vor.u32 %v4970_v37, %v4422_v36  ;;  %v4232_v42 = vld [vmem:[#allocation9 + $0x170] sm:$0xf0]  ;;  %v4967_v43 = vld [vmem:[#allocation9 + $0x2dc] sm:$0xf]  ;;  %v4206_v47 = vld [vmem:[#allocation9 + $0x128] sm:$0xf]  ;;  %918 = vmatpush.bf16.msra.mxu3 %v4247_v25 }
  0x47   :  { %4050 = vmatmul.msk.bf16.vlgmr.msra.gmra.mxu0 %vm276_vm5, %v227_v38  ;;  %4051 = vmatmul.msk.bf16.vlgmr.msra.gmra.mxu1 %vm276_vm5, %v227_v38  ;;  %v4235_v45 = vor.u32 %v4919_v41, %v4232_v42  ;;  %v4424_v46 = vld [vmem:[#allocation9 + $0x2f0] sm:$0xf0]  ;;  %v4916_v48 = vld [vmem:[#allocation9 + $0x13c] sm:$0xf0]  ;;  %v4398_v50 = vld [vmem:[#allocation9 + $0x2a8] sm:$0xf] }
  0x48   :  { %v4427_v49 = vor.u32 %v4967_v43, %v4424_v46  ;;  %v4964_v51 = vld [vmem:[#allocation9 + $0x2bc] sm:$0xf0]  ;;  %v4913_v52 = vld [vmem:[#allocation9 + $0x12c] sm:$0xf]  ;;  %v4207_v53 = vor.u32 %v4916_v48, %v4206_v47  ;;  %v4208_v54 = vld [vmem:[#allocation9 + $0x140] sm:$0xf0] }
  0x49   :  { %930 = vmatpush.bf16.msrb.mxu0 %v4083_v14  ;;  %950 = vmatpush.bf16.msrb.mxu2 %v4231_v39  ;;  %v4961_v55 = vld [vmem:[#allocation9 + $0x2ac] sm:$0xf]  ;;  %v4400_v56 = vld [vmem:[#allocation9 + $0x2c0] sm:$0xf0]  ;;  %v4399_v57 = vor.u32 %v4964_v51, %v4398_v50  ;;  %v4211_v58 = vor.u32 %v4913_v52, %v4208_v54  ;;  %v4182_v59 = vld [vmem:[#allocation9 + $0xf8] sm:$0xf] }
  0x4a   :  { %943 = vmatpush.bf16.msrb.mxu1 %v4275_v19  ;;  %963 = vmatpush.bf16.msrb.mxu3 %v4423_v40  ;;  %v4910_v60 = vld [vmem:[#allocation9 + $0x10c] sm:$0xf0]  ;;  %v4374_v61 = vld [vmem:[#allocation9 + $0x278] sm:$0xf]  ;;  %v4403_v62 = vor.u32 %v4961_v55, %v4400_v56  ;;  %v4907_v0 = vld [vmem:[#allocation9 + $0xfc] sm:$0xf] }
  0x4b   :  { %v4958_v63 = vld [vmem:[#allocation9 + $0x28c] sm:$0xf0]  ;;  %v4184_v1 = vld [vmem:[#allocation9 + $0x110] sm:$0xf0]  ;;  %v4955_v2 = vld [vmem:[#allocation9 + $0x27c] sm:$0xf]  ;;  %v4183_v4 = vor.u32 %v4910_v60, %v4182_v59 }
  0x4c   :  { %v4376_v3 = vld [vmem:[#allocation9 + $0x290] sm:$0xf0]  ;;  %v4375_v5 = vor.u32 %v4958_v63, %v4374_v61  ;;  %v4187_v6 = vor.u32 %v4907_v0, %v4184_v1  ;;  %v4158_v7 = vld [vmem:[#allocation9 + $0xc8] sm:$0xf]  ;;  %v4904_v8 = vld [vmem:[#allocation9 + $0xdc] sm:$0xf0] }
  0x4d   :  { %931 = vmatpush.bf16.msrb.mxu0 %v4059_v30  ;;  %951 = vmatpush.bf16.msrb.mxu2 %v4207_v53  ;;  %v4350_v9 = vld [vmem:[#allocation9 + $0x248] sm:$0xf]  ;;  %v4379_v10 = vor.u32 %v4955_v2, %v4376_v3  ;;  %v4952_v11 = vld [vmem:[#allocation9 + $0x25c] sm:$0xf0]  ;;  %v4901_v12 = vld [vmem:[#allocation9 + $0xcc] sm:$0xf]  ;;  %v4159_v16 = vor.u32 %v4904_v8, %v4158_v7 }
  0x4e   :  { %944 = vmatpush.bf16.msrb.mxu1 %v4251_v44  ;;  %964 = vmatpush.bf16.msrb.mxu3 %v4399_v57  ;;  %v4160_v13 = vld [vmem:[#allocation9 + $0xe0] sm:$0xf0]  ;;  %v4949_v14 = vld [vmem:[#allocation9 + $0x24c] sm:$0xf]  ;;  %v4351_v17 = vor.u32 %v4952_v11, %v4350_v9  ;;  %v4134_v19 = vld [vmem:[#allocation9 + $0x98] sm:$0xf] }
  0x4f   :  { %v4352_v15 = vld [vmem:[#allocation9 + $0x260] sm:$0xf0]  ;;  %v4163_v18 = vor.u32 %v4901_v12, %v4160_v13  ;;  %v4898_v20 = vld [vmem:[#allocation9 + $0xac] sm:$0xf0]  ;;  %v4326_v21 = vld [vmem:[#allocation9 + $0x218] sm:$0xf] }
  0x50   :  { %v4355_v22 = vor.u32 %v4949_v14, %v4352_v15  ;;  %v4946_v23 = vld [vmem:[#allocation9 + $0x22c] sm:$0xf0]  ;;  %v4895_v24 = vld [vmem:[#allocation9 + $0x9c] sm:$0xf]  ;;  %v4136_v26 = vld [vmem:[#allocation9 + $0xb0] sm:$0xf0]  ;;  %v4135_v29 = vor.u32 %v4898_v20, %v4134_v19 }
  0x51   :  { %976 = vmatpush.bf16.msra.mxu0 %v4235_v45  ;;  %952 = vmatpush.bf16.msrb.mxu2 %v4183_v4  ;;  %v4943_v27 = vld [vmem:[#allocation9 + $0x21c] sm:$0xf]  ;;  %v4328_v28 = vld [vmem:[#allocation9 + $0x230] sm:$0xf0]  ;;  %v4327_v25 = vor.u32 %v4946_v23, %v4326_v21  ;;  %v4139_v30 = vor.u32 %v4895_v24, %v4136_v26  ;;  %v4110_v31 = vld [vmem:[#allocation9 + $0x68] sm:$0xf] }
  0x52   :  { %989 = vmatpush.bf16.msra.mxu1 %v4427_v49  ;;  %965 = vmatpush.bf16.msrb.mxu3 %v4375_v5  ;;  %v4892_v32 = vld [vmem:[#allocation9 + $0x7c] sm:$0xf0]  ;;  %v4302_v33 = vld [vmem:[#allocation9 + $0x1e8] sm:$0xf]  ;;  %v4331_v34 = vor.u32 %v4943_v27, %v4328_v28  ;;  %v4889_v35 = vld [vmem:[#allocation9 + $0x6c] sm:$0xf] }
  0x53   :  { %v4940_v44 = vld [vmem:[#allocation9 + $0x1fc] sm:$0xf0]  ;;  %v4112_v36 = vld [vmem:[#allocation9 + $0x80] sm:$0xf0]  ;;  %v4937_v37 = vld [vmem:[#allocation9 + $0x1ec] sm:$0xf]  ;;  %v4111_v39 = vor.u32 %v4892_v32, %v4110_v31 }
  0x54   :  { %v4304_v38 = vld [vmem:[#allocation9 + $0x200] sm:$0xf0]  ;;  %v4303_v40 = vor.u32 %v4940_v44, %v4302_v33  ;;  %v4115_v41 = vor.u32 %v4889_v35, %v4112_v36  ;;  %v4086_v42 = vld [vmem:[#allocation9 + $0x38] sm:$0xf]  ;;  %v4886_v43 = vld [vmem:[#allocation9 + $0x4c] sm:$0xf0] }
  0x55   :  { %977 = vmatpush.bf16.msra.mxu0 %v4211_v58  ;;  %953 = vmatpush.bf16.msrb.mxu2 %v4159_v16  ;;  %v4278_v45 = vld [vmem:[#allocation9 + $0x1b8] sm:$0xf]  ;;  %v4307_v46 = vor.u32 %v4937_v37, %v4304_v38  ;;  %v4934_v47 = vld [vmem:[#allocation9 + $0x1cc] sm:$0xf0]  ;;  %v4883_v48 = vld [vmem:[#allocation9 + $0x3c] sm:$0xf]  ;;  %v4087_v52 = vor.u32 %v4886_v43, %v4086_v42 }
  0x56   :  { %990 = vmatpush.bf16.msra.mxu1 %v4403_v62  ;;  %966 = vmatpush.bf16.msrb.mxu3 %v4351_v17  ;;  %v4088_v49 = vld [vmem:[#allocation9 + $0x50] sm:$0xf0]  ;;  %v4931_v50 = vld [vmem:[#allocation9 + $0x1bc] sm:$0xf]  ;;  %v4279_v53 = vor.u32 %v4934_v47, %v4278_v45  ;;  %v4062_v56 = vld [vmem:[#allocation9 + $0x8] sm:$0xf] }
  0x57   :  { %v4280_v51 = vld [vmem:[#allocation9 + $0x1d0] sm:$0xf0]  ;;  %v4091_v54 = vor.u32 %v4883_v48, %v4088_v49  ;;  %v4880_v57 = vld [vmem:[#allocation9 + $0x1c] sm:$0xf0]  ;;  %v4254_v58 = vld [vmem:[#allocation9 + $0x188] sm:$0xf] }
  0x58   :  { %v4283_v55 = vor.u32 %v4931_v50, %v4280_v51  ;;  %v4063_v59 = vor.u32 %v4880_v57, %v4062_v56  ;;  %v4928_v60 = vld [vmem:[#allocation9 + $0x19c] sm:$0xf0]  ;;  %v4877_v61 = vld [vmem:[#allocation9 + $0xc] sm:$0xf]  ;;  %v4064_v62 = vld [vmem:[#allocation9 + $0x20] sm:$0xf0] }
  0x59   :  { %978 = vmatpush.bf16.msra.mxu0 %v4187_v6  ;;  %954 = vmatpush.bf16.msrb.mxu2 %v4135_v29  ;;  %v4255_v63 = vor.u32 %v4928_v60, %v4254_v58  ;;  %v4067_v0 = vor.u32 %v4877_v61, %v4064_v62  ;;  %v4925_v1 = vld [vmem:[#allocation9 + $0x18c] sm:$0xf]  ;;  %v4256_v2 = vld [vmem:[#allocation9 + $0x1a0] sm:$0xf0]  ;;  %v4238_v4 = vld [vmem:[#allocation9 + $0x160] sm:$0xf] }
  0x5a   :  { %991 = vmatpush.bf16.msra.mxu1 %v4379_v10  ;;  %967 = vmatpush.bf16.msrb.mxu3 %v4327_v25  ;;  %v4259_v3 = vor.u32 %v4925_v1, %v4256_v2  ;;  %v4923_v5 = vld [vmem:[#allocation9 + $0x174] sm:$0xf0]  ;;  %v4430_v6 = vld [vmem:[#allocation9 + $0x2e0] sm:$0xf]  ;;  %v4920_v8 = vld [vmem:[#allocation9 + $0x164] sm:$0xf] }
  0x5b   :  { %v4971_v7 = vld [vmem:[#allocation9 + $0x2f4] sm:$0xf0]  ;;  %v4240_v9 = vld [vmem:[#allocation9 + $0x178] sm:$0xf0]  ;;  %v4968_v10 = vld [vmem:[#allocation9 + $0x2e4] sm:$0xf]  ;;  %v4239_v16 = vor.u32 %v4923_v5, %v4238_v4 }
  0x5c   :  { %v4432_v11 = vld [vmem:[#allocation9 + $0x2f8] sm:$0xf0]  ;;  %v4431_v17 = vor.u32 %v4971_v7, %v4430_v6  ;;  %v4917_v19 = vld [vmem:[#allocation9 + $0x144] sm:$0xf0]  ;;  %v4243_v20 = vor.u32 %v4920_v8, %v4240_v9  ;;  %v4914_v24 = vld [vmem:[#allocation9 + $0x134] sm:$0xf] }
  0x5d   :  { %979 = vmatpush.bf16.msra.mxu0 %v4163_v18  ;;  %955 = vmatpush.bf16.msrb.mxu2 %v4111_v39  ;;  %v4214_v18 = vld [vmem:[#allocation9 + $0x130] sm:$0xf]  ;;  %v4435_v21 = vor.u32 %v4968_v10, %v4432_v11  ;;  %v4965_v23 = vld [vmem:[#allocation9 + $0x2c4] sm:$0xf0]  ;;  %v4216_v26 = vld [vmem:[#allocation9 + $0x148] sm:$0xf0] }
  0x5e   :  { %992 = vmatpush.bf16.msra.mxu1 %v4355_v22  ;;  %968 = vmatpush.bf16.msrb.mxu3 %v4303_v40  ;;  %v4406_v22 = vld [vmem:[#allocation9 + $0x2b0] sm:$0xf]  ;;  %v4962_v27 = vld [vmem:[#allocation9 + $0x2b4] sm:$0xf]  ;;  %v4408_v28 = vld [vmem:[#allocation9 + $0x2c8] sm:$0xf0]  ;;  %v4215_v29 = vor.u32 %v4917_v19, %v4214_v18  ;;  %v4219_v32 = vor.u32 %v4914_v24, %v4216_v26 }
  0x5f   :  { %v4407_v25 = vor.u32 %v4965_v23, %v4406_v22  ;;  %v4911_v31 = vld [vmem:[#allocation9 + $0x114] sm:$0xf0]  ;;  %v4411_v33 = vor.u32 %v4962_v27, %v4408_v28  ;;  %v4908_v35 = vld [vmem:[#allocation9 + $0x104] sm:$0xf]  ;;  %v4192_v36 = vld [vmem:[#allocation9 + $0x118] sm:$0xf0] }
  0x60   :  { %v4959_v44 = vld [vmem:[#allocation9 + $0x294] sm:$0xf0]  ;;  %v4956_v37 = vld [vmem:[#allocation9 + $0x284] sm:$0xf]  ;;  %v4384_v38 = vld [vmem:[#allocation9 + $0x298] sm:$0xf0] }
  0x61   :  { %980 = vmatpush.bf16.msra.mxu0 %v4139_v30  ;;  %956 = vmatpush.bf16.msrb.mxu2 %v4087_v52  ;;  %v4190_v30 = vld [vmem:[#allocation9 + $0x100] sm:$0xf]  ;;  %v4166_v43 = vld [vmem:[#allocation9 + $0xd0] sm:$0xf]  ;;  %v4905_v45 = vld [vmem:[#allocation9 + $0xe4] sm:$0xf0]  ;;  %v4387_v47 = vor.u32 %v4956_v37, %v4384_v38 }
  0x62   :  { %993 = vmatpush.bf16.msra.mxu1 %v4331_v34  ;;  %969 = vmatpush.bf16.msrb.mxu3 %v4279_v53  ;;  %v4382_v34 = vld [vmem:[#allocation9 + $0x280] sm:$0xf]  ;;  %v4358_v48 = vld [vmem:[#allocation9 + $0x250] sm:$0xf]  ;;  %v4953_v49 = vld [vmem:[#allocation9 + $0x264] sm:$0xf0] }
  0x63   :  { %v4383_v42 = vor.u32 %v4959_v44, %v4382_v34  ;;  %v4902_v50 = vld [vmem:[#allocation9 + $0xd4] sm:$0xf]  ;;  %v4168_v51 = vld [vmem:[#allocation9 + $0xe8] sm:$0xf0]  ;;  %v4142_v56 = vld [vmem:[#allocation9 + $0xa0] sm:$0xf] }
  0x64   :  { %v4950_v52 = vld [vmem:[#allocation9 + $0x254] sm:$0xf]  ;;  %v4360_v53 = vld [vmem:[#allocation9 + $0x268] sm:$0xf0]  ;;  %v4899_v57 = vld [vmem:[#allocation9 + $0xb4] sm:$0xf0]  ;;  %v4171_v58 = vor.u32 %v4902_v50, %v4168_v51 }
  0x65   :  { %981 = vmatpush.bf16.msra.mxu0 %v4115_v41  ;;  %957 = vmatpush.bf16.msrb.mxu2 %v4063_v59  ;;  %v4191_v41 = vor.u32 %v4911_v31, %v4190_v30  ;;  %v4363_v59 = vor.u32 %v4950_v52, %v4360_v53  ;;  %v4334_v60 = vld [vmem:[#allocation9 + $0x220] sm:$0xf]  ;;  %v4947_v61 = vld [vmem:[#allocation9 + $0x234] sm:$0xf0]  ;;  %v4896_v62 = vld [vmem:[#allocation9 + $0xa4] sm:$0xf]  ;;  %v4143_v2 = vor.u32 %v4899_v57, %v4142_v56 }
  0x66   :  { %994 = vmatpush.bf16.msra.mxu1 %v4307_v46  ;;  %970 = vmatpush.bf16.msrb.mxu3 %v4255_v63  ;;  %v4195_v46 = vor.u32 %v4908_v35, %v4192_v36  ;;  %v4144_v63 = vld [vmem:[#allocation9 + $0xb8] sm:$0xf0]  ;;  %v4118_v4 = vld [vmem:[#allocation9 + $0x70] sm:$0xf]  ;;  %v4893_v5 = vld [vmem:[#allocation9 + $0x84] sm:$0xf0] }
  0x67   :  { %v4336_v1 = vld [vmem:[#allocation9 + $0x238] sm:$0xf0]  ;;  %v4147_v6 = vor.u32 %v4896_v62, %v4144_v63  ;;  %v4310_v8 = vld [vmem:[#allocation9 + $0x1f0] sm:$0xf]  ;;  %v4941_v9 = vld [vmem:[#allocation9 + $0x204] sm:$0xf0] }
  0x68   :  { %v4890_v10 = vld [vmem:[#allocation9 + $0x74] sm:$0xf]  ;;  %v4120_v11 = vld [vmem:[#allocation9 + $0x88] sm:$0xf0]  ;;  %v4094_v18 = vld [vmem:[#allocation9 + $0x40] sm:$0xf] }
  0x69   :  { %982 = vmatpush.bf16.msra.mxu0 %v4091_v54  ;;  %v4167_v54 = vor.u32 %v4905_v45, %v4166_v43  ;;  %v4887_v19 = vld [vmem:[#allocation9 + $0x54] sm:$0xf0]  ;;  %v4286_v22 = vld [vmem:[#allocation9 + $0x1c0] sm:$0xf]  ;;  %v4884_v24 = vld [vmem:[#allocation9 + $0x44] sm:$0xf] }
  0x6a   :  { %995 = vmatpush.bf16.msra.mxu1 %v4283_v55  ;;  %v4359_v55 = vor.u32 %v4953_v49, %v4358_v48  ;;  %v4935_v23 = vld [vmem:[#allocation9 + $0x1d4] sm:$0xf0]  ;;  %v4096_v26 = vld [vmem:[#allocation9 + $0x58] sm:$0xf0]  ;;  %v4932_v27 = vld [vmem:[#allocation9 + $0x1c4] sm:$0xf] }
  0x6b   :  { %v4288_v28 = vld [vmem:[#allocation9 + $0x1d8] sm:$0xf0]  ;;  %v4287_v30 = vor.u32 %v4935_v23, %v4286_v22  ;;  %v4881_v31 = vld [vmem:[#allocation9 + $0x24] sm:$0xf0]  ;;  %v4099_v34 = vor.u32 %v4884_v24, %v4096_v26  ;;  %v4878_v35 = vld [vmem:[#allocation9 + $0x14] sm:$0xf] }
  0x6c   :  { %v4291_v44 = vor.u32 %v4932_v27, %v4288_v28  ;;  %v4072_v36 = vld [vmem:[#allocation9 + $0x28] sm:$0xf0]  ;;  %v4926_v37 = vld [vmem:[#allocation9 + $0x194] sm:$0xf]  ;;  %v5056_v62 = vld [vmem:[#allocation10 + $0x2a4] sm:$0xf] }
  0x6d   :  { %983 = vmatpush.bf16.msra.mxu0 %v4067_v0  ;;  %v4944_v0 = vld [vmem:[#allocation9 + $0x224] sm:$0xf]  ;;  %v4264_v38 = vld [vmem:[#allocation9 + $0x1a8] sm:$0xf0]  ;;  %v5014_v43 = vld [vmem:[#allocation10 + $0x154] sm:$0xf]  ;;  %v4075_v50 = vor.u32 %v4878_v35, %v4072_v36 }
  0x6e   :  { %996 = vmatpush.bf16.msra.mxu1 %v4259_v3  ;;  %v4335_v3 = vor.u32 %v4947_v61, %v4334_v60  ;;  %v4339_v7 = vor.u32 %v4944_v0, %v4336_v1  ;;  %v5062_v48 = vld [vmem:[#allocation10 + $0x2d4] sm:$0xf]  ;;  %v4800_v49 = vld [vmem:[#allocation10 + $0x2e8] sm:$0xf0]  ;;  %v4267_v51 = vor.u32 %v4926_v37, %v4264_v38  ;;  %v5008_v60 = vld [vmem:[#allocation10 + $0x124] sm:$0xf] }
  0x6f   :  { %v5629_v57 = vor.u32 %v5062_v48, %v4800_v49  ;;  %v4584_v61 = vld [vmem:[#allocation10 + $0x138] sm:$0xf0]  ;;  %v5044_v22 = vld [vmem:[#allocation10 + $0x244] sm:$0xf]  ;;  %v4510_v27 = vld [vmem:[#allocation10 + $0x90] sm:$0xf] }
  0x70   :  { %v4776_v63 = vld [vmem:[#allocation10 + $0x2b8] sm:$0xf0]  ;;  %v4993_v28 = vld [vmem:[#allocation10 + $0xa4] sm:$0xf0]  ;;  %v4486_v37 = vld [vmem:[#allocation10 + $0x60] sm:$0xf] }
  0x71   :  { %v4728_v23 = vld [vmem:[#allocation10 + $0x258] sm:$0xf0]  ;;  %v5673_v35 = vor.u32 %v4993_v28, %v4510_v27  ;;  %v4987_v38 = vld [vmem:[#allocation10 + $0x74] sm:$0xf0]  ;;  %v5066_v27 = vld [vmem:[#allocation10 + $0x2ec] sm:$0xf0] }
  0x72   :  { %v5685_v48 = vor.u32 %v4987_v38, %v4486_v37  ;;  %v5015_v28 = vld [vmem:[#allocation10 + $0x15c] sm:$0xf] }
  0x73   :  { %7184 = vst [vmem:[#allocation33_spill] sm:$0xff] %v5673_v35 }
  0x74   :  { %7188 = vst [vmem:[#allocation37_spill] sm:$0xff] %v5685_v48 }
  0xc4   :  { %v289_v12 = vpop.f32.mrf.mxu0  ;;  %v302_v13 = vpop.f32.mrf.mxu1 }
  0xc5   :  { %v5611_v14 = vpack.c.bf16 %v289_v12, %v289_v12  ;;  %v5613_v15 = vpack.c.bf16 %v302_v13, %v302_v13  ;;  %v4938_v12 = vld [vmem:[#allocation9 + $0x1f4] sm:$0xf]  ;;  %v4312_v13 = vld [vmem:[#allocation9 + $0x208] sm:$0xf0] }
  0xc7   :  { %906 = vmatmul.bf16.vlgmr.msra.gmra.mxu2 %v5611_v14  ;;  %919 = vmatmul.bf16.vlgmr.msra.gmra.mxu3 %v5613_v15 }
  0xc8   :  { %932 = vmatmul.bf16.vlgmr.msrb.gmra.mxu0 %v5611_v14  ;;  %945 = vmatmul.bf16.vlgmr.msrb.gmra.mxu1 %v5613_v15 }
  0xc9   :  { %1002 = vmatpush.bf16.msra.mxu2 %v4239_v16  ;;  %1015 = vmatpush.bf16.msra.mxu3 %v4431_v17  ;;  %v4119_v16 = vor.u32 %v4893_v5, %v4118_v4  ;;  %v4311_v17 = vor.u32 %v4941_v9, %v4310_v8  ;;  %v5639_v4 = vor.u32 %v5008_v60, %v4584_v61  ;;  %v5002_v8 = vld [vmem:[#allocation10 + $0xf4] sm:$0xf]  ;;  %v4560_v9 = vld [vmem:[#allocation10 + $0x108] sm:$0xf0] }
  0xca   :  { %1028 = vmatpush.bf16.msrb.mxu0 %v4243_v20  ;;  %1041 = vmatpush.bf16.msrb.mxu1 %v4435_v21  ;;  %v4123_v20 = vor.u32 %v4890_v10, %v4120_v11  ;;  %v4315_v21 = vor.u32 %v4938_v12, %v4312_v13  ;;  %v5641_v5 = vor.u32 %v5056_v62, %v4776_v63  ;;  %v5050_v10 = vld [vmem:[#allocation10 + $0x274] sm:$0xf]  ;;  %v4752_v11 = vld [vmem:[#allocation10 + $0x288] sm:$0xf0] }
  0xcb   :  { %7174 = vst [vmem:[#allocation23_spill] sm:$0xff] %v5639_v4  ;;  %v4978_v60 = vld [vmem:[#allocation10 + $0x34] sm:$0xf]  ;;  %v4464_v61 = vld [vmem:[#allocation10 + $0x48] sm:$0xf0] }
  0xcc   :  { %v291_v39 = vpop.f32.mrf.mxu0  ;;  %v304_v40 = vpop.f32.mrf.mxu1  ;;  %7175 = vst [vmem:[#allocation24_spill] sm:$0xff] %v5641_v5  ;;  %v5026_v62 = vld [vmem:[#allocation10 + $0x1b4] sm:$0xf]  ;;  %v4656_v63 = vld [vmem:[#allocation10 + $0x1c8] sm:$0xf0] }
  0xcd   :  { %1003 = vmatpush.bf16.msra.mxu2 %v4215_v29  ;;  %1016 = vmatpush.bf16.msra.mxu3 %v4407_v25  ;;  %v4070_v29 = vld [vmem:[#allocation9 + $0x10] sm:$0xf]  ;;  %v4095_v25 = vor.u32 %v4887_v19, %v4094_v18  ;;  %v5017_v40 = vld [vmem:[#allocation10 + $0x164] sm:$0xf0]  ;;  %v5655_v18 = vor.u32 %v5002_v8, %v4560_v9  ;;  %v5657_v19 = vor.u32 %v5050_v10, %v4752_v11  ;;  %v5023_v9 = vld [vmem:[#allocation10 + $0x194] sm:$0xf0] }
  0xce   :  { %1029 = vmatpush.bf16.msrb.mxu0 %v4219_v32  ;;  %1042 = vmatpush.bf16.msrb.mxu1 %v4411_v33  ;;  %v4262_v32 = vld [vmem:[#allocation9 + $0x190] sm:$0xf]  ;;  %v4929_v33 = vld [vmem:[#allocation9 + $0x1a4] sm:$0xf0]  ;;  %v4071_v45 = vor.u32 %v4881_v31, %v4070_v29  ;;  %v4972_v10 = vld [vmem:[#allocation10 + $0x4] sm:$0xf] }
  0xcf   :  { %v4606_v39 = vld [vmem:[#allocation10 + $0x150] sm:$0xf]  ;;  %7178 = vst [vmem:[#allocation27_spill] sm:$0xff] %v5655_v18  ;;  %v5041_v31 = vld [vmem:[#allocation10 + $0x224] sm:$0xf0] }
  0xd0   :  { %v5623_v52 = vor.u32 %v5017_v40, %v4606_v39  ;;  %7179 = vst [vmem:[#allocation28_spill] sm:$0xff] %v5657_v19  ;;  %v4440_v11 = vld [vmem:[#allocation10 + $0x18] sm:$0xf0] }
  0xd1   :  { %1004 = vmatpush.bf16.msra.mxu2 %v4191_v41  ;;  %1017 = vmatpush.bf16.msra.mxu3 %v4383_v42  ;;  %v4798_v41 = vld [vmem:[#allocation10 + $0x2d0] sm:$0xf]  ;;  %v5065_v42 = vld [vmem:[#allocation10 + $0x2e4] sm:$0xf0]  ;;  %v5719_v38 = vor.u32 %v4972_v10, %v4440_v11 }
  0xd2   :  { %1030 = vmatpush.bf16.msrb.mxu0 %v4195_v46  ;;  %1043 = vmatpush.bf16.msrb.mxu1 %v4387_v47  ;;  %v4263_v46 = vor.u32 %v4929_v33, %v4262_v32  ;;  %v4608_v47 = vld [vmem:[#allocation10 + $0x168] sm:$0xf0]  ;;  %7170 = vst [vmem:[#allocation19_spill] sm:$0xff] %v5623_v52  ;;  %v5625_v53 = vor.u32 %v5065_v42, %v4798_v41  ;;  %v4990_v32 = vld [vmem:[#allocation10 + $0x94] sm:$0xf] }
  0xd3   :  { %v5627_v56 = vor.u32 %v5014_v43, %v4608_v47  ;;  %v4512_v33 = vld [vmem:[#allocation10 + $0xa8] sm:$0xf0]  ;;  %v4678_v41 = vld [vmem:[#allocation10 + $0x1e0] sm:$0xf]  ;;  %v5035_v42 = vld [vmem:[#allocation10 + $0x1f4] sm:$0xf0] }
  0xd4   :  { %v5679_v39 = vor.u32 %v4990_v32, %v4512_v33  ;;  %v4984_v43 = vld [vmem:[#allocation10 + $0x64] sm:$0xf]  ;;  %v4680_v47 = vld [vmem:[#allocation10 + $0x1f8] sm:$0xf0]  ;;  %v5687_v49 = vor.u32 %v5035_v42, %v4678_v41  ;;  %7199 = vst [vmem:[#allocation48_spill] sm:$0xff] %v5719_v38 }
  0xd5   :  { %1005 = vmatpush.bf16.msra.mxu2 %v4167_v54  ;;  %1018 = vmatpush.bf16.msra.mxu3 %v4359_v55  ;;  %v4582_v54 = vld [vmem:[#allocation10 + $0x120] sm:$0xf]  ;;  %v5011_v55 = vld [vmem:[#allocation10 + $0x134] sm:$0xf0]  ;;  %7171 = vst [vmem:[#allocation20_spill] sm:$0xff] %v5627_v56 }
  0xd6   :  { %1031 = vmatpush.bf16.msrb.mxu0 %v4171_v58  ;;  %1044 = vmatpush.bf16.msrb.mxu1 %v4363_v59  ;;  %v4774_v58 = vld [vmem:[#allocation10 + $0x2a0] sm:$0xf]  ;;  %v5059_v59 = vld [vmem:[#allocation10 + $0x2b4] sm:$0xf0]  ;;  %v5633_v0 = vor.u32 %v5011_v55, %v4582_v54  ;;  %7186 = vst [vmem:[#allocation35_spill] sm:$0xff] %v5679_v39 }
  0xd7   :  { %958 = vmatmul.bf16.vlgmr.msrb.gmra.mxu2 %v5611_v14  ;;  %971 = vmatmul.bf16.vlgmr.msrb.gmra.mxu3 %v5613_v15  ;;  %v5635_v1 = vor.u32 %v5059_v59, %v4774_v58  ;;  %7189 = vst [vmem:[#allocation38_spill] sm:$0xff] %v5687_v49  ;;  %v4654_v58 = vld [vmem:[#allocation10 + $0x1b0] sm:$0xf]  ;;  %v5029_v59 = vld [vmem:[#allocation10 + $0x1c4] sm:$0xf0] }
  0xd8   :  { %984 = vmatmul.bf16.vlgmr.msra.gmra.mxu0 %v5611_v14  ;;  %997 = vmatmul.bf16.vlgmr.msra.gmra.mxu1 %v5613_v15  ;;  %7172 = vst [vmem:[#allocation21_spill] sm:$0xff] %v5633_v0  ;;  %v5699_v8 = vor.u32 %v5029_v59, %v4654_v58  ;;  %v5063_v33 = vld [vmem:[#allocation10 + $0x2dc] sm:$0xf]  ;;  %v5060_v58 = vld [vmem:[#allocation10 + $0x2bc] sm:$0xf0] }
  0xd9   :  { %1006 = vmatpush.bf16.msra.mxu2 %v4143_v2  ;;  %1019 = vmatpush.bf16.msra.mxu3 %v4335_v3  ;;  %7173 = vst [vmem:[#allocation22_spill] sm:$0xff] %v5635_v1  ;;  %v4558_v2 = vld [vmem:[#allocation10 + $0xf0] sm:$0xf]  ;;  %v5005_v3 = vld [vmem:[#allocation10 + $0x104] sm:$0xf0] }
  0xda   :  { %1032 = vmatpush.bf16.msrb.mxu0 %v4147_v6  ;;  %1045 = vmatpush.bf16.msrb.mxu1 %v4339_v7  ;;  %v4750_v6 = vld [vmem:[#allocation10 + $0x270] sm:$0xf]  ;;  %v5053_v7 = vld [vmem:[#allocation10 + $0x284] sm:$0xf0]  ;;  %v5649_v12 = vor.u32 %v5005_v3, %v4558_v2  ;;  %v4438_v2 = vld [vmem:[#allocation10] sm:$0xf] }
  0xdb   :  { %v5651_v13 = vor.u32 %v5053_v7, %v4750_v6  ;;  %v4975_v3 = vld [vmem:[#allocation10 + $0x14] sm:$0xf0]  ;;  %v4630_v6 = vld [vmem:[#allocation10 + $0x180] sm:$0xf]  ;;  %7193 = vst [vmem:[#allocation42_spill] sm:$0xff] %v5699_v8 }
  0xdc   :  { %7176 = vst [vmem:[#allocation25_spill] sm:$0xff] %v5649_v12  ;;  %v5713_v32 = vor.u32 %v5023_v9, %v4630_v6  ;;  %v5009_v59 = vld [vmem:[#allocation10 + $0x12c] sm:$0xf]  ;;  %v4566_v9 = vld [vmem:[#allocation10 + $0xf8] sm:$0xf] }
  0xdd   :  { %1007 = vmatpush.bf16.msra.mxu2 %v4119_v16  ;;  %1020 = vmatpush.bf16.msra.mxu3 %v4311_v17  ;;  %7177 = vst [vmem:[#allocation26_spill] sm:$0xff] %v5651_v13  ;;  %v4534_v16 = vld [vmem:[#allocation10 + $0xc0] sm:$0xf]  ;;  %v4999_v17 = vld [vmem:[#allocation10 + $0xd4] sm:$0xf0] }
  0xde   :  { %1033 = vmatpush.bf16.msrb.mxu0 %v4123_v20  ;;  %1046 = vmatpush.bf16.msrb.mxu1 %v4315_v21  ;;  %v4996_v20 = vld [vmem:[#allocation10 + $0xc4] sm:$0xf]  ;;  %v4536_v21 = vld [vmem:[#allocation10 + $0xd8] sm:$0xf0]  ;;  %v5661_v24 = vor.u32 %v4999_v17, %v4534_v16  ;;  %v5703_v16 = vor.u32 %v4978_v60, %v4464_v61  ;;  %v5705_v17 = vor.u32 %v5026_v62, %v4656_v63  ;;  %v5057_v63 = vld [vmem:[#allocation10 + $0x2ac] sm:$0xf] }
  0xdf   :  { %v5667_v29 = vor.u32 %v4996_v20, %v4536_v21  ;;  %v5707_v20 = vld [vmem:[#allocation7] sm:$0x3]  ;;  %v4614_v21 = vld [vmem:[#allocation10 + $0x158] sm:$0xf]  ;;  %7198 = vst [vmem:[#allocation47_spill] sm:$0xff] %v5713_v32 }
  0xe0   :  { %7180 = vst [vmem:[#allocation29_spill] sm:$0xff] %v5661_v24  ;;  %v1058_v37 = vperm.slane %v5707_v20, 1  ;;  %v4592_v62 = vld [vmem:[#allocation10 + $0x140] sm:$0xf0]  ;;  %v5006_v10 = vld [vmem:[#allocation10 + $0x10c] sm:$0xf0] }
  0xe1   :  { %1008 = vmatpush.bf16.msra.mxu2 %v4095_v25  ;;  %1021 = vmatpush.bf16.msra.mxu3 %v4287_v30  ;;  %7182 = vst [vmem:[#allocation31_spill] sm:$0xff] %v5667_v29  ;;  %v5669_v25 = vor.u32 %v5044_v22, %v4728_v23  ;;  %v4702_v30 = vld [vmem:[#allocation10 + $0x210] sm:$0xf]  ;;  %v4806_v23 = vld [vmem:[#allocation10 + $0x2d8] sm:$0xf]  ;;  %v5747_v11 = vor.u32 %v5009_v59, %v4592_v62 }
  0xe2   :  { %1034 = vmatpush.bf16.msrb.mxu0 %v4099_v34  ;;  %1047 = vmatpush.bf16.msrb.mxu1 %v4291_v44  ;;  %v5038_v34 = vld [vmem:[#allocation10 + $0x214] sm:$0xf]  ;;  %v4704_v44 = vld [vmem:[#allocation10 + $0x228] sm:$0xf0]  ;;  %v5675_v36 = vor.u32 %v5041_v31, %v4702_v30  ;;  %7194 = vst [vmem:[#allocation43_spill] sm:$0xff] %v5703_v16  ;;  %v5711_v31 = vor.u32 %v4975_v3, %v4438_v2 }
  0xe3   :  { %7183 = vst [vmem:[#allocation32_spill] sm:$0xff] %v5669_v25  ;;  %v5681_v40 = vor.u32 %v5038_v34, %v4704_v44  ;;  %v5018_v22 = vld [vmem:[#allocation10 + $0x16c] sm:$0xf0]  ;;  %v4616_v30 = vld [vmem:[#allocation10 + $0x170] sm:$0xf0]  ;;  %v1057_v44 = vperm.slane %v5707_v20, 0  ;;  %v5735_v61 = vpack.c.bf16 %v1058_v37, %v1058_v37 }
  0xe4   :  { %7185 = vst [vmem:[#allocation34_spill] sm:$0xff] %v5675_v36  ;;  %v4808_v34 = vld [vmem:[#allocation10 + $0x2f0] sm:$0xf0]  ;;  %v5723_v42 = vor.u32 %v5018_v22, %v4614_v21  ;;  %v4784_v2 = vld [vmem:[#allocation10 + $0x2c0] sm:$0xf0] }
  0xe5   :  { %1009 = vmatpush.bf16.msra.mxu2 %v4071_v45  ;;  %1022 = vmatpush.bf16.msra.mxu3 %v4263_v46  ;;  %7187 = vst [vmem:[#allocation36_spill] sm:$0xff] %v5681_v40  ;;  %v4488_v45 = vld [vmem:[#allocation10 + $0x78] sm:$0xf0]  ;;  %v5032_v46 = vld [vmem:[#allocation10 + $0x1e4] sm:$0xf]  ;;  %v5733_v60 = vpack.c.bf16 %v1057_v44, %v1057_v44 }
  0xe6   :  { %1035 = vmatpush.bf16.msrb.mxu0 %v4075_v50  ;;  %1048 = vmatpush.bf16.msrb.mxu1 %v4267_v51  ;;  %v4462_v50 = vld [vmem:[#allocation10 + $0x30] sm:$0xf]  ;;  %v4981_v51 = vld [vmem:[#allocation10 + $0x44] sm:$0xf0]  ;;  %v5691_v54 = vor.u32 %v4984_v43, %v4488_v45  ;;  %v5693_v55 = vor.u32 %v5032_v46, %v4680_v47  ;;  %7195 = vst [vmem:[#allocation44_spill] sm:$0xff] %v5705_v17 }
  0xe7   :  { %v5697_v7 = vor.u32 %v4981_v51, %v4462_v50  ;;  %7196 = vst [vmem:[#allocation45_spill] sm:$0xff] %v5707_v20  ;;  %v5725_v43 = vor.u32 %v5066_v27, %v4806_v23  ;;  %v4590_v45 = vld [vmem:[#allocation10 + $0x128] sm:$0xf]  ;;  %v5012_v46 = vld [vmem:[#allocation10 + $0x13c] sm:$0xf0]  ;;  %v5727_v47 = vor.u32 %v5015_v28, %v4616_v30  ;;  %v5729_v50 = vor.u32 %v5063_v33, %v4808_v34 }
  0xe8   :  { %1010 = vmatmul.bf16.vlgmr.msra.gmra.mxu2 %v5611_v14  ;;  %1023 = vmatmul.bf16.vlgmr.msra.gmra.mxu3 %v5613_v15  ;;  %7190 = vst [vmem:[#allocation39_spill] sm:$0xff] %v5691_v54  ;;  %v4782_v51 = vld [vmem:[#allocation10 + $0x2a8] sm:$0xf]  ;;  %v5741_v3 = vor.u32 %v5012_v46, %v4590_v45  ;;  %v5054_v21 = vld [vmem:[#allocation10 + $0x28c] sm:$0xf0]  ;;  %v5757_v30 = vor.u32 %v5006_v10, %v4566_v9 }
  0xe9   :  { %1639 = vmatpush.bf16.msrb.mxu2 %v5623_v52  ;;  %1652 = vmatpush.bf16.msrb.mxu3 %v5625_v53  ;;  %7191 = vst [vmem:[#allocation40_spill] sm:$0xff] %v5693_v55  ;;  %v5743_v6 = vor.u32 %v5060_v58, %v4782_v51  ;;  %v5003_v22 = vld [vmem:[#allocation10 + $0xfc] sm:$0xf]  ;;  %v4568_v23 = vld [vmem:[#allocation10 + $0x110] sm:$0xf0] }
  0xea   :  { %1665 = vmatpush.bf16.msra.mxu0 %v5627_v56  ;;  %1678 = vmatpush.bf16.msra.mxu1 %v5629_v57  ;;  %7192 = vst [vmem:[#allocation41_spill] sm:$0xff] %v5697_v7  ;;  %v5051_v27 = vld [vmem:[#allocation10 + $0x27c] sm:$0xf]  ;;  %v4760_v28 = vld [vmem:[#allocation10 + $0x290] sm:$0xf0]  ;;  %v5763_v37 = vor.u32 %v5003_v22, %v4568_v23 }
  0xeb   :  { %1036 = vmatmul.bf16.vlgmr.msrb.gmra.mxu0 %v5611_v14  ;;  %1049 = vmatmul.bf16.vlgmr.msrb.gmra.mxu1 %v5613_v15  ;;  %v4726_v14 = vld [vmem:[#allocation10 + $0x240] sm:$0xf]  ;;  %v5047_v15 = vld [vmem:[#allocation10 + $0x254] sm:$0xf0]  ;;  %7197 = vst [vmem:[#allocation46_spill] sm:$0xff] %v5711_v31  ;;  %v5765_v45 = vor.u32 %v5051_v27, %v4760_v28 }
  0xec   :  { %v5663_v26 = vor.u32 %v5047_v15, %v4726_v14  ;;  %v5020_v14 = vld [vmem:[#allocation10 + $0x184] sm:$0xf]  ;;  %v4632_v15 = vld [vmem:[#allocation10 + $0x198] sm:$0xf0]  ;;  %7201 = vst [vmem:[#allocation50_spill] sm:$0xff] %v5723_v42 }
  0xed   :  { %1640 = vmatpush.bf16.msrb.mxu2 %v5633_v0  ;;  %1653 = vmatpush.bf16.msrb.mxu3 %v5635_v1  ;;  %v5721_v41 = vor.u32 %v5020_v14, %v4632_v15  ;;  %7202 = vst [vmem:[#allocation51_spill] sm:$0xff] %v5725_v43  ;;  %v5749_v14 = vor.u32 %v5057_v63, %v4784_v2  ;;  %v4758_v15 = vld [vmem:[#allocation10 + $0x278] sm:$0xf]  ;;  %v4542_v34 = vld [vmem:[#allocation10 + $0xc8] sm:$0xf] }
  0xee   :  { %1666 = vmatpush.bf16.msra.mxu0 %v5639_v4  ;;  %1679 = vmatpush.bf16.msra.mxu1 %v5641_v5  ;;  %7181 = vst [vmem:[#allocation30_spill] sm:$0xff] %v5663_v26  ;;  %v5759_v33 = vor.u32 %v5054_v21, %v4758_v15  ;;  %v5000_v44 = vld [vmem:[#allocation10 + $0xdc] sm:$0xf0]  ;;  %v4734_v46 = vld [vmem:[#allocation10 + $0x248] sm:$0xf] }
  0xef   :  { %7200 = vst [vmem:[#allocation49_spill] sm:$0xff] %v5721_v41  ;;  %v5048_v51 = vld [vmem:[#allocation10 + $0x25c] sm:$0xf0]  ;;  %v4997_v58 = vld [vmem:[#allocation10 + $0xcc] sm:$0xf]  ;;  %v5769_v2 = vor.u32 %v5000_v44, %v4542_v34 }
  0xf0   :  { %7203 = vst [vmem:[#allocation52_spill] sm:$0xff] %v5727_v47  ;;  %v4544_v59 = vld [vmem:[#allocation10 + $0xe0] sm:$0xf0]  ;;  %v5045_v62 = vld [vmem:[#allocation10 + $0x24c] sm:$0xf]  ;;  %v5771_v9 = vor.u32 %v5048_v51, %v4734_v46 }
  0xf1   :  { %1641 = vmatpush.bf16.msrb.mxu2 %v5649_v12  ;;  %1654 = vmatpush.bf16.msrb.mxu3 %v5651_v13  ;;  %7204 = vst [vmem:[#allocation53_spill] sm:$0xff] %v5729_v50  ;;  %v4736_v63 = vld [vmem:[#allocation10 + $0x260] sm:$0xf0]  ;;  %v4518_v10 = vld [vmem:[#allocation10 + $0x98] sm:$0xf]  ;;  %v5775_v21 = vor.u32 %v4997_v58, %v4544_v59 }
  0xf2   :  { %1667 = vmatpush.bf16.msra.mxu0 %v5655_v18  ;;  %1680 = vmatpush.bf16.msra.mxu1 %v5657_v19  ;;  %7205 = vst [vmem:[#allocation54_spill] sm:$0xff] %v5741_v3  ;;  %v4994_v15 = vld [vmem:[#allocation10 + $0xac] sm:$0xf0]  ;;  %v5777_v22 = vor.u32 %v5045_v62, %v4736_v63  ;;  %v4710_v23 = vld [vmem:[#allocation10 + $0x218] sm:$0xf] }
  0xf3   :  { %7206 = vst [vmem:[#allocation55_spill] sm:$0xff] %v5743_v6  ;;  %v5042_v27 = vld [vmem:[#allocation10 + $0x22c] sm:$0xf0]  ;;  %v4991_v28 = vld [vmem:[#allocation10 + $0x9c] sm:$0xf]  ;;  %v5781_v34 = vor.u32 %v4994_v15, %v4518_v10 }
  0xf4   :  { %7207 = vst [vmem:[#allocation56_spill] sm:$0xff] %v5747_v11  ;;  %v4520_v20 = vld [vmem:[#allocation10 + $0xb0] sm:$0xf0]  ;;  %v5783_v44 = vor.u32 %v5042_v27, %v4710_v23  ;;  %v4494_v46 = vld [vmem:[#allocation10 + $0x68] sm:$0xf] }
  0xf5   :  { %1642 = vmatpush.bf16.msrb.mxu2 %v5661_v24  ;;  %1655 = vmatpush.bf16.msrb.mxu3 %v5663_v26  ;;  %7208 = vst [vmem:[#allocation57_spill] sm:$0xff] %v5749_v14  ;;  %v4988_v51 = vld [vmem:[#allocation10 + $0x7c] sm:$0xf0]  ;;  %v5787_v58 = vor.u32 %v4991_v28, %v4520_v20  ;;  %v4686_v62 = vld [vmem:[#allocation10 + $0x1e8] sm:$0xf] }
  0xf6   :  { %1668 = vmatpush.bf16.msra.mxu0 %v5667_v29  ;;  %1681 = vmatpush.bf16.msra.mxu1 %v5669_v25  ;;  %7209 = vst [vmem:[#allocation58_spill] sm:$0xff] %v5757_v30  ;;  %v5036_v63 = vld [vmem:[#allocation10 + $0x1fc] sm:$0xf0]  ;;  %v5793_v10 = vor.u32 %v4988_v51, %v4494_v46  ;;  %v4470_v23 = vld [vmem:[#allocation10 + $0x38] sm:$0xf] }
  0xf7   :  { %7210 = vst [vmem:[#allocation59_spill] sm:$0xff] %v5759_v33  ;;  %v5795_v15 = vor.u32 %v5036_v63, %v4686_v62  ;;  %v4982_v27 = vld [vmem:[#allocation10 + $0x4c] sm:$0xf0]  ;;  %v4446_v46 = vld [vmem:[#allocation10 + $0x8] sm:$0xf] }
  0xf8   :  { %7211 = vst [vmem:[#allocation60_spill] sm:$0xff] %v5763_v37  ;;  %v5030_v28 = vld [vmem:[#allocation10 + $0x1cc] sm:$0xf0]  ;;  %v5805_v51 = vor.u32 %v4982_v27, %v4470_v23  ;;  %v4976_v63 = vld [vmem:[#allocation10 + $0x1c] sm:$0xf0] }
  0xf9   :  { %1643 = vmatpush.bf16.msrb.mxu2 %v5673_v35  ;;  %1656 = vmatpush.bf16.msrb.mxu3 %v5675_v36  ;;  %7212 = vst [vmem:[#allocation61_spill] sm:$0xff] %v5765_v45  ;;  %v5019_v23 = vld [vmem:[#allocation10 + $0x174] sm:$0xf0]  ;;  %v4814_v27 = vld [vmem:[#allocation10 + $0x2e0] sm:$0xf] }
  0xfa   :  { %1669 = vmatpush.bf16.msra.mxu0 %v5679_v39  ;;  %1682 = vmatpush.bf16.msra.mxu1 %v5681_v40  ;;  %7213 = vst [vmem:[#allocation62_spill] sm:$0xff] %v5769_v2 }
  0xfb   :  { %7214 = vst [vmem:[#allocation63_spill] sm:$0xff] %v5771_v9 }
  0xfc   :  { %7215 = vst [vmem:[#allocation64_spill] sm:$0xff] %v5775_v21 }
  0xfd   :  { %1644 = vmatpush.bf16.msrb.mxu2 %v5685_v48  ;;  %1657 = vmatpush.bf16.msrb.mxu3 %v5687_v49  ;;  %7216 = vst [vmem:[#allocation65_spill] sm:$0xff] %v5777_v22 }
  0xfe   :  { %1670 = vmatpush.bf16.msra.mxu0 %v5691_v54  ;;  %1683 = vmatpush.bf16.msra.mxu1 %v5693_v55  ;;  %7217 = vst [vmem:[#allocation66_spill] sm:$0xff] %v5781_v34 }
  0xff   :  { %7218 = vst [vmem:[#allocation67_spill] sm:$0xff] %v5783_v44 }
 0x100   :  { %7219 = vst [vmem:[#allocation68_spill] sm:$0xff] %v5787_v58 }
 0x101   :  { %1645 = vmatpush.bf16.msrb.mxu2 %v5697_v7  ;;  %1658 = vmatpush.bf16.msrb.mxu3 %v5699_v8  ;;  %7221 = vst [vmem:[#allocation70_spill] sm:$0xff] %v5793_v10 }
 0x102   :  { %1671 = vmatpush.bf16.msra.mxu0 %v5703_v16  ;;  %1684 = vmatpush.bf16.msra.mxu1 %v5705_v17  ;;  %7222 = vst [vmem:[#allocation71_spill] sm:$0xff] %v5795_v15 }
 0x103   :  { %7225 = vst [vmem:[#allocation74_spill] sm:$0xff] %v5805_v51 }
 0x105   :  { %1646 = vmatpush.bf16.msrb.mxu2 %v5711_v31  ;;  %1659 = vmatpush.bf16.msrb.mxu3 %v5713_v32 }
 0x106   :  { %1672 = vmatpush.bf16.msra.mxu0 %v5719_v38  ;;  %1685 = vmatpush.bf16.msra.mxu1 %v5721_v41 }
 0x108   :  { %1647 = vmatmul.bf16.vlgmr.msrb.gmra.mxu2 %v5733_v60  ;;  %1660 = vmatmul.bf16.vlgmr.msrb.gmra.mxu3 %v5735_v61 }
 0x109   :  { %1691 = vmatpush.bf16.msra.mxu2 %v5723_v42  ;;  %1704 = vmatpush.bf16.msra.mxu3 %v5725_v43 }
 0x10a   :  { %1717 = vmatpush.bf16.msrb.mxu0 %v5727_v47  ;;  %1730 = vmatpush.bf16.msrb.mxu1 %v5729_v50  ;;  %v5010_v50 = vld [vmem:[#allocation10 + $0x134] sm:$0xf] }
 0x10b   :  { %1673 = vmatmul.bf16.vlgmr.msra.gmra.mxu0 %v5733_v60  ;;  %1686 = vmatmul.bf16.vlgmr.msra.gmra.mxu1 %v5735_v61 }
 0x10d   :  { %1692 = vmatpush.bf16.msra.mxu2 %v5741_v3  ;;  %1705 = vmatpush.bf16.msra.mxu3 %v5743_v6  ;;  %v5061_v3 = vld [vmem:[#allocation10 + $0x2c4] sm:$0xf0] }
 0x10e   :  { %1718 = vmatpush.bf16.msrb.mxu0 %v5747_v11  ;;  %1731 = vmatpush.bf16.msrb.mxu1 %v5749_v14  ;;  %v4640_v14 = vld [vmem:[#allocation10 + $0x1a0] sm:$0xf0] }
 0x111   :  { %1693 = vmatpush.bf16.msra.mxu2 %v5757_v30  ;;  %1706 = vmatpush.bf16.msra.mxu3 %v5759_v33  ;;  %v5039_v30 = vld [vmem:[#allocation10 + $0x21c] sm:$0xf]  ;;  %v4712_v33 = vld [vmem:[#allocation10 + $0x230] sm:$0xf0] }
 0x112   :  { %1719 = vmatpush.bf16.msrb.mxu0 %v5763_v37  ;;  %1732 = vmatpush.bf16.msrb.mxu1 %v5765_v45  ;;  %v5789_v59 = vor.u32 %v5039_v30, %v4712_v33  ;;  %v4985_v45 = vld [vmem:[#allocation10 + $0x6c] sm:$0xf]  ;;  %v4662_v33 = vld [vmem:[#allocation10 + $0x1b8] sm:$0xf] }
 0x113   :  { %v5033_v37 = vld [vmem:[#allocation10 + $0x1ec] sm:$0xf]  ;;  %v5807_v62 = vor.u32 %v5030_v28, %v4662_v33  ;;  %v5067_v33 = vld [vmem:[#allocation10 + $0x2f4] sm:$0xf0]  ;;  %v5016_v28 = vld [vmem:[#allocation10 + $0x164] sm:$0xf] }
 0x114   :  { %7220 = vst [vmem:[#allocation69_spill] sm:$0xff] %v5789_v59 }
 0x115   :  { %1694 = vmatpush.bf16.msra.mxu2 %v5769_v2  ;;  %1707 = vmatpush.bf16.msra.mxu3 %v5771_v9  ;;  %v4496_v2 = vld [vmem:[#allocation10 + $0x80] sm:$0xf0]  ;;  %7226 = vst [vmem:[#allocation75_spill] sm:$0xff] %v5807_v62 }
 0x116   :  { %1720 = vmatpush.bf16.msrb.mxu0 %v5775_v21  ;;  %1733 = vmatpush.bf16.msrb.mxu1 %v5777_v22  ;;  %v4688_v9 = vld [vmem:[#allocation10 + $0x200] sm:$0xf0]  ;;  %v5799_v20 = vor.u32 %v4985_v45, %v4496_v2  ;;  %v4979_v22 = vld [vmem:[#allocation10 + $0x3c] sm:$0xf]  ;;  %v4638_v45 = vld [vmem:[#allocation10 + $0x188] sm:$0xf] }
 0x117   :  { %v5801_v30 = vor.u32 %v5033_v37, %v4688_v9  ;;  %v5027_v21 = vld [vmem:[#allocation10 + $0x1bc] sm:$0xf]  ;;  %v5024_v2 = vld [vmem:[#allocation10 + $0x19c] sm:$0xf0] }
 0x118   :  { %7223 = vst [vmem:[#allocation72_spill] sm:$0xff] %v5799_v20 }
 0x119   :  { %1695 = vmatpush.bf16.msra.mxu2 %v5781_v34  ;;  %1708 = vmatpush.bf16.msra.mxu3 %v5783_v44  ;;  %7224 = vst [vmem:[#allocation73_spill] sm:$0xff] %v5801_v30  ;;  %v4472_v34 = vld [vmem:[#allocation10 + $0x50] sm:$0xf0] }
 0x11a   :  { %1721 = vmatpush.bf16.msrb.mxu0 %v5787_v58  ;;  %1734 = vmatpush.bf16.msrb.mxu1 %v5789_v59  ;;  %v4664_v44 = vld [vmem:[#allocation10 + $0x1d0] sm:$0xf0]  ;;  %v5811_v37 = vor.u32 %v4979_v22, %v4472_v34  ;;  %v4973_v59 = vld [vmem:[#allocation10 + $0xc] sm:$0xf]  ;;  %v4448_v58 = vld [vmem:[#allocation10 + $0x20] sm:$0xf0] }
 0x11b   :  { %v5813_v9 = vor.u32 %v5027_v21, %v4664_v44  ;;  %v4624_v22 = vld [vmem:[#allocation10 + $0x178] sm:$0xf0]  ;;  %v5064_v21 = vld [vmem:[#allocation10 + $0x2e4] sm:$0xf]  ;;  %v5823_v44 = vor.u32 %v4973_v59, %v4448_v58  ;;  %v4600_v58 = vld [vmem:[#allocation10 + $0x148] sm:$0xf0] }
 0x11c   :  { %7227 = vst [vmem:[#allocation76_spill] sm:$0xff] %v5811_v37  ;;  %v4816_v34 = vld [vmem:[#allocation10 + $0x2f8] sm:$0xf0]  ;;  %v4792_v59 = vld [vmem:[#allocation10 + $0x2c8] sm:$0xf0] }
 0x11d   :  { %1696 = vmatpush.bf16.msra.mxu2 %v5793_v10  ;;  %1709 = vmatpush.bf16.msra.mxu3 %v5795_v15  ;;  %7228 = vst [vmem:[#allocation77_spill] sm:$0xff] %v5813_v9  ;;  %v5021_v10 = vld [vmem:[#allocation10 + $0x18c] sm:$0xf]  ;;  %v4622_v15 = vld [vmem:[#allocation10 + $0x160] sm:$0xf] }
 0x11e   :  { %1722 = vmatpush.bf16.msrb.mxu0 %v5799_v20  ;;  %1735 = vmatpush.bf16.msrb.mxu1 %v5801_v30  ;;  %v5817_v20 = vor.u32 %v4976_v63, %v4446_v46  ;;  %v5819_v30 = vor.u32 %v5024_v2, %v4638_v45  ;;  %7231 = vst [vmem:[#allocation80_spill] sm:$0xff] %v5823_v44  ;;  %v5013_v46 = vld [vmem:[#allocation10 + $0x144] sm:$0xf0]  ;;  %v4790_v2 = vld [vmem:[#allocation10 + $0x2b0] sm:$0xf] }
 0x11f   :  { %v5825_v11 = vor.u32 %v5021_v10, %v4640_v14  ;;  %v5827_v6 = vor.u32 %v5019_v23, %v4622_v15  ;;  %v5831_v63 = vor.u32 %v5016_v28, %v4624_v22  ;;  %v5833_v45 = vor.u32 %v5064_v21, %v4816_v34  ;;  %v5058_v14 = vld [vmem:[#allocation10 + $0x2b4] sm:$0xf]  ;;  %v4574_v23 = vld [vmem:[#allocation10 + $0x100] sm:$0xf]  ;;  %v5055_v21 = vld [vmem:[#allocation10 + $0x294] sm:$0xf0] }
 0x120   :  { %7229 = vst [vmem:[#allocation78_spill] sm:$0xff] %v5817_v20  ;;  %v5843_v15 = vor.u32 %v5061_v3, %v4790_v2  ;;  %v5849_v28 = vor.u32 %v5058_v14, %v4792_v59  ;;  %v4766_v22 = vld [vmem:[#allocation10 + $0x280] sm:$0xf]  ;;  %v5004_v34 = vld [vmem:[#allocation10 + $0x104] sm:$0xf] }
 0x121   :  { %1697 = vmatpush.bf16.msra.mxu2 %v5805_v51  ;;  %1710 = vmatpush.bf16.msra.mxu3 %v5807_v62  ;;  %7230 = vst [vmem:[#allocation79_spill] sm:$0xff] %v5819_v30  ;;  %v5829_v51 = vor.u32 %v5067_v33, %v4814_v27  ;;  %v4598_v62 = vld [vmem:[#allocation10 + $0x130] sm:$0xf]  ;;  %v5007_v27 = vld [vmem:[#allocation10 + $0x114] sm:$0xf0]  ;;  %v5847_v33 = vor.u32 %v5010_v50, %v4600_v58 }
 0x122   :  { %1723 = vmatpush.bf16.msrb.mxu0 %v5811_v37  ;;  %1736 = vmatpush.bf16.msrb.mxu1 %v5813_v9  ;;  %7232 = vst [vmem:[#allocation81_spill] sm:$0xff] %v5825_v11  ;;  %v5841_v10 = vor.u32 %v5013_v46, %v4598_v62  ;;  %v4576_v62 = vld [vmem:[#allocation10 + $0x118] sm:$0xf0]  ;;  %v5052_v3 = vld [vmem:[#allocation10 + $0x284] sm:$0xf]  ;;  %v5857_v50 = vor.u32 %v5007_v27, %v4574_v23 }
 0x123   :  { %7233 = vst [vmem:[#allocation82_spill] sm:$0xff] %v5827_v6  ;;  %v4768_v46 = vld [vmem:[#allocation10 + $0x298] sm:$0xf0]  ;;  %v5859_v2 = vor.u32 %v5055_v21, %v4766_v22  ;;  %v4550_v58 = vld [vmem:[#allocation10 + $0xd0] sm:$0xf]  ;;  %v5863_v59 = vor.u32 %v5004_v34, %v4576_v62 }
 0x124   :  { %7234 = vst [vmem:[#allocation83_spill] sm:$0xff] %v5829_v51  ;;  %v5001_v14 = vld [vmem:[#allocation10 + $0xe4] sm:$0xf0]  ;;  %v4526_v22 = vld [vmem:[#allocation10 + $0xa0] sm:$0xf] }
 0x125   :  { %7235 = vst [vmem:[#allocation84_spill] sm:$0xff] %v5831_v63  ;;  %1698 = vmatpush.bf16.msra.mxu2 %v5817_v20  ;;  %1711 = vmatpush.bf16.msra.mxu3 %v5819_v30  ;;  %v5869_v23 = vor.u32 %v5001_v14, %v4550_v58  ;;  %v4995_v21 = vld [vmem:[#allocation10 + $0xb4] sm:$0xf0]  ;;  %v4502_v58 = vld [vmem:[#allocation10 + $0x70] sm:$0xf] }
 0x126   :  { %7236 = vst [vmem:[#allocation85_spill] sm:$0xff] %v5833_v45  ;;  %1724 = vmatpush.bf16.msrb.mxu0 %v5823_v44  ;;  %1737 = vmatpush.bf16.msrb.mxu1 %v5825_v11  ;;  %v5046_v11 = vld [vmem:[#allocation10 + $0x254] sm:$0xf]  ;;  %v4989_v14 = vld [vmem:[#allocation10 + $0x84] sm:$0xf0] }
 0x127   :  { %7237 = vst [vmem:[#allocation86_spill] sm:$0xff] %v5841_v10 }
 0x128   :  { %7238 = vst [vmem:[#allocation87_spill] sm:$0xff] %v5843_v15  ;;  %1699 = vmatmul.bf16.vlgmr.msra.gmra.mxu2 %v5733_v60  ;;  %1712 = vmatmul.bf16.vlgmr.msra.gmra.mxu3 %v5735_v61 }
 0x129   :  { %1743 = vmatpush.bf16.msrb.mxu2 %v5827_v6  ;;  %1756 = vmatpush.bf16.msrb.mxu3 %v5829_v51  ;;  %7239 = vst [vmem:[#allocation88_spill] sm:$0xff] %v5847_v33  ;;  %v5049_v51 = vld [vmem:[#allocation10 + $0x264] sm:$0xf0]  ;;  %v4998_v6 = vld [vmem:[#allocation10 + $0xd4] sm:$0xf] }
 0x12a   :  { %1769 = vmatpush.bf16.msra.mxu0 %v5831_v63  ;;  %1782 = vmatpush.bf16.msra.mxu1 %v5833_v45  ;;  %7240 = vst [vmem:[#allocation89_spill] sm:$0xff] %v5849_v28  ;;  %v5865_v45 = vor.u32 %v5052_v3, %v4768_v46  ;;  %v4742_v63 = vld [vmem:[#allocation10 + $0x250] sm:$0xf]  ;;  %v4718_v3 = vld [vmem:[#allocation10 + $0x220] sm:$0xf] }
 0x12b   :  { %1725 = vmatmul.bf16.vlgmr.msrb.gmra.mxu0 %v5733_v60  ;;  %1738 = vmatmul.bf16.vlgmr.msrb.gmra.mxu1 %v5735_v61  ;;  %7241 = vst [vmem:[#allocation90_spill] sm:$0xff] %v5857_v50  ;;  %v5871_v27 = vor.u32 %v5049_v51, %v4742_v63  ;;  %v5043_v46 = vld [vmem:[#allocation10 + $0x234] sm:$0xf0]  ;;  %v5881_v51 = vor.u32 %v4995_v21, %v4526_v22 }
 0x12c   :  { %7242 = vst [vmem:[#allocation91_spill] sm:$0xff] %v5859_v2  ;;  %v5883_v63 = vor.u32 %v5043_v46, %v4718_v3  ;;  %v5893_v22 = vor.u32 %v4989_v14, %v4502_v58  ;;  %v4478_v3 = vld [vmem:[#allocation10 + $0x40] sm:$0xf]  ;;  %v4983_v46 = vld [vmem:[#allocation10 + $0x54] sm:$0xf0] }
 0x12d   :  { %1744 = vmatpush.bf16.msrb.mxu2 %v5841_v10  ;;  %1757 = vmatpush.bf16.msrb.mxu3 %v5843_v15  ;;  %7243 = vst [vmem:[#allocation92_spill] sm:$0xff] %v5863_v59  ;;  %v4552_v10 = vld [vmem:[#allocation10 + $0xe8] sm:$0xf0]  ;;  %v5905_v58 = vor.u32 %v4983_v46, %v4478_v3 }
 0x12e   :  { %1770 = vmatpush.bf16.msra.mxu0 %v5847_v33  ;;  %1783 = vmatpush.bf16.msra.mxu1 %v5849_v28  ;;  %7244 = vst [vmem:[#allocation93_spill] sm:$0xff] %v5865_v45  ;;  %v4744_v15 = vld [vmem:[#allocation10 + $0x268] sm:$0xf0]  ;;  %v5875_v34 = vor.u32 %v4998_v6, %v4552_v10  ;;  %v4992_v28 = vld [vmem:[#allocation10 + $0xa4] sm:$0xf] }
 0x12f   :  { %7245 = vst [vmem:[#allocation94_spill] sm:$0xff] %v5869_v23  ;;  %v5877_v62 = vor.u32 %v5046_v11, %v4744_v15  ;;  %v5040_v33 = vld [vmem:[#allocation10 + $0x224] sm:$0xf]  ;;  %v4694_v10 = vld [vmem:[#allocation10 + $0x1f0] sm:$0xf] }
 0x130   :  { %7246 = vst [vmem:[#allocation95_spill] sm:$0xff] %v5871_v27  ;;  %v5037_v15 = vld [vmem:[#allocation10 + $0x204] sm:$0xf0] }
 0x131   :  { %1745 = vmatpush.bf16.msrb.mxu2 %v5857_v50  ;;  %1758 = vmatpush.bf16.msrb.mxu3 %v5859_v2  ;;  %7247 = vst [vmem:[#allocation96_spill] sm:$0xff] %v5875_v34  ;;  %v4528_v50 = vld [vmem:[#allocation10 + $0xb8] sm:$0xf0]  ;;  %v5895_v21 = vor.u32 %v5037_v15, %v4694_v10  ;;  %v4454_v10 = vld [vmem:[#allocation10 + $0x10] sm:$0xf] }
 0x132   :  { %1771 = vmatpush.bf16.msra.mxu0 %v5863_v59  ;;  %1784 = vmatpush.bf16.msra.mxu1 %v5865_v45  ;;  %7248 = vst [vmem:[#allocation97_spill] sm:$0xff] %v5877_v62  ;;  %v4720_v2 = vld [vmem:[#allocation10 + $0x238] sm:$0xf0]  ;;  %v5887_v6 = vor.u32 %v4992_v28, %v4528_v50  ;;  %v4986_v45 = vld [vmem:[#allocation10 + $0x74] sm:$0xf] }
 0x133   :  { %7249 = vst [vmem:[#allocation98_spill] sm:$0xff] %v5881_v51  ;;  %v5889_v11 = vor.u32 %v5040_v33, %v4720_v2  ;;  %v5034_v59 = vld [vmem:[#allocation10 + $0x1f4] sm:$0xf]  ;;  %v4670_v50 = vld [vmem:[#allocation10 + $0x1c0] sm:$0xf] }
 0x134   :  { %7250 = vst [vmem:[#allocation99_spill] sm:$0xff] %v5883_v63  ;;  %v5031_v2 = vld [vmem:[#allocation10 + $0x1d4] sm:$0xf0]  ;;  %v4977_v15 = vld [vmem:[#allocation10 + $0x24] sm:$0xf0] }
 0x135   :  { %1746 = vmatpush.bf16.msrb.mxu2 %v5869_v23  ;;  %1759 = vmatpush.bf16.msrb.mxu3 %v5871_v27  ;;  %7251 = vst [vmem:[#allocation100_spill] sm:$0xff] %v5887_v6  ;;  %v4504_v23 = vld [vmem:[#allocation10 + $0x88] sm:$0xf0]  ;;  %v5907_v14 = vor.u32 %v5031_v2, %v4670_v50  ;;  %v5917_v3 = vor.u32 %v4977_v15, %v4454_v10 }
 0x136   :  { %1772 = vmatpush.bf16.msra.mxu0 %v5875_v34  ;;  %1785 = vmatpush.bf16.msra.mxu1 %v5877_v62  ;;  %7252 = vst [vmem:[#allocation101_spill] sm:$0xff] %v5889_v11  ;;  %v4696_v27 = vld [vmem:[#allocation10 + $0x208] sm:$0xf0]  ;;  %v5899_v33 = vor.u32 %v4986_v45, %v4504_v23  ;;  %v4980_v62 = vld [vmem:[#allocation10 + $0x44] sm:$0xf] }
 0x137   :  { %7253 = vst [vmem:[#allocation102_spill] sm:$0xff] %v5893_v22  ;;  %v5901_v28 = vor.u32 %v5034_v59, %v4696_v27  ;;  %v5028_v34 = vld [vmem:[#allocation10 + $0x1c4] sm:$0xf]  ;;  %v4646_v23 = vld [vmem:[#allocation10 + $0x190] sm:$0xf] }
 0x138   :  { %7254 = vst [vmem:[#allocation103_spill] sm:$0xff] %v5895_v21  ;;  %v5025_v27 = vld [vmem:[#allocation10 + $0x1a4] sm:$0xf0] }
 0x139   :  { %1747 = vmatpush.bf16.msrb.mxu2 %v5881_v51  ;;  %1760 = vmatpush.bf16.msrb.mxu3 %v5883_v63  ;;  %v4480_v51 = vld [vmem:[#allocation10 + $0x58] sm:$0xf0]  ;;  %7255 = vst [vmem:[#allocation104_spill] sm:$0xff] %v5917_v3  ;;  %v5919_v46 = vor.u32 %v5025_v27, %v4646_v23 }
 0x13a   :  { %1773 = vmatpush.bf16.msra.mxu0 %v5887_v6  ;;  %1786 = vmatpush.bf16.msra.mxu1 %v5889_v11  ;;  %v4672_v63 = vld [vmem:[#allocation10 + $0x1d8] sm:$0xf0]  ;;  %v5911_v45 = vor.u32 %v4980_v62, %v4480_v51  ;;  %v4974_v11 = vld [vmem:[#allocation10 + $0x14] sm:$0xf]  ;;  %v5929_v51 = vld [vmem:[#allocation12] sm:$0x3f] }
 0x13b   :  { %v5913_v59 = vor.u32 %v5028_v34, %v4672_v63  ;;  %v5022_v6 = vld [vmem:[#allocation10 + $0x194] sm:$0xf]  ;;  %v407_v63 = vperm.slane %v5929_v51, 1 }
 0x13d   :  { %1748 = vmatpush.bf16.msrb.mxu2 %v5893_v22  ;;  %1761 = vmatpush.bf16.msrb.mxu3 %v5895_v21  ;;  %v4456_v22 = vld [vmem:[#allocation10 + $0x28] sm:$0xf0] }
 0x13e   :  { %1774 = vmatpush.bf16.msra.mxu0 %v5899_v33  ;;  %1787 = vmatpush.bf16.msra.mxu1 %v5901_v28  ;;  %v4648_v21 = vld [vmem:[#allocation10 + $0x1a8] sm:$0xf0]  ;;  %v5923_v34 = vor.u32 %v4974_v11, %v4456_v22 }
 0x13f   :  { %v5925_v62 = vor.u32 %v5022_v6, %v4648_v21  ;;  %v406_v21 = vperm.slane %v5929_v51, 0 }
 0x140   :  { %7256 = vst [vmem:[#allocation105_spill] sm:$0xff] %v5923_v34 }
 0x141   :  { %1749 = vmatpush.bf16.msrb.mxu2 %v5905_v58  ;;  %1762 = vmatpush.bf16.msrb.mxu3 %v5907_v14 }
 0x142   :  { %1775 = vmatpush.bf16.msra.mxu0 %v5911_v45  ;;  %1788 = vmatpush.bf16.msra.mxu1 %v5913_v59 }
 0x145   :  { %1750 = vmatpush.bf16.msrb.mxu2 %v5917_v3  ;;  %1763 = vmatpush.bf16.msrb.mxu3 %v5919_v46  ;;  %v933_v6 = vpop.f32.mrf.mxu0  ;;  %v946_v11 = vpop.f32.mrf.mxu1 }
 0x146   :  { %1776 = vmatpush.bf16.msra.mxu0 %v5923_v34  ;;  %1789 = vmatpush.bf16.msra.mxu1 %v5925_v62  ;;  %v934_v22 = vadd.f32 %v933_v6, %v407_v63  ;;  %v409_v6 = vperm.slane %v5929_v51, 3 }
 0x148   :  { %1751 = vmatmul.bf16.vlgmr.msrb.gmra.mxu2 %v5733_v60  ;;  %1764 = vmatmul.bf16.vlgmr.msrb.gmra.mxu3 %v5735_v61  ;;  %v5945_v50 = vadd.f32 %v946_v11, %v934_v22 }
 0x149   :  { %1905 = vmatpush.bf16.msra.mxu2 %v5623_v52  ;;  %1918 = vmatpush.bf16.msra.mxu3 %v5625_v53 }
 0x14a   :  { %1777 = vmatmul.bf16.vlgmr.msra.gmra.mxu0 %v5733_v60  ;;  %1790 = vmatmul.bf16.vlgmr.msra.gmra.mxu1 %v5735_v61  ;;  %7257 = vst [vmem:[#allocation106_spill] sm:$0xff] %v5945_v50  ;;  %v907_v60 = vpop.f32.mrf.mxu2  ;;  %v920_v61 = vpop.f32.mrf.mxu3 }
 0x14b   :  { %1931 = vmatpush.bf16.msrb.mxu0 %v5627_v56  ;;  %1944 = vmatpush.bf16.msrb.mxu1 %v5629_v57  ;;  %v908_v2 = vadd.f32 %v907_v60, %v406_v21  ;;  %v408_v60 = vperm.slane %v5929_v51, 2 }
 0x14d   :  { %1906 = vmatpush.bf16.msra.mxu2 %v5633_v0  ;;  %1919 = vmatpush.bf16.msra.mxu3 %v5635_v1  ;;  %v5953_v10 = vadd.f32 %v920_v61, %v908_v2  ;;  %v935_v15 = vpop.f32.mrf.mxu0  ;;  %v948_v23 = vpop.f32.mrf.mxu1 }
 0x14f   :  { %1932 = vmatpush.bf16.msrb.mxu0 %v5639_v4  ;;  %1945 = vmatpush.bf16.msrb.mxu1 %v5641_v5  ;;  %7258 = vst [vmem:[#allocation107_spill] sm:$0xff] %v5953_v10 }
 0x151   :  { %1907 = vmatpush.bf16.msra.mxu2 %v5649_v12  ;;  %1920 = vmatpush.bf16.msra.mxu3 %v5651_v13 }
 0x152   :  { %v909_v27 = vpop.f32.mrf.mxu2  ;;  %v922_v63 = vpop.f32.mrf.mxu3 }
 0x153   :  { %1933 = vmatpush.bf16.msrb.mxu0 %v5655_v18  ;;  %1946 = vmatpush.bf16.msrb.mxu1 %v5657_v19 }
 0x155   :  { %1908 = vmatpush.bf16.msra.mxu2 %v5661_v24  ;;  %1921 = vmatpush.bf16.msra.mxu3 %v5663_v26  ;;  %v985_v11 = vpop.f32.mrf.mxu0  ;;  %v998_v22 = vpop.f32.mrf.mxu1 }
 0x156   :  { %v986_v21 = vadd.f32 %v985_v11, %v409_v6  ;;  %v7261_v11 = vld [vmem:[#allocation53_spill] sm:$0xff] }
 0x157   :  { %1934 = vmatpush.bf16.msrb.mxu0 %v5667_v29  ;;  %1947 = vmatpush.bf16.msrb.mxu1 %v5669_v25 }
 0x158   :  { %v5967_v61 = vadd.f32 %v998_v22, %v986_v21 }
 0x159   :  { %1909 = vmatpush.bf16.msra.mxu2 %v5673_v35  ;;  %1922 = vmatpush.bf16.msra.mxu3 %v5675_v36 }
 0x15a   :  { %7259 = vst [vmem:[#allocation108_spill] sm:$0xff] %v5967_v61  ;;  %v959_v2 = vpop.f32.mrf.mxu2  ;;  %v972_v15 = vpop.f32.mrf.mxu3 }
 0x15b   :  { %1935 = vmatpush.bf16.msrb.mxu0 %v5679_v39  ;;  %1948 = vmatpush.bf16.msrb.mxu1 %v5681_v40  ;;  %v960_v23 = vadd.f32 %v959_v2, %v408_v60  ;;  %v7262_v60 = vld [vmem:[#allocation54_spill] sm:$0xff]  ;;  %v7263_v2 = vld [vmem:[#allocation55_spill] sm:$0xff] }
 0x15d   :  { %1910 = vmatpush.bf16.msra.mxu2 %v5685_v48  ;;  %1923 = vmatpush.bf16.msra.mxu3 %v5687_v49  ;;  %v5975_v27 = vadd.f32 %v972_v15, %v960_v23  ;;  %v987_v63 = vpop.f32.mrf.mxu0  ;;  %v1000_v6 = vpop.f32.mrf.mxu1  ;;  %v411_v15 = vperm.slane %v5929_v51, 5  ;;  %v7264_v23 = vld [vmem:[#allocation56_spill] sm:$0xff] }
 0x15e   :  { %v7265_v63 = vld [vmem:[#allocation57_spill] sm:$0xff]  ;;  %v7266_v6 = vld [vmem:[#allocation58_spill] sm:$0xff] }
 0x15f   :  { %1936 = vmatpush.bf16.msrb.mxu0 %v5691_v54  ;;  %1949 = vmatpush.bf16.msrb.mxu1 %v5693_v55  ;;  %7260 = vst [vmem:[#allocation109_spill] sm:$0xff] %v5975_v27 }
 0x161   :  { %1911 = vmatpush.bf16.msra.mxu2 %v5697_v7  ;;  %1924 = vmatpush.bf16.msra.mxu3 %v5699_v8 }
 0x162   :  { %v961_v22 = vpop.f32.mrf.mxu2  ;;  %v974_v21 = vpop.f32.mrf.mxu3 }
 0x163   :  { %1937 = vmatpush.bf16.msrb.mxu0 %v5703_v16  ;;  %1950 = vmatpush.bf16.msrb.mxu1 %v5705_v17  ;;  %v410_v22 = vperm.slane %v5929_v51, 4  ;;  %v7268_v21 = vld [vmem:[#allocation60_spill] sm:$0xff]  ;;  %v7275_v51 = vld [vmem:[#allocation67_spill] sm:$0xff] }
 0x165   :  { %1912 = vmatpush.bf16.msra.mxu2 %v5711_v31  ;;  %1925 = vmatpush.bf16.msra.mxu3 %v5713_v32 }
 0x167   :  { %1938 = vmatpush.bf16.msrb.mxu0 %v5719_v38  ;;  %1951 = vmatpush.bf16.msrb.mxu1 %v5721_v41  ;;  %v7272_v41 = vld [vmem:[#allocation64_spill] sm:$0xff] }
 0x168   :  { %v1037_v38 = vpop.f32.mrf.mxu0 }
 0x169   :  { %1957 = vmatpush.bf16.msrb.mxu2 %v5723_v42  ;;  %1970 = vmatpush.bf16.msrb.mxu3 %v5725_v43  ;;  %v7267_v42 = vld [vmem:[#allocation59_spill] sm:$0xff]  ;;  %v1038_v31 = vadd.f32 %v1037_v38, %v411_v15  ;;  %v7274_v38 = vld [vmem:[#allocation66_spill] sm:$0xff] }
 0x16b   :  { %1983 = vmatpush.bf16.msra.mxu0 %v5727_v47  ;;  %1996 = vmatpush.bf16.msra.mxu1 %v7261_v11  ;;  %v1050_v47 = vpop.f32.mrf.mxu1  ;;  %v7270_v11 = vld [vmem:[#allocation62_spill] sm:$0xff]  ;;  %v1024_v43 = vpop.f32.mrf.mxu3 }
 0x16d   :  { %1958 = vmatpush.bf16.msrb.mxu2 %v7262_v60  ;;  %1971 = vmatpush.bf16.msrb.mxu3 %v7263_v2  ;;  %v7269_v60 = vld [vmem:[#allocation61_spill] sm:$0xff]  ;;  %v5995_v2 = vadd.f32 %v1050_v47, %v1038_v31  ;;  %v7276_v47 = vld [vmem:[#allocation68_spill] sm:$0xff] }
 0x16f   :  { %1984 = vmatpush.bf16.msra.mxu0 %v7264_v23  ;;  %1997 = vmatpush.bf16.msra.mxu1 %v7265_v63  ;;  %v7271_v23 = vld [vmem:[#allocation63_spill] sm:$0xff]  ;;  %v1011_v63 = vpop.f32.mrf.mxu2 }
 0x171   :  { %1959 = vmatpush.bf16.msrb.mxu2 %v7266_v6  ;;  %1972 = vmatpush.bf16.msrb.mxu3 %v7267_v42  ;;  %v1012_v6 = vadd.f32 %v1011_v63, %v410_v22  ;;  %v7273_v42 = vld [vmem:[#allocation65_spill] sm:$0xff] }
 0x173   :  { %1985 = vmatpush.bf16.msra.mxu0 %v7268_v21  ;;  %1998 = vmatpush.bf16.msra.mxu1 %v7269_v60  ;;  %v6003_v15 = vadd.f32 %v1024_v43, %v1012_v6  ;;  %v1039_v21 = vpop.f32.mrf.mxu0  ;;  %v1052_v31 = vpop.f32.mrf.mxu1  ;;  %v7279_v60 = vld [vmem:[#allocation71_spill] sm:$0xff]  ;;  %v7284_v6 = vld [vmem:[#allocation81_spill] sm:$0xff] }
 0x174   :  { %v1026_v22 = vpop.f32.mrf.mxu3  ;;  %v7283_v43 = vld [vmem:[#allocation75_spill] sm:$0xff] }
 0x175   :  { %1960 = vmatpush.bf16.msrb.mxu2 %v7270_v11  ;;  %1973 = vmatpush.bf16.msrb.mxu3 %v7271_v23  ;;  %v7277_v11 = vld [vmem:[#allocation69_spill] sm:$0xff]  ;;  %v7278_v23 = vld [vmem:[#allocation70_spill] sm:$0xff] }
 0x177   :  { %1986 = vmatpush.bf16.msra.mxu0 %v7272_v41  ;;  %1999 = vmatpush.bf16.msra.mxu1 %v7273_v42  ;;  %v1013_v63 = vpop.f32.mrf.mxu2  ;;  %v7280_v41 = vld [vmem:[#allocation72_spill] sm:$0xff]  ;;  %v7281_v42 = vld [vmem:[#allocation73_spill] sm:$0xff] }
 0x179   :  { %1961 = vmatpush.bf16.msrb.mxu2 %v7274_v38  ;;  %1974 = vmatpush.bf16.msrb.mxu3 %v7275_v51  ;;  %v7282_v38 = vld [vmem:[#allocation74_spill] sm:$0xff] }
 0x17b   :  { %1987 = vmatpush.bf16.msra.mxu0 %v7276_v47  ;;  %2000 = vmatpush.bf16.msra.mxu1 %v7277_v11 }
 0x17d   :  { %1962 = vmatpush.bf16.msrb.mxu2 %v7278_v23  ;;  %1975 = vmatpush.bf16.msrb.mxu3 %v7279_v60 }
 0x17f   :  { %1988 = vmatpush.bf16.msra.mxu0 %v7280_v41  ;;  %2001 = vmatpush.bf16.msra.mxu1 %v7281_v42 }
 0x181   :  { %1963 = vmatpush.bf16.msrb.mxu2 %v7282_v38  ;;  %1976 = vmatpush.bf16.msrb.mxu3 %v7283_v43 }
 0x183   :  { %1989 = vmatpush.bf16.msra.mxu0 %v5811_v37  ;;  %2002 = vmatpush.bf16.msra.mxu1 %v5813_v9 }
 0x185   :  { %1964 = vmatpush.bf16.msrb.mxu2 %v5817_v20  ;;  %1977 = vmatpush.bf16.msrb.mxu3 %v5819_v30 }
 0x187   :  { %1990 = vmatpush.bf16.msra.mxu0 %v5823_v44  ;;  %2003 = vmatpush.bf16.msra.mxu1 %v7284_v6 }
 0x188   :  { %v1674_v21 = vpop.f32.mrf.mxu0  ;;  %v1687_v31 = vpop.f32.mrf.mxu1 }
 0x189   :  { %v1688_v23 = vadd.f32 %v1687_v31, %v1674_v21 }
 0x18b   :  { %v1648_v63 = vpop.f32.mrf.mxu2  ;;  %v1661_v22 = vpop.f32.mrf.mxu3  ;;  %v1796_v37 = vadd.f32 %v1688_v23, %v5945_v50 }
 0x18c   :  { %v1662_v9 = vadd.f32 %v1661_v22, %v1648_v63 }
 0x18d   :  { %v4821_v60 = vmul.f32 -1.442695, %v1796_v37 }
 0x18e   :  { %v1795_v20 = vadd.f32 %v1662_v9, %v5953_v10 }
 0x18f   :  { %5080 = vpow2.f32 %v4821_v60 }
 0x190   :  { %v1676_v41 = vpop.f32.mrf.mxu0  ;;  %v1689_v38 = vpop.f32.mrf.mxu1  ;;  %v4820_v30 = vmul.f32 -1.442695, %v1795_v20 }
 0x192   :  { %5082 = vpow2.f32 %v4820_v30 }
 0x193   :  { %v1650_v43 = vpop.f32.mrf.mxu2  ;;  %v1663_v42 = vpop.f32.mrf.mxu3 }
 0x195   :  { %v5081_v44 = vpop.eup %5080 }
 0x196   :  { %v1804_v11 = vadd.f32 1.0, %v5081_v44 }
 0x198   :  { %v5083_v32 = vpop.eup %5082  ;;  %5084 = vrcp.f32 %v1804_v11  ;;  %vm1825_vm7 = vweird.f32 %v1804_v11 }
 0x199   :  { %v1803_v43 = vadd.f32 1.0, %v5083_v32 }
 0x19b   :  { %5086 = vrcp.f32 %v1803_v43  ;;  %v1816_v10 = vand.u32 2147483648, %v1803_v43  ;;  %vm1810_vm13 = vweird.f32 %v1803_v43 }
 0x19e   :  { %v5085_v30 = vpop.eup %5084 }
 0x19f   :  { %vm1826_vm6 = vweird.f32 %v5085_v30 }
 0x1a0   :  { %vm1827_vm10 = vmor %vm1825_vm7, %vm1826_vm6 }
 0x1a1   :  { %v5087_v31 = vpop.eup %5086 }
 0x1a2   :  { %vm1811_vm11 = vweird.f32 %v5087_v31 }
 0x1a3   :  { %vm1812_vm14 = vmor %vm1810_vm13, %vm1811_vm11 }
 0x1a8   :  { %v1726_v6 = vpop.f32.mrf.mxu0  ;;  %v1739_v47 = vpop.f32.mrf.mxu1 }
 0x1a9   :  { %v1740_v51 = vadd.f32 %v1739_v47, %v1726_v6  ;;  %v1821_v6 = vmul.f32 %v5085_v30, %v1804_v11 }
 0x1ab   :  { %v1836_v41 = vadd.f32 %v1740_v51, %v5967_v61  ;;  %v1700_v38 = vpop.f32.mrf.mxu2  ;;  %v1713_v42 = vpop.f32.mrf.mxu3  ;;  %v1822_v63 = vsub.f32 1.0, %v1821_v6  ;;  %v1806_v61 = vmul.f32 %v5087_v31, %v1803_v43 }
 0x1ac   :  { %v1714_v23 = vadd.f32 %v1713_v42, %v1700_v38 }
 0x1ad   :  { %v4823_v21 = vmul.f32 -1.442695, %v1836_v41  ;;  %v1823_v38 = vmul.f32 %v5085_v30, %v1822_v63  ;;  %v1807_v42 = vsub.f32 1.0, %v1806_v61 }
 0x1ae   :  { %v1835_v37 = vadd.f32 %v1714_v23, %v5975_v27  ;;  %v1055_v23 = vld [vmem:[%s6959_s6] sm:$0x3]  ;;  %s5417_s6 = smov [#allocation13]  }
 0x1af   :  { %5088 = vpow2.f32 %v4823_v21  ;;  %v1824_v21 = vadd.f32 %v5085_v30, %v1823_v38  ;;  %v6037_v50 = vperm.slane %v1055_v23, 0  ;;  %s3948_s19 = sshll.u32 %s5417_s6, 4  ;;  %s3949_s19 = int_to_ptr.vmem [resolvable:$true] %s3948_s19 }
 0x1b0   :  { %v1728_v9 = vpop.f32.mrf.mxu0  ;;  %v1741_v60 = vpop.f32.mrf.mxu1  ;;  %v4822_v20 = vmul.f32 -1.442695, %v1835_v37  ;;  %v1831_v37 = vand.u32 2147483648, %v1804_v11 }
 0x1b1   :  { %v1808_v9 = vmul.f32 %v5087_v31, %v1807_v42  ;;  %v1829_v60 = vand.u32 2147483647, %v1804_v11  ;;  %v1828_v6 = vsel %vm1827_vm10, %v5085_v30, %v1824_v21  ;;  %v1814_v11 = vand.u32 2147483647, %v1803_v43 }
 0x1b2   :  { %5090 = vpow2.f32 %v4822_v20  ;;  %v6032_v20 = vperm.slane %v1055_v23, 1  ;;  %v1832_v63 = vor.u32 1.1754944e-38, %v1831_v37 }
 0x1b3   :  { %v1702_v44 = vpop.f32.mrf.mxu2  ;;  %v1715_v47 = vpop.f32.mrf.mxu3  ;;  %vm1830_vm12 = vcmp.eq.f32.partialorder %v1829_v60, 8.507059e+37  ;;  %vm1815_vm15 = vcmp.eq.f32.partialorder %v1814_v11, 8.507059e+37 }
 0x1b4   :  { %7285 = vst [vmem:[#allocation110_spill] sm:$0xff] %v6032_v20  ;;  %v1833_v42 = vsel %vm1830_vm12, %v1832_v63, %v1828_v6 }
 0x1b5   :  { %v5089_v51 = vpop.eup %5088 }
 0x1b6   :  { %v6023_v32 = vadd.f32 1.0, %v5089_v51 }
 0x1b8   :  { %v5091_v22 = vpop.eup %5090  ;;  %5092 = vrcp.f32 %v6023_v32  ;;  %vm1865_vm4 = vweird.f32 %v6023_v32 }
 0x1b9   :  { %v6025_v41 = vadd.f32 1.0, %v5091_v22  ;;  %v1809_v22 = vadd.f32 %v5087_v31, %v1808_v9 }
 0x1bb   :  { %5094 = vrcp.f32 %v6025_v41  ;;  %v1813_v9 = vsel %vm1812_vm14, %v5087_v31, %v1809_v22  ;;  %v1871_v22 = vand.u32 2147483648, %v6023_v32  ;;  %v1856_v11 = vand.u32 2147483648, %v6025_v41 }
 0x1bc   :  { %vm1850_vm6 = vweird.f32 %v6025_v41 }
 0x1be   :  { %v6034_v51 = vpop.eup %5092 }
 0x1bf   :  { %v1861_v30 = vmul.f32 %v6034_v51, %v6023_v32  ;;  %vm1866_vm1 = vweird.f32 %v6034_v51 }
 0x1c0   :  { %vm6051_vm5 = vmor %vm1865_vm4, %vm1866_vm1 }
 0x1c1   :  { %v5095_v27 = vpop.eup %5094  ;;  %v1862_v6 = vsub.f32 1.0, %v1861_v30 }
 0x1c2   :  { %v1846_v21 = vmul.f32 %v5095_v27, %v6025_v41  ;;  %vm1851_vm2 = vweird.f32 %v5095_v27 }
 0x1c3   :  { %vm1852_vm7 = vmor %vm1850_vm6, %vm1851_vm2 }
 0x1c4   :  { %v1847_v63 = vsub.f32 1.0, %v1846_v21  ;;  %v1869_v21 = vand.u32 2147483647, %v6023_v32 }
 0x1c6   :  { %vm1870_vm10 = vcmp.eq.f32.partialorder %v1869_v21, 8.507059e+37  ;;  %v7299_v21 = vld [vmem:[#allocation90_spill] sm:$0xff] }
 0x1c7   :  { %v1778_v44 = vpop.f32.mrf.mxu0  ;;  %v1791_v47 = vpop.f32.mrf.mxu1 }
 0x1c8   :  { %v1792_v61 = vadd.f32 %v1791_v47, %v1778_v44  ;;  %v1817_v44 = vor.u32 1.1754944e-38, %v1816_v10 }
 0x1ca   :  { %v1881_v38 = vadd.f32 %v6032_v20, %v1792_v61  ;;  %v1818_v61 = vsel %vm1815_vm15, %v1817_v44, %v1813_v9 }
 0x1cb   :  { %v1752_v7 = vpop.f32.mrf.mxu2  ;;  %v1765_v17 = vpop.f32.mrf.mxu3 }
 0x1cc   :  { %v1883_v16 = vmul.f32 %v1881_v38, %v1833_v42  ;;  %v1766_v37 = vadd.f32 %v1765_v17, %v1752_v7  ;;  %v1863_v7 = vmul.f32 %v6034_v51, %v1862_v6  ;;  %v1848_v17 = vmul.f32 %v5095_v27, %v1847_v63 }
 0x1ce   :  { %v1885_v60 = vadd.f32 %v1883_v16, %v5995_v2  ;;  %v1880_v47 = vadd.f32 %v6037_v50, %v1766_v37  ;;  %v1864_v10 = vadd.f32 %v6034_v51, %v1863_v7  ;;  %v1849_v31 = vadd.f32 %v5095_v27, %v1848_v17 }
 0x1cf   :  { %v1780_v43 = vpop.f32.mrf.mxu0  ;;  %v1793_v23 = vpop.f32.mrf.mxu1  ;;  %v1854_v37 = vand.u32 2147483647, %v6025_v41 }
 0x1d0   :  { %5096 = vtanh.f32 %v1885_v60  ;;  %v1882_v38 = vmul.f32 %v1880_v47, %v1818_v61  ;;  %v1868_v60 = vsel %vm6051_vm5, %v6034_v51, %v1864_v10  ;;  %v1853_v44 = vsel %vm1852_vm7, %v5095_v27, %v1849_v31  ;;  %v7288_v47 = vld [vmem:[#allocation45_spill] sm:$0xff]  ;;  %v7291_v10 = vld [vmem:[#allocation82_spill] sm:$0xff]  ;;  %v7292_v31 = vld [vmem:[#allocation83_spill] sm:$0xff] }
 0x1d1   :  { %v1872_v23 = vor.u32 1.1754944e-38, %v1871_v22  ;;  %v1857_v61 = vor.u32 1.1754944e-38, %v1856_v11  ;;  %vm1855_vm11 = vcmp.eq.f32.partialorder %v1854_v37, 8.507059e+37  ;;  %v7293_v22 = vld [vmem:[#allocation84_spill] sm:$0xff]  ;;  %v7294_v11 = vld [vmem:[#allocation85_spill] sm:$0xff]  ;;  %v7300_v37 = vld [vmem:[#allocation91_spill] sm:$0xff] }
 0x1d2   :  { %v1884_v42 = vadd.f32 %v1882_v38, %v6003_v15 }
 0x1d3   :  { %v1754_v20 = vpop.f32.mrf.mxu2  ;;  %v1767_v8 = vpop.f32.mrf.mxu3  ;;  %v1873_v63 = vsel %vm1870_vm10, %v1872_v23, %v1868_v60  ;;  %v1858_v38 = vsel %vm1855_vm11, %v1857_v61, %v1853_v44  ;;  %v7302_v60 = vld [vmem:[#allocation93_spill] sm:$0xff]  ;;  %v7303_v44 = vld [vmem:[#allocation94_spill] sm:$0xff] }
 0x1d4   :  { %5098 = vtanh.f32 %v1884_v42  ;;  %v7298_v8 = vld [vmem:[#allocation89_spill] sm:$0xff]  ;;  %v7307_v61 = vld [vmem:[#allocation98_spill] sm:$0xff] }
 0x1d5   :  { %v7306_v23 = vld [vmem:[#allocation97_spill] sm:$0xff] }
 0x1d6   :  { %v5097_v16 = vpop.eup %5096 }
 0x1d7   :  { %v1890_v30 = vrot.slane %v5097_v16, 7 }
 0x1da   :  { %v5099_v20 = vpop.eup %5098 }
 0x1db   :  { %v1891_v9 = vsel %vm197_vm3, %v5099_v20, %v1890_v30  ;;  %v7296_v30 = vld [vmem:[#allocation87_spill] sm:$0xff] }
 0x1dc   :  { %v1893_v43 = vsub.f32 %v7288_v47, %v1891_v9  ;;  %v7301_v9 = vld [vmem:[#allocation92_spill] sm:$0xff]  ;;  %v7304_v47 = vld [vmem:[#allocation95_spill] sm:$0xff] }
 0x1de   :  { %v1895_v6 = vperm.slane %v1893_v43, 0  ;;  %v1896_v32 = vperm.slane %v1893_v43, 1  ;;  %v7305_v43 = vld [vmem:[#allocation96_spill] sm:$0xff] }
 0x1e0   :  { %v1899_v42 = vmul.f32 %v1895_v6, %v1858_v38  ;;  %v1900_v41 = vmul.f32 %v1896_v32, %v1873_v63  ;;  %v7308_v6 = vld [vmem:[#allocation99_spill] sm:$0xff]  ;;  %v7309_v32 = vld [vmem:[#allocation100_spill] sm:$0xff]  ;;  %v7310_v63 = vld [vmem:[#allocation101_spill] sm:$0xff] }
 0x1e1   :  { %v7311_v38 = vld [vmem:[#allocation102_spill] sm:$0xff] }
 0x1e2   :  { %v6063_v7 = vadd.f32 %v5099_v20, %v1899_v42  ;;  %v6065_v17 = vadd.f32 %v5097_v16, %v1900_v41  ;;  %v7295_v16 = vld [vmem:[#allocation86_spill] sm:$0xff]  ;;  %v7297_v20 = vld [vmem:[#allocation88_spill] sm:$0xff]  ;;  %v7312_v42 = vld [vmem:[#allocation103_spill] sm:$0xff] }
 0x1e3   :  { %v7313_v41 = vld [vmem:[#allocation42_spill] sm:$0xff] }
 0x1e4   :  { %7289 = vst [vmem:[#allocation45_spill] sm:$0xff] %v6063_v7  ;;  %v1903_v51 = vpack.c.bf16 %v6063_v7, %v6063_v7  ;;  %v1904_v27 = vpack.c.bf16 %v6065_v17, %v6065_v17 }
 0x1e5   :  { %7290 = vst [vmem:[#allocation111_spill] sm:$0xff] %v6065_v17 }
 0x1e6   :  { %1913 = vmatmul.bf16.vlgmr.msra.gmra.mxu2 %v1903_v51  ;;  %1926 = vmatmul.bf16.vlgmr.msra.gmra.mxu3 %v1904_v27 }
 0x1e7   :  { %1939 = vmatmul.bf16.vlgmr.msrb.gmra.mxu0 %v1903_v51  ;;  %1952 = vmatmul.bf16.vlgmr.msrb.gmra.mxu1 %v1904_v27 }
 0x1e8   :  { %2009 = vmatpush.bf16.msra.mxu2 %v7291_v10  ;;  %2022 = vmatpush.bf16.msra.mxu3 %v7292_v31 }
 0x1e9   :  { %2035 = vmatpush.bf16.msrb.mxu0 %v7293_v22  ;;  %2048 = vmatpush.bf16.msrb.mxu1 %v7294_v11 }
 0x1ec   :  { %2010 = vmatpush.bf16.msra.mxu2 %v7295_v16  ;;  %2023 = vmatpush.bf16.msra.mxu3 %v7296_v30 }
 0x1ed   :  { %2036 = vmatpush.bf16.msrb.mxu0 %v7297_v20  ;;  %2049 = vmatpush.bf16.msrb.mxu1 %v7298_v8 }
 0x1f0   :  { %2011 = vmatpush.bf16.msra.mxu2 %v7299_v21  ;;  %2024 = vmatpush.bf16.msra.mxu3 %v7300_v37 }
 0x1f1   :  { %2037 = vmatpush.bf16.msrb.mxu0 %v7301_v9  ;;  %2050 = vmatpush.bf16.msrb.mxu1 %v7302_v60 }
 0x1f4   :  { %2012 = vmatpush.bf16.msra.mxu2 %v7303_v44  ;;  %2025 = vmatpush.bf16.msra.mxu3 %v7304_v47 }
 0x1f5   :  { %2038 = vmatpush.bf16.msrb.mxu0 %v7305_v43  ;;  %2051 = vmatpush.bf16.msrb.mxu1 %v7306_v23 }
 0x1f6   :  { %1965 = vmatmul.bf16.vlgmr.msrb.gmra.mxu2 %v1903_v51  ;;  %1978 = vmatmul.bf16.vlgmr.msrb.gmra.mxu3 %v1904_v27 }
 0x1f7   :  { %1991 = vmatmul.bf16.vlgmr.msra.gmra.mxu0 %v1903_v51  ;;  %2004 = vmatmul.bf16.vlgmr.msra.gmra.mxu1 %v1904_v27 }
 0x1f8   :  { %2013 = vmatpush.bf16.msra.mxu2 %v7307_v61  ;;  %2026 = vmatpush.bf16.msra.mxu3 %v7308_v6 }
 0x1f9   :  { %2039 = vmatpush.bf16.msrb.mxu0 %v7309_v32  ;;  %2052 = vmatpush.bf16.msrb.mxu1 %v7310_v63 }
 0x1fc   :  { %2014 = vmatpush.bf16.msra.mxu2 %v7311_v38  ;;  %2027 = vmatpush.bf16.msra.mxu3 %v7312_v42 }
 0x1fd   :  { %2040 = vmatpush.bf16.msrb.mxu0 %v5899_v33  ;;  %2053 = vmatpush.bf16.msrb.mxu1 %v5901_v28 }
 0x200   :  { %2015 = vmatpush.bf16.msra.mxu2 %v5905_v58  ;;  %2028 = vmatpush.bf16.msra.mxu3 %v5907_v14 }
 0x201   :  { %2041 = vmatpush.bf16.msrb.mxu0 %v5911_v45  ;;  %2054 = vmatpush.bf16.msrb.mxu1 %v5913_v59 }
 0x204   :  { %2016 = vmatpush.bf16.msra.mxu2 %v5917_v3  ;;  %2029 = vmatpush.bf16.msra.mxu3 %v5919_v46 }
 0x205   :  { %2042 = vmatpush.bf16.msrb.mxu0 %v5923_v34  ;;  %2055 = vmatpush.bf16.msrb.mxu1 %v5925_v62 }
 0x207   :  { %2017 = vmatmul.bf16.vlgmr.msra.gmra.mxu2 %v1903_v51  ;;  %2030 = vmatmul.bf16.vlgmr.msra.gmra.mxu3 %v1904_v27 }
 0x208   :  { %2208 = vmatpush.bf16.msrb.mxu3 %v5625_v53  ;;  %2043 = vmatmul.bf16.vlgmr.msrb.gmra.mxu0 %v1903_v51  ;;  %v7314_v51 = vld [vmem:[#allocation44_spill] sm:$0xff] }
 0x209   :  { %2234 = vmatpush.bf16.msra.mxu1 %v5629_v57  ;;  %2195 = vmatpush.bf16.msrb.mxu2 %v5623_v52 }
 0x20a   :  { %2056 = vmatmul.bf16.vlgmr.msrb.gmra.mxu1 %v1904_v27  ;;  %2221 = vmatpush.bf16.msra.mxu0 %v5627_v56  ;;  %v7315_v27 = vld [vmem:[#allocation41_spill] sm:$0xff] }
 0x20c   :  { %2209 = vmatpush.bf16.msrb.mxu3 %v5635_v1 }
 0x20d   :  { %2235 = vmatpush.bf16.msra.mxu1 %v5641_v5  ;;  %2196 = vmatpush.bf16.msrb.mxu2 %v5633_v0 }
 0x20e   :  { %2222 = vmatpush.bf16.msra.mxu0 %v5639_v4 }
 0x210   :  { %2210 = vmatpush.bf16.msrb.mxu3 %v5651_v13 }
 0x211   :  { %2236 = vmatpush.bf16.msra.mxu1 %v5657_v19  ;;  %2197 = vmatpush.bf16.msrb.mxu2 %v5649_v12 }
 0x212   :  { %2223 = vmatpush.bf16.msra.mxu0 %v5655_v18 }
 0x214   :  { %2211 = vmatpush.bf16.msrb.mxu3 %v5663_v26 }
 0x215   :  { %2237 = vmatpush.bf16.msra.mxu1 %v5669_v25  ;;  %2198 = vmatpush.bf16.msrb.mxu2 %v5661_v24  ;;  %v7317_v24 = vld [vmem:[#allocation47_spill] sm:$0xff] }
 0x216   :  { %2224 = vmatpush.bf16.msra.mxu0 %v5667_v29  ;;  %v7316_v29 = vld [vmem:[#allocation43_spill] sm:$0xff] }
 0x218   :  { %2212 = vmatpush.bf16.msrb.mxu3 %v5675_v36  ;;  %v7353_v36 = vld [vmem:[#allocation106_spill] sm:$0xff] }
 0x219   :  { %2238 = vmatpush.bf16.msra.mxu1 %v5681_v40  ;;  %2199 = vmatpush.bf16.msrb.mxu2 %v5673_v35  ;;  %v7318_v35 = vld [vmem:[#allocation49_spill] sm:$0xff] }
 0x21a   :  { %2225 = vmatpush.bf16.msra.mxu0 %v5679_v39  ;;  %v7319_v39 = vld [vmem:[#allocation51_spill] sm:$0xff] }
 0x21c   :  { %2213 = vmatpush.bf16.msrb.mxu3 %v5687_v49  ;;  %v7320_v49 = vld [vmem:[#allocation53_spill] sm:$0xff] }
 0x21d   :  { %2239 = vmatpush.bf16.msra.mxu1 %v5693_v55  ;;  %2200 = vmatpush.bf16.msrb.mxu2 %v5685_v48  ;;  %v7321_v55 = vld [vmem:[#allocation46_spill] sm:$0xff]  ;;  %v7322_v48 = vld [vmem:[#allocation48_spill] sm:$0xff] }
 0x21e   :  { %2226 = vmatpush.bf16.msra.mxu0 %v5691_v54  ;;  %v7323_v54 = vld [vmem:[#allocation50_spill] sm:$0xff] }
 0x220   :  { %2214 = vmatpush.bf16.msrb.mxu3 %v7313_v41  ;;  %v7324_v41 = vld [vmem:[#allocation52_spill] sm:$0xff] }
 0x221   :  { %2240 = vmatpush.bf16.msra.mxu1 %v7314_v51  ;;  %2201 = vmatpush.bf16.msrb.mxu2 %v7315_v27  ;;  %v7325_v51 = vld [vmem:[#allocation55_spill] sm:$0xff]  ;;  %v7326_v27 = vld [vmem:[#allocation57_spill] sm:$0xff] }
 0x222   :  { %2227 = vmatpush.bf16.msra.mxu0 %v7316_v29  ;;  %v7327_v29 = vld [vmem:[#allocation54_spill] sm:$0xff] }
 0x224   :  { %2215 = vmatpush.bf16.msrb.mxu3 %v7317_v24  ;;  %v7328_v24 = vld [vmem:[#allocation56_spill] sm:$0xff] }
 0x225   :  { %2241 = vmatpush.bf16.msra.mxu1 %v7318_v35  ;;  %2202 = vmatpush.bf16.msrb.mxu2 %v7321_v55  ;;  %v7329_v35 = vld [vmem:[#allocation59_spill] sm:$0xff]  ;;  %v7332_v55 = vld [vmem:[#allocation60_spill] sm:$0xff] }
 0x226   :  { %2228 = vmatpush.bf16.msra.mxu0 %v7322_v48  ;;  %v7333_v48 = vld [vmem:[#allocation63_spill] sm:$0xff] }
 0x228   :  { %2260 = vmatpush.bf16.msra.mxu3 %v7319_v39  ;;  %v7330_v39 = vld [vmem:[#allocation61_spill] sm:$0xff] }
 0x229   :  { %2286 = vmatpush.bf16.msrb.mxu1 %v7320_v49  ;;  %2247 = vmatpush.bf16.msra.mxu2 %v7323_v54  ;;  %v7331_v49 = vld [vmem:[#allocation58_spill] sm:$0xff]  ;;  %v7334_v54 = vld [vmem:[#allocation65_spill] sm:$0xff] }
 0x22a   :  { %2273 = vmatpush.bf16.msrb.mxu0 %v7324_v41  ;;  %v7335_v41 = vld [vmem:[#allocation62_spill] sm:$0xff] }
 0x22c   :  { %2261 = vmatpush.bf16.msra.mxu3 %v7325_v51  ;;  %v7336_v51 = vld [vmem:[#allocation64_spill] sm:$0xff] }
 0x22d   :  { %2287 = vmatpush.bf16.msrb.mxu1 %v7326_v27  ;;  %2248 = vmatpush.bf16.msra.mxu2 %v7327_v29  ;;  %v7337_v27 = vld [vmem:[#allocation67_spill] sm:$0xff]  ;;  %v7338_v29 = vld [vmem:[#allocation69_spill] sm:$0xff] }
 0x22e   :  { %2274 = vmatpush.bf16.msrb.mxu0 %v7328_v24  ;;  %v7339_v24 = vld [vmem:[#allocation66_spill] sm:$0xff] }
 0x230   :  { %2262 = vmatpush.bf16.msra.mxu3 %v7329_v35  ;;  %v7340_v35 = vld [vmem:[#allocation68_spill] sm:$0xff] }
 0x231   :  { %2288 = vmatpush.bf16.msrb.mxu1 %v7330_v39  ;;  %2249 = vmatpush.bf16.msra.mxu2 %v7331_v49  ;;  %v7341_v39 = vld [vmem:[#allocation71_spill] sm:$0xff]  ;;  %v7342_v49 = vld [vmem:[#allocation73_spill] sm:$0xff] }
 0x232   :  { %2275 = vmatpush.bf16.msrb.mxu0 %v7332_v55  ;;  %v7343_v55 = vld [vmem:[#allocation70_spill] sm:$0xff] }
 0x234   :  { %2263 = vmatpush.bf16.msra.mxu3 %v7333_v48  ;;  %v7344_v48 = vld [vmem:[#allocation72_spill] sm:$0xff] }
 0x235   :  { %2289 = vmatpush.bf16.msrb.mxu1 %v7334_v54  ;;  %2250 = vmatpush.bf16.msra.mxu2 %v7335_v41  ;;  %v7345_v54 = vld [vmem:[#allocation75_spill] sm:$0xff]  ;;  %v7346_v41 = vld [vmem:[#allocation77_spill] sm:$0xff] }
 0x236   :  { %2276 = vmatpush.bf16.msrb.mxu0 %v7336_v51  ;;  %v7347_v51 = vld [vmem:[#allocation74_spill] sm:$0xff] }
 0x238   :  { %2264 = vmatpush.bf16.msra.mxu3 %v7337_v27  ;;  %v7348_v27 = vld [vmem:[#allocation76_spill] sm:$0xff] }
 0x239   :  { %2290 = vmatpush.bf16.msrb.mxu1 %v7338_v29  ;;  %2251 = vmatpush.bf16.msra.mxu2 %v7339_v24  ;;  %v7349_v29 = vld [vmem:[#allocation79_spill] sm:$0xff]  ;;  %v7350_v24 = vld [vmem:[#allocation81_spill] sm:$0xff] }
 0x23a   :  { %2277 = vmatpush.bf16.msrb.mxu0 %v7340_v35  ;;  %v7351_v35 = vld [vmem:[#allocation78_spill] sm:$0xff] }
 0x23c   :  { %2265 = vmatpush.bf16.msra.mxu3 %v7341_v39  ;;  %v7352_v39 = vld [vmem:[#allocation80_spill] sm:$0xff] }
 0x23d   :  { %2291 = vmatpush.bf16.msrb.mxu1 %v7342_v49  ;;  %2252 = vmatpush.bf16.msra.mxu2 %v7343_v55 }
 0x23e   :  { %2278 = vmatpush.bf16.msrb.mxu0 %v7344_v48 }
 0x240   :  { %2266 = vmatpush.bf16.msra.mxu3 %v7345_v54 }
 0x241   :  { %2292 = vmatpush.bf16.msrb.mxu1 %v7346_v41  ;;  %2253 = vmatpush.bf16.msra.mxu2 %v7347_v51 }
 0x242   :  { %2279 = vmatpush.bf16.msrb.mxu0 %v7348_v27 }
 0x244   :  { %2267 = vmatpush.bf16.msra.mxu3 %v7349_v29  ;;  %v7354_v29 = vld [vmem:[#allocation107_spill] sm:$0xff] }
 0x245   :  { %2293 = vmatpush.bf16.msrb.mxu1 %v7350_v24  ;;  %2254 = vmatpush.bf16.msra.mxu2 %v7351_v35 }
 0x246   :  { %2280 = vmatpush.bf16.msrb.mxu0 %v7352_v39 }
 0x264   :  { %v1940_v49 = vpop.f32.mrf.mxu0  ;;  %v1953_v55 = vpop.f32.mrf.mxu1 }
 0x265   :  { %v1954_v40 = vadd.f32 %v1953_v55, %v1940_v49 }
 0x267   :  { %v2064_v48 = vrot.slane %v1954_v40, 7 }
 0x269   :  { %v2068_v54 = vadd.f32 %v2064_v48, %v7353_v36  ;;  %v1914_v18 = vpop.f32.mrf.mxu2  ;;  %v1927_v41 = vpop.f32.mrf.mxu3 }
 0x26a   :  { %v1928_v12 = vadd.f32 %v1927_v41, %v1914_v18 }
 0x26b   :  { %v4825_v51 = vmul.f32 -1.442695, %v2068_v54 }
 0x26c   :  { %v2063_v25 = vrot.slane %v1928_v12, 7  ;;  %v1942_v27 = vpop.f32.mrf.mxu0  ;;  %v1955_v26 = vpop.f32.mrf.mxu1  ;;  %v7355_v12 = vld [vmem:[#allocation108_spill] sm:$0xff] }
 0x26d   :  { %5100 = vpow2.f32 %v4825_v51  ;;  %v7356_v27 = vld [vmem:[#allocation109_spill] sm:$0xff] }
 0x26e   :  { %v2067_v24 = vadd.f32 %v2063_v25, %v7354_v29 }
 0x270   :  { %v4824_v4 = vmul.f32 -1.442695, %v2067_v24 }
 0x271   :  { %v1916_v35 = vpop.f32.mrf.mxu2  ;;  %v1929_v0 = vpop.f32.mrf.mxu3 }
 0x272   :  { %5102 = vpow2.f32 %v4824_v4 }
 0x273   :  { %v5101_v39 = vpop.eup %5100 }
 0x274   :  { %v2076_v19 = vadd.f32 1.0, %v5101_v39  ;;  %v1992_v49 = vpop.f32.mrf.mxu0  ;;  %v2005_v40 = vpop.f32.mrf.mxu1 }
 0x275   :  { %v2006_v55 = vadd.f32 %v2005_v40, %v1992_v49 }
 0x276   :  { %5104 = vrcp.f32 %v2076_v19  ;;  %vm2097_vm13 = vweird.f32 %v2076_v19 }
 0x277   :  { %v2110_v48 = vrot.slane %v2006_v55, 7 }
 0x278   :  { %v5103_v36 = vpop.eup %5102 }
 0x279   :  { %v6169_v18 = vadd.f32 1.0, %v5103_v36  ;;  %v2114_v54 = vadd.f32 %v2110_v48, %v7355_v12  ;;  %v1966_v26 = vpop.f32.mrf.mxu2  ;;  %v1979_v41 = vpop.f32.mrf.mxu3 }
 0x27a   :  { %v1980_v51 = vadd.f32 %v1979_v41, %v1966_v26 }
 0x27b   :  { %5106 = vrcp.f32 %v6169_v18  ;;  %v4827_v24 = vmul.f32 -1.442695, %v2114_v54  ;;  %vm2082_vm2 = vweird.f32 %v6169_v18 }
 0x27c   :  { %v5105_v0 = vpop.eup %5104  ;;  %v2109_v4 = vrot.slane %v1980_v51, 7  ;;  %v1994_v25 = vpop.f32.mrf.mxu0 }
 0x27d   :  { %v2007_v35 = vpop.f32.mrf.mxu1  ;;  %5108 = vpow2.f32 %v4827_v24  ;;  %v2093_v39 = vmul.f32 %v5105_v0, %v2076_v19  ;;  %vm2098_vm12 = vweird.f32 %v5105_v0 }
 0x27e   :  { %v2113_v49 = vadd.f32 %v2109_v4, %v7356_v27  ;;  %v2101_v35 = vand.u32 2147483647, %v2076_v19  ;;  %vm6180_vm14 = vmor %vm2097_vm13, %vm2098_vm12 }
 0x27f   :  { %v2094_v40 = vsub.f32 1.0, %v2093_v39  ;;  %v2103_v39 = vand.u32 2147483648, %v2076_v19  ;;  %v2088_v19 = vand.u32 2147483648, %v6169_v18 }
 0x280   :  { %v4826_v55 = vmul.f32 -1.442695, %v2113_v49  ;;  %vm2102_vm1 = vcmp.eq.f32.partialorder %v2101_v35, 8.507059e+37 }
 0x281   :  { %v5107_v36 = vpop.eup %5106  ;;  %v1968_v29 = vpop.f32.mrf.mxu2  ;;  %v2095_v48 = vmul.f32 %v5105_v0, %v2094_v40  ;;  %v2089_v5 = vor.u32 1.1754944e-38, %v2088_v19 }
 0x282   :  { %v1981_v13 = vpop.f32.mrf.mxu3  ;;  %5110 = vpow2.f32 %v4826_v55  ;;  %v2078_v26 = vmul.f32 %v5107_v36, %v6169_v18  ;;  %v7359_v55 = vld [vmem:[#allocation110_spill] sm:$0xff]  ;;  %vm2083_vm15 = vweird.f32 %v5107_v36 }
 0x283   :  { %v5109_v41 = vpop.eup %5108  ;;  %v2096_v24 = vadd.f32 %v5105_v0, %v2095_v48  ;;  %vm2084_vm4 = vmor %vm2082_vm2, %vm2083_vm15 }
 0x284   :  { %v6175_v12 = vadd.f32 1.0, %v5109_v41  ;;  %v2079_v54 = vsub.f32 1.0, %v2078_v26 }
 0x285   :  { %v2044_v51 = vpop.f32.mrf.mxu0  ;;  %v2100_v41 = vsel %vm6180_vm14, %v5105_v0, %v2096_v24 }
 0x286   :  { %5112 = vrcp.f32 %v6175_v12  ;;  %v2080_v49 = vmul.f32 %v5107_v36, %v2079_v54  ;;  %v2104_v54 = vor.u32 1.1754944e-38, %v2103_v39  ;;  %vm2143_vm7 = vweird.f32 %v6175_v12 }
 0x287   :  { %v2057_v25 = vpop.f32.mrf.mxu1 }
 0x288   :  { %v2058_v4 = vadd.f32 %v2057_v25, %v2044_v51  ;;  %v5111_v29 = vpop.eup %5110  ;;  %v2081_v56 = vadd.f32 %v5107_v36, %v2080_v49  ;;  %v2105_v0 = vsel %vm2102_vm1, %v2104_v54, %v2100_v41 }
 0x289   :  { %v6178_v13 = vadd.f32 1.0, %v5111_v29 }
 0x28a   :  { %v2154_v26 = vadd.f32 %v2058_v4, %v7359_v55  ;;  %v2018_v27 = vpop.f32.mrf.mxu2  ;;  %v2031_v48 = vpop.f32.mrf.mxu3  ;;  %v2086_v4 = vand.u32 2147483647, %v6169_v18  ;;  %v2085_v52 = vsel %vm2084_vm4, %v5107_v36, %v2081_v56 }
 0x28b   :  { %5114 = vrcp.f32 %v6178_v13  ;;  %v2032_v29 = vadd.f32 %v2031_v48, %v2018_v27  ;;  %vm2128_vm13 = vweird.f32 %v6178_v13 }
 0x28c   :  { %v5113_v51 = vpop.eup %5112  ;;  %v2158_v25 = vrot.slane %v2154_v26, 7  ;;  %vm2087_vm5 = vcmp.eq.f32.partialorder %v2086_v4, 8.507059e+37 }
 0x28d   :  { %v2139_v40 = vmul.f32 %v5113_v51, %v6175_v12  ;;  %v2046_v24 = vpop.f32.mrf.mxu0  ;;  %v2153_v35 = vadd.f32 %v2032_v29, %v6037_v50  ;;  %v2090_v48 = vsel %vm2087_vm5, %v2089_v5, %v2085_v52  ;;  %vm2144_vm6 = vweird.f32 %v5113_v51 }
 0x28e   :  { %v2162_v55 = vmul.f32 %v2158_v25, %v2105_v0  ;;  %v2149_v29 = vand.u32 2147483648, %v6175_v12  ;;  %vm2145_vm10 = vmor %vm2143_vm7, %vm2144_vm6  ;;  %v2134_v0 = vand.u32 2147483648, %v6178_v13 }
 0x28f   :  { %v2059_v49 = vpop.f32.mrf.mxu1  ;;  %v2140_v39 = vsub.f32 1.0, %v2139_v40  ;;  %v2157_v27 = vrot.slane %v2153_v35, 7  ;;  %v2132_v35 = vand.u32 2147483647, %v6178_v13 }
 0x290   :  { %v2164_v1 = vadd.f32 %v2162_v55, %v5995_v2  ;;  %v2147_v55 = vand.u32 2147483647, %v6175_v12 }
 0x291   :  { %v5115_v26 = vpop.eup %5114  ;;  %v2161_v34 = vmul.f32 %v2157_v27, %v2090_v48  ;;  %v2141_v24 = vmul.f32 %v5113_v51, %v2140_v39  ;;  %vm2133_vm15 = vcmp.eq.f32.partialorder %v2132_v35, 8.507059e+37  ;;  %v7371_v35 = vld [vmem:[#allocation30_spill] sm:$0xff] }
 0x292   :  { %v2124_v18 = vmul.f32 %v5115_v26, %v6178_v13  ;;  %5116 = vtanh.f32 %v2164_v1  ;;  %v2020_v41 = vpop.f32.mrf.mxu2  ;;  %v2033_v54 = vpop.f32.mrf.mxu3  ;;  %vm2129_vm11 = vweird.f32 %v5115_v26  ;;  %vm2148_vm12 = vcmp.eq.f32.partialorder %v2147_v55, 8.507059e+37  ;;  %v7362_v55 = vld [vmem:[#allocation105_spill] sm:$0xff] }
 0x293   :  { %v2163_v56 = vadd.f32 %v2161_v34, %v6003_v15  ;;  %v2142_v36 = vadd.f32 %v5113_v51, %v2141_v24  ;;  %v2150_v34 = vor.u32 1.1754944e-38, %v2149_v29  ;;  %vm2130_vm14 = vmor %vm2128_vm13, %vm2129_vm11  ;;  %v7363_v29 = vld [vmem:[#allocation22_spill] sm:$0xff] }
 0x294   :  { %v2125_v49 = vsub.f32 1.0, %v2124_v18 }
 0x295   :  { %5118 = vtanh.f32 %v2163_v56  ;;  %v2146_v5 = vsel %vm2145_vm10, %v5113_v51, %v2142_v36  ;;  %v2135_v51 = vor.u32 1.1754944e-38, %v2134_v0  ;;  %v7370_v0 = vld [vmem:[#allocation23_spill] sm:$0xff] }
 0x296   :  { %v2126_v19 = vmul.f32 %v5115_v26, %v2125_v49  ;;  %v2151_v12 = vsel %vm2148_vm12, %v2150_v34, %v2146_v5  ;;  %v7366_v5 = vld [vmem:[#allocation20_spill] sm:$0xff]  ;;  %v7369_v34 = vld [vmem:[#allocation21_spill] sm:$0xff] }
 0x298   :  { %v5117_v25 = vpop.eup %5116  ;;  %v2127_v1 = vadd.f32 %v5115_v26, %v2126_v19 }
 0x299   :  { %v2170_v52 = vrot.slane %v5117_v25, 1 }
 0x29a   :  { %v2131_v18 = vsel %vm2130_vm14, %v5115_v26, %v2127_v1  ;;  %v7365_v1 = vld [vmem:[#allocation19_spill] sm:$0xff] }
 0x29b   :  { %v2174_v4 = vsub.f32 %v6065_v17, %v2170_v52  ;;  %v5119_v40 = vpop.eup %5118  ;;  %v2136_v49 = vsel %vm2133_vm15, %v2135_v51, %v2131_v18  ;;  %v7364_v52 = vld [vmem:[#allocation24_spill] sm:$0xff]  ;;  %v7378_v51 = vld [vmem:[#allocation31_spill] sm:$0xff] }
 0x29c   :  { %v2169_v27 = vrot.slane %v5119_v40, 1  ;;  %v7376_v18 = vld [vmem:[#allocation36_spill] sm:$0xff]  ;;  %v7387_v17 = vld [vmem:[#allocation47_spill] sm:$0xff] }
 0x29d   :  { %v2178_v39 = vrot.slane %v2174_v4, 7  ;;  %v7367_v4 = vld [vmem:[#allocation26_spill] sm:$0xff] }
 0x29e   :  { %v2173_v41 = vsub.f32 %v6063_v7, %v2169_v27  ;;  %v7373_v27 = vld [vmem:[#allocation25_spill] sm:$0xff]  ;;  %v7386_v7 = vld [vmem:[#allocation39_spill] sm:$0xff] }
 0x29f   :  { %v2182_v48 = vmul.f32 %v2178_v39, %v2151_v12  ;;  %v7372_v39 = vld [vmem:[#allocation32_spill] sm:$0xff]  ;;  %v7374_v12 = vld [vmem:[#allocation27_spill] sm:$0xff] }
 0x2a0   :  { %v2177_v24 = vrot.slane %v2173_v41, 7  ;;  %v7377_v41 = vld [vmem:[#allocation29_spill] sm:$0xff] }
 0x2a1   :  { %v6204_v54 = vadd.f32 %v5117_v25, %v2182_v48  ;;  %v7375_v48 = vld [vmem:[#allocation34_spill] sm:$0xff] }
 0x2a2   :  { %v2181_v56 = vmul.f32 %v2177_v24, %v2136_v49  ;;  %v7379_v24 = vld [vmem:[#allocation38_spill] sm:$0xff]  ;;  %v7380_v49 = vld [vmem:[#allocation40_spill] sm:$0xff] }
 0x2a3   :  { %7360 = vst [vmem:[#allocation82_spill] sm:$0xff] %v6204_v54  ;;  %v2186_v36 = vpack.c.bf16 %v6204_v54, %v6204_v54 }
 0x2a4   :  { %v6208_v19 = vadd.f32 %v5119_v40, %v2181_v56  ;;  %v7368_v40 = vld [vmem:[#allocation28_spill] sm:$0xff]  ;;  %v7381_v56 = vld [vmem:[#allocation33_spill] sm:$0xff] }
 0x2a5   :  { %v2191_v13 = vshrl.u32 %v2186_v36, 16  ;;  %v7382_v36 = vld [vmem:[#allocation35_spill] sm:$0xff] }
 0x2a6   :  { %7361 = vst [vmem:[#allocation83_spill] sm:$0xff] %v6208_v19  ;;  %v2185_v26 = vpack.c.bf16 %v6208_v19, %v6208_v19 }
 0x2a7   :  { %2216 = vmatmul.bf16.vlgmr.msrb.gmra.mxu3 %v2191_v13  ;;  %2242 = vmatmul.bf16.vlgmr.msra.gmra.mxu1 %v2191_v13 }
 0x2a8   :  { %2312 = vmatpush.bf16.msrb.mxu3 %v7292_v31  ;;  %2338 = vmatpush.bf16.msra.mxu1 %v7294_v11  ;;  %v2188_v25 = vshrl.u32 %v2185_v26, 16  ;;  %v7384_v26 = vld [vmem:[#allocation44_spill] sm:$0xff] }
 0x2aa   :  { %2203 = vmatmul.bf16.vlgmr.msrb.gmra.mxu2 %v2188_v25  ;;  %2229 = vmatmul.bf16.vlgmr.msra.gmra.mxu0 %v2188_v25 }
 0x2ab   :  { %2299 = vmatpush.bf16.msrb.mxu2 %v7291_v10  ;;  %2325 = vmatpush.bf16.msra.mxu0 %v7293_v22 }
 0x2ac   :  { %2313 = vmatpush.bf16.msrb.mxu3 %v7296_v30  ;;  %2339 = vmatpush.bf16.msra.mxu1 %v7298_v8 }
 0x2af   :  { %2300 = vmatpush.bf16.msrb.mxu2 %v7295_v16  ;;  %2326 = vmatpush.bf16.msra.mxu0 %v7297_v20 }
 0x2b0   :  { %2314 = vmatpush.bf16.msrb.mxu3 %v7300_v37  ;;  %2340 = vmatpush.bf16.msra.mxu1 %v7302_v60 }
 0x2b3   :  { %2301 = vmatpush.bf16.msrb.mxu2 %v7299_v21  ;;  %2327 = vmatpush.bf16.msra.mxu0 %v7301_v9 }
 0x2b4   :  { %2315 = vmatpush.bf16.msrb.mxu3 %v7304_v47  ;;  %2341 = vmatpush.bf16.msra.mxu1 %v7306_v23 }
 0x2b7   :  { %2268 = vmatmul.bf16.vlgmr.msra.gmra.mxu3 %v2191_v13  ;;  %2294 = vmatmul.bf16.vlgmr.msrb.gmra.mxu1 %v2191_v13 }
 0x2b8   :  { %2316 = vmatpush.bf16.msrb.mxu3 %v7308_v6  ;;  %2342 = vmatpush.bf16.msra.mxu1 %v7310_v63 }
 0x2b9   :  { %2302 = vmatpush.bf16.msrb.mxu2 %v7303_v44  ;;  %2328 = vmatpush.bf16.msra.mxu0 %v7305_v43 }
 0x2ba   :  { %2255 = vmatmul.bf16.vlgmr.msra.gmra.mxu2 %v2188_v25  ;;  %2281 = vmatmul.bf16.vlgmr.msrb.gmra.mxu0 %v2188_v25 }
 0x2bc   :  { %2317 = vmatpush.bf16.msrb.mxu3 %v7312_v42  ;;  %2343 = vmatpush.bf16.msra.mxu1 %v5901_v28 }
 0x2bd   :  { %2303 = vmatpush.bf16.msrb.mxu2 %v7307_v61  ;;  %2329 = vmatpush.bf16.msra.mxu0 %v7309_v32 }
 0x2c0   :  { %2318 = vmatpush.bf16.msrb.mxu3 %v5907_v14  ;;  %2344 = vmatpush.bf16.msra.mxu1 %v5913_v59 }
 0x2c1   :  { %2304 = vmatpush.bf16.msrb.mxu2 %v7311_v38  ;;  %2330 = vmatpush.bf16.msra.mxu0 %v5899_v33 }
 0x2c4   :  { %2319 = vmatpush.bf16.msrb.mxu3 %v5919_v46  ;;  %2345 = vmatpush.bf16.msra.mxu1 %v5925_v62 }
 0x2c5   :  { %2305 = vmatpush.bf16.msrb.mxu2 %v5905_v58  ;;  %2331 = vmatpush.bf16.msra.mxu0 %v5911_v45 }
 0x2c7   :  { %2320 = vmatmul.bf16.vlgmr.msrb.gmra.mxu3 %v2191_v13  ;;  %2346 = vmatmul.bf16.vlgmr.msra.gmra.mxu1 %v2191_v13  ;;  %v7383_v13 = vld [vmem:[#allocation42_spill] sm:$0xff] }
 0x2c8   :  { %2496 = vmatpush.bf16.msra.mxu3 %v5625_v53  ;;  %2522 = vmatpush.bf16.msrb.mxu1 %v5629_v57 }
 0x2c9   :  { %2306 = vmatpush.bf16.msrb.mxu2 %v5917_v3  ;;  %2332 = vmatpush.bf16.msra.mxu0 %v7362_v55 }
 0x2cc   :  { %2497 = vmatpush.bf16.msra.mxu3 %v7363_v29  ;;  %2523 = vmatpush.bf16.msrb.mxu1 %v7364_v52 }
 0x2cd   :  { %2483 = vmatpush.bf16.msra.mxu2 %v7365_v1  ;;  %2509 = vmatpush.bf16.msrb.mxu0 %v7366_v5 }
 0x2ce   :  { %2307 = vmatmul.bf16.vlgmr.msrb.gmra.mxu2 %v2188_v25  ;;  %2333 = vmatmul.bf16.vlgmr.msra.gmra.mxu0 %v2188_v25  ;;  %v7385_v25 = vld [vmem:[#allocation37_spill] sm:$0xff] }
 0x2d0   :  { %2498 = vmatpush.bf16.msra.mxu3 %v7367_v4  ;;  %2524 = vmatpush.bf16.msrb.mxu1 %v7368_v40 }
 0x2d1   :  { %2484 = vmatpush.bf16.msra.mxu2 %v7369_v34  ;;  %2510 = vmatpush.bf16.msrb.mxu0 %v7370_v0 }
 0x2d4   :  { %2499 = vmatpush.bf16.msra.mxu3 %v7371_v35  ;;  %2525 = vmatpush.bf16.msrb.mxu1 %v7372_v39 }
 0x2d5   :  { %2485 = vmatpush.bf16.msra.mxu2 %v7373_v27  ;;  %2511 = vmatpush.bf16.msrb.mxu0 %v7374_v12  ;;  %v7425_v12 = vld [vmem:[#allocation106_spill] sm:$0xff] }
 0x2d8   :  { %2500 = vmatpush.bf16.msra.mxu3 %v7375_v48  ;;  %2526 = vmatpush.bf16.msrb.mxu1 %v7376_v18 }
 0x2d9   :  { %2486 = vmatpush.bf16.msra.mxu2 %v7377_v41  ;;  %2512 = vmatpush.bf16.msrb.mxu0 %v7378_v51  ;;  %v7388_v41 = vld [vmem:[#allocation49_spill] sm:$0xff]  ;;  %v7389_v51 = vld [vmem:[#allocation51_spill] sm:$0xff] }
 0x2dc   :  { %2501 = vmatpush.bf16.msra.mxu3 %v7379_v24  ;;  %2527 = vmatpush.bf16.msrb.mxu1 %v7380_v49  ;;  %v7390_v24 = vld [vmem:[#allocation53_spill] sm:$0xff] }
 0x2dd   :  { %2487 = vmatpush.bf16.msra.mxu2 %v7381_v56  ;;  %2513 = vmatpush.bf16.msrb.mxu0 %v7382_v36  ;;  %v7391_v49 = vld [vmem:[#allocation41_spill] sm:$0xff]  ;;  %v7392_v56 = vld [vmem:[#allocation43_spill] sm:$0xff] }
 0x2de   :  { %v7393_v36 = vld [vmem:[#allocation55_spill] sm:$0xff] }
 0x2e0   :  { %2502 = vmatpush.bf16.msra.mxu3 %v7383_v13  ;;  %2528 = vmatpush.bf16.msrb.mxu1 %v7384_v26  ;;  %v7394_v13 = vld [vmem:[#allocation57_spill] sm:$0xff]  ;;  %v7395_v26 = vld [vmem:[#allocation46_spill] sm:$0xff] }
 0x2e1   :  { %2488 = vmatpush.bf16.msra.mxu2 %v7385_v25  ;;  %2514 = vmatpush.bf16.msrb.mxu0 %v7386_v7  ;;  %v7396_v25 = vld [vmem:[#allocation48_spill] sm:$0xff]  ;;  %v7397_v7 = vld [vmem:[#allocation50_spill] sm:$0xff] }
 0x2e4   :  { %2503 = vmatpush.bf16.msra.mxu3 %v7387_v17  ;;  %2529 = vmatpush.bf16.msrb.mxu1 %v7388_v41  ;;  %v7398_v17 = vld [vmem:[#allocation52_spill] sm:$0xff]  ;;  %v7399_v41 = vld [vmem:[#allocation59_spill] sm:$0xff] }
 0x2e5   :  { %2489 = vmatpush.bf16.msra.mxu2 %v7391_v49  ;;  %2515 = vmatpush.bf16.msrb.mxu0 %v7392_v56  ;;  %v7402_v49 = vld [vmem:[#allocation56_spill] sm:$0xff]  ;;  %v7403_v56 = vld [vmem:[#allocation63_spill] sm:$0xff] }
 0x2e8   :  { %2548 = vmatpush.bf16.msrb.mxu3 %v7389_v51  ;;  %2574 = vmatpush.bf16.msra.mxu1 %v7390_v24  ;;  %v7400_v51 = vld [vmem:[#allocation61_spill] sm:$0xff]  ;;  %v7401_v24 = vld [vmem:[#allocation54_spill] sm:$0xff] }
 0x2e9   :  { %2490 = vmatpush.bf16.msra.mxu2 %v7395_v26  ;;  %2516 = vmatpush.bf16.msrb.mxu0 %v7396_v25  ;;  %v7406_v26 = vld [vmem:[#allocation60_spill] sm:$0xff]  ;;  %v7407_v25 = vld [vmem:[#allocation67_spill] sm:$0xff] }
 0x2ec   :  { %2549 = vmatpush.bf16.msrb.mxu3 %v7393_v36  ;;  %2575 = vmatpush.bf16.msra.mxu1 %v7394_v13  ;;  %v7404_v36 = vld [vmem:[#allocation65_spill] sm:$0xff]  ;;  %v7405_v13 = vld [vmem:[#allocation58_spill] sm:$0xff] }
 0x2ed   :  { %2535 = vmatpush.bf16.msrb.mxu2 %v7397_v7  ;;  %2561 = vmatpush.bf16.msra.mxu0 %v7398_v17  ;;  %v7408_v7 = vld [vmem:[#allocation69_spill] sm:$0xff]  ;;  %v7409_v17 = vld [vmem:[#allocation62_spill] sm:$0xff] }
 0x2f0   :  { %2550 = vmatpush.bf16.msrb.mxu3 %v7399_v41  ;;  %2576 = vmatpush.bf16.msra.mxu1 %v7400_v51  ;;  %v7410_v41 = vld [vmem:[#allocation64_spill] sm:$0xff]  ;;  %v7411_v51 = vld [vmem:[#allocation71_spill] sm:$0xff] }
 0x2f1   :  { %2536 = vmatpush.bf16.msrb.mxu2 %v7401_v24  ;;  %2562 = vmatpush.bf16.msra.mxu0 %v7402_v49  ;;  %v7412_v24 = vld [vmem:[#allocation73_spill] sm:$0xff]  ;;  %v7413_v49 = vld [vmem:[#allocation66_spill] sm:$0xff] }
 0x2f4   :  { %2551 = vmatpush.bf16.msrb.mxu3 %v7403_v56  ;;  %2577 = vmatpush.bf16.msra.mxu1 %v7404_v36  ;;  %v7414_v56 = vld [vmem:[#allocation68_spill] sm:$0xff]  ;;  %v7415_v36 = vld [vmem:[#allocation75_spill] sm:$0xff] }
 0x2f5   :  { %2537 = vmatpush.bf16.msrb.mxu2 %v7405_v13  ;;  %2563 = vmatpush.bf16.msra.mxu0 %v7406_v26  ;;  %v7416_v13 = vld [vmem:[#allocation77_spill] sm:$0xff]  ;;  %v7417_v26 = vld [vmem:[#allocation70_spill] sm:$0xff] }
 0x2f8   :  { %2552 = vmatpush.bf16.msrb.mxu3 %v7407_v25  ;;  %2578 = vmatpush.bf16.msra.mxu1 %v7408_v7  ;;  %v7418_v25 = vld [vmem:[#allocation72_spill] sm:$0xff]  ;;  %v7419_v7 = vld [vmem:[#allocation79_spill] sm:$0xff] }
 0x2f9   :  { %2538 = vmatpush.bf16.msrb.mxu2 %v7409_v17  ;;  %2564 = vmatpush.bf16.msra.mxu0 %v7410_v41  ;;  %v7420_v17 = vld [vmem:[#allocation81_spill] sm:$0xff]  ;;  %v7421_v41 = vld [vmem:[#allocation74_spill] sm:$0xff] }
 0x2fc   :  { %2553 = vmatpush.bf16.msrb.mxu3 %v7411_v51  ;;  %2579 = vmatpush.bf16.msra.mxu1 %v7412_v24  ;;  %v7422_v51 = vld [vmem:[#allocation76_spill] sm:$0xff]  ;;  %v7423_v24 = vld [vmem:[#allocation78_spill] sm:$0xff] }
 0x2fd   :  { %2539 = vmatpush.bf16.msrb.mxu2 %v7413_v49  ;;  %2565 = vmatpush.bf16.msra.mxu0 %v7414_v56  ;;  %v7424_v49 = vld [vmem:[#allocation80_spill] sm:$0xff] }
 0x300   :  { %2554 = vmatpush.bf16.msrb.mxu3 %v7415_v36  ;;  %2580 = vmatpush.bf16.msra.mxu1 %v7416_v13 }
 0x301   :  { %2540 = vmatpush.bf16.msrb.mxu2 %v7417_v26  ;;  %2566 = vmatpush.bf16.msra.mxu0 %v7418_v25 }
 0x304   :  { %2555 = vmatpush.bf16.msrb.mxu3 %v7419_v7  ;;  %2581 = vmatpush.bf16.msra.mxu1 %v7420_v17 }
 0x305   :  { %2541 = vmatpush.bf16.msrb.mxu2 %v7421_v41  ;;  %2567 = vmatpush.bf16.msra.mxu0 %v7422_v51  ;;  %v7426_v51 = vld [vmem:[#allocation107_spill] sm:$0xff] }
 0x309   :  { %2542 = vmatpush.bf16.msrb.mxu2 %v7423_v24  ;;  %2568 = vmatpush.bf16.msra.mxu0 %v7424_v49 }
 0x324   :  { %v2243_v56 = vpop.f32.mrf.mxu1 }
 0x327   :  { %v2230_v36 = vpop.f32.mrf.mxu0 }
 0x328   :  { %v2244_v18 = vadd.f32 %v2243_v56, %v2230_v36 }
 0x32a   :  { %v2217_v13 = vpop.f32.mrf.mxu3  ;;  %v2354_v48 = vrot.slane %v2244_v18, 6 }
 0x32c   :  { %v2245_v26 = vpop.f32.mrf.mxu1  ;;  %v2358_v25 = vadd.f32 %v2354_v48, %v7425_v12 }
 0x32d   :  { %v2204_v27 = vpop.f32.mrf.mxu2 }
 0x32e   :  { %v4829_v7 = vmul.f32 -1.442695, %v2358_v25  ;;  %v2218_v39 = vadd.f32 %v2217_v13, %v2204_v27  ;;  %v7427_v27 = vld [vmem:[#allocation108_spill] sm:$0xff] }
 0x32f   :  { %v2232_v17 = vpop.f32.mrf.mxu0 }
 0x330   :  { %5120 = vpow2.f32 %v4829_v7  ;;  %v2353_v41 = vrot.slane %v2218_v39, 6 }
 0x332   :  { %v2219_v35 = vpop.f32.mrf.mxu3  ;;  %v2357_v0 = vadd.f32 %v2353_v41, %v7426_v51 }
 0x334   :  { %v2295_v24 = vpop.f32.mrf.mxu1  ;;  %v4828_v34 = vmul.f32 -1.442695, %v2357_v0 }
 0x335   :  { %v2206_v49 = vpop.f32.mrf.mxu2 }
 0x336   :  { %v5121_v40 = vpop.eup %5120  ;;  %5122 = vpow2.f32 %v4828_v34  ;;  %v7428_v49 = vld [vmem:[#allocation109_spill] sm:$0xff] }
 0x337   :  { %v2366_v56 = vadd.f32 1.0, %v5121_v40  ;;  %v2282_v36 = vpop.f32.mrf.mxu0 }
 0x338   :  { %v2296_v18 = vadd.f32 %v2295_v24, %v2282_v36 }
 0x339   :  { %5124 = vrcp.f32 %v2366_v56  ;;  %vm2387_vm2 = vweird.f32 %v2366_v56 }
 0x33a   :  { %v2269_v26 = vpop.f32.mrf.mxu3  ;;  %v2400_v48 = vrot.slane %v2296_v18, 6 }
 0x33c   :  { %v2297_v12 = vpop.f32.mrf.mxu1  ;;  %v5123_v25 = vpop.eup %5122  ;;  %v2404_v17 = vadd.f32 %v2400_v48, %v7427_v27 }
 0x33d   :  { %v6311_v7 = vadd.f32 1.0, %v5123_v25  ;;  %v2256_v35 = vpop.f32.mrf.mxu2 }
 0x33e   :  { %v4831_v39 = vmul.f32 -1.442695, %v2404_v17  ;;  %v2270_v41 = vadd.f32 %v2269_v26, %v2256_v35 }
 0x33f   :  { %v5125_v13 = vpop.eup %5124  ;;  %5126 = vrcp.f32 %v6311_v7  ;;  %v2284_v0 = vpop.f32.mrf.mxu0  ;;  %vm2372_vm7 = vweird.f32 %v6311_v7 }
 0x340   :  { %5128 = vpow2.f32 %v4831_v39  ;;  %v2399_v40 = vrot.slane %v2270_v41, 6  ;;  %v2383_v34 = vmul.f32 %v5125_v13, %v2366_v56  ;;  %vm2388_vm1 = vweird.f32 %v5125_v13 }
 0x341   :  { %vm2389_vm4 = vmor %vm2387_vm2, %vm2388_vm1 }
 0x342   :  { %v2271_v24 = vpop.f32.mrf.mxu3  ;;  %v2403_v36 = vadd.f32 %v2399_v40, %v7428_v49  ;;  %v2384_v18 = vsub.f32 1.0, %v2383_v34  ;;  %v2393_v40 = vand.u32 2147483648, %v2366_v56  ;;  %v7429_v49 = vld [vmem:[#allocation110_spill] sm:$0xff] }
 0x343   :  { %v2391_v24 = vand.u32 2147483647, %v2366_v56  ;;  %v2378_v56 = vand.u32 2147483648, %v6311_v7 }
 0x344   :  { %v2347_v12 = vpop.f32.mrf.mxu1  ;;  %v4830_v51 = vmul.f32 -1.442695, %v2403_v36  ;;  %v2385_v4 = vmul.f32 %v5125_v13, %v2384_v18  ;;  %v2394_v1 = vor.u32 1.1754944e-38, %v2393_v40 }
 0x345   :  { %v5127_v48 = vpop.eup %5126  ;;  %v2258_v25 = vpop.f32.mrf.mxu2  ;;  %vm2392_vm5 = vcmp.eq.f32.partialorder %v2391_v24, 8.507059e+37 }
 0x346   :  { %v5129_v27 = vpop.eup %5128  ;;  %5130 = vpow2.f32 %v4830_v51  ;;  %v2368_v26 = vmul.f32 %v5127_v48, %v6311_v7  ;;  %v2386_v0 = vadd.f32 %v5125_v13, %v2385_v4  ;;  %vm2373_vm6 = vweird.f32 %v5127_v48 }
 0x347   :  { %v6316_v17 = vadd.f32 1.0, %v5129_v27  ;;  %vm2374_vm10 = vmor %vm2372_vm7, %vm2373_vm6 }
 0x348   :  { %v2369_v39 = vsub.f32 1.0, %v2368_v26  ;;  %v2390_v51 = vsel %vm2389_vm4, %v5125_v13, %v2386_v0 }
 0x349   :  { %5132 = vrcp.f32 %v6316_v17  ;;  %vm2433_vm13 = vweird.f32 %v6316_v17 }
 0x34a   :  { %v2321_v41 = vpop.f32.mrf.mxu3  ;;  %v2370_v36 = vmul.f32 %v5127_v48, %v2369_v39  ;;  %v2376_v39 = vand.u32 2147483647, %v6311_v7 }
 0x34b   :  { %v2334_v35 = vpop.f32.mrf.mxu0 }
 0x34c   :  { %v2348_v34 = vadd.f32 %v2347_v12, %v2334_v35  ;;  %v2349_v18 = vpop.f32.mrf.mxu1  ;;  %v5131_v25 = vpop.eup %5130  ;;  %v2371_v55 = vadd.f32 %v5127_v48, %v2370_v36  ;;  %v2395_v12 = vsel %vm2392_vm5, %v2394_v1, %v2390_v51  ;;  %v2379_v1 = vor.u32 1.1754944e-38, %v2378_v56 }
 0x34d   :  { %v6320_v27 = vadd.f32 1.0, %v5131_v25  ;;  %vm2377_vm11 = vcmp.eq.f32.partialorder %v2376_v39, 8.507059e+37 }
 0x34e   :  { %v2444_v5 = vadd.f32 %v2348_v34, %v7429_v49  ;;  %v2375_v36 = vsel %vm2374_vm10, %v5127_v48, %v2371_v55  ;;  %v2439_v55 = vand.u32 2147483648, %v6316_v17  ;;  %v2437_v48 = vand.u32 2147483647, %v6316_v17 }
 0x34f   :  { %v5133_v3 = vpop.eup %5132  ;;  %5134 = vrcp.f32 %v6320_v27  ;;  %v2380_v52 = vsel %vm2377_vm11, %v2379_v1, %v2375_v36  ;;  %vm2418_vm2 = vweird.f32 %v6320_v27 }
 0x350   :  { %v2448_v4 = vrot.slane %v2444_v5, 6  ;;  %v2429_v13 = vmul.f32 %v5133_v3, %v6316_v17  ;;  %vm2434_vm12 = vweird.f32 %v5133_v3  ;;  %vm2438_vm15 = vcmp.eq.f32.partialorder %v2437_v48, 8.507059e+37 }
 0x351   :  { %v2308_v26 = vpop.f32.mrf.mxu2  ;;  %vm2435_vm14 = vmor %vm2433_vm13, %vm2434_vm12 }
 0x352   :  { %v2452_v35 = vmul.f32 %v2448_v4, %v2395_v12  ;;  %v2322_v0 = vadd.f32 %v2321_v41, %v2308_v26  ;;  %v2323_v5 = vpop.f32.mrf.mxu3  ;;  %v2430_v34 = vsub.f32 1.0, %v2429_v13 }
 0x353   :  { %v2336_v40 = vpop.f32.mrf.mxu0 }
 0x354   :  { %v2454_v24 = vadd.f32 %v2452_v35, %v5995_v2  ;;  %v2443_v18 = vadd.f32 %v2322_v0, %v6037_v50  ;;  %v2431_v49 = vmul.f32 %v5133_v3, %v2430_v34  ;;  %v2440_v40 = vor.u32 1.1754944e-38, %v2439_v55 }
 0x355   :  { %v5135_v51 = vpop.eup %5134 }
 0x356   :  { %5136 = vtanh.f32 %v2454_v24  ;;  %v2447_v25 = vrot.slane %v2443_v18, 6  ;;  %v2414_v41 = vmul.f32 %v5135_v51, %v6320_v27  ;;  %v2432_v13 = vadd.f32 %v5133_v3, %v2431_v49 }
 0x357   :  { %vm2419_vm1 = vweird.f32 %v5135_v51  ;;  %v2424_v24 = vand.u32 2147483648, %v6320_v27  ;;  %v2422_v18 = vand.u32 2147483647, %v6320_v27 }
 0x358   :  { %v2451_v4 = vmul.f32 %v2447_v25, %v2380_v52  ;;  %v2415_v26 = vsub.f32 1.0, %v2414_v41  ;;  %v2436_v39 = vsel %vm2435_vm14, %v5133_v3, %v2432_v13  ;;  %vm2420_vm4 = vmor %vm2418_vm2, %vm2419_vm1 }
 0x359   :  { %v2310_v7 = vpop.f32.mrf.mxu2  ;;  %v2441_v36 = vsel %vm2438_vm15, %v2440_v40, %v2436_v39  ;;  %vm2423_vm5 = vcmp.eq.f32.partialorder %v2422_v18, 8.507059e+37  ;;  %v7435_v39 = vld [vmem:[#allocation19_spill] sm:$0xff]  ;;  %v7437_v40 = vld [vmem:[#allocation26_spill] sm:$0xff]  ;;  %v7443_v18 = vld [vmem:[#allocation25_spill] sm:$0xff] }
 0x35a   :  { %v2453_v12 = vadd.f32 %v2451_v4, %v6003_v15  ;;  %v2416_v56 = vmul.f32 %v5135_v51, %v2415_v26  ;;  %v2425_v4 = vor.u32 1.1754944e-38, %v2424_v24  ;;  %v7441_v24 = vld [vmem:[#allocation30_spill] sm:$0xff] }
 0x35c   :  { %v5137_v35 = vpop.eup %5136  ;;  %5138 = vtanh.f32 %v2453_v12  ;;  %v2417_v5 = vadd.f32 %v5135_v51, %v2416_v56  ;;  %v7433_v56 = vld [vmem:[#allocation104_spill] sm:$0xff] }
 0x35d   :  { %v2460_v0 = vrot.slane %v5137_v35, 1 }
 0x35e   :  { %v2421_v3 = vsel %vm2420_vm4, %v5135_v51, %v2417_v5  ;;  %v7438_v5 = vld [vmem:[#allocation28_spill] sm:$0xff] }
 0x35f   :  { %v2464_v52 = vsub.f32 %v6204_v54, %v2460_v0  ;;  %v2426_v12 = vsel %vm2423_vm5, %v2425_v4, %v2421_v3  ;;  %v7434_v0 = vld [vmem:[#allocation105_spill] sm:$0xff]  ;;  %v7446_v3 = vld [vmem:[#allocation36_spill] sm:$0xff]  ;;  %v7448_v4 = vld [vmem:[#allocation31_spill] sm:$0xff] }
 0x360   :  { %v7457_v54 = vld [vmem:[#allocation47_spill] sm:$0xff] }
 0x361   :  { %v2468_v49 = vrot.slane %v2464_v52, 7  ;;  %v7436_v52 = vld [vmem:[#allocation20_spill] sm:$0xff] }
 0x362   :  { %v5139_v34 = vpop.eup %5138 }
 0x363   :  { %v2472_v17 = vmul.f32 %v2468_v49, %v2441_v36  ;;  %v2459_v1 = vrot.slane %v5139_v34, 1  ;;  %v7439_v49 = vld [vmem:[#allocation21_spill] sm:$0xff]  ;;  %v7442_v36 = vld [vmem:[#allocation32_spill] sm:$0xff] }
 0x365   :  { %v6338_v25 = vadd.f32 %v5137_v35, %v2472_v17  ;;  %v2463_v41 = vsub.f32 %v6208_v19, %v2459_v1  ;;  %v7432_v35 = vld [vmem:[#allocation24_spill] sm:$0xff]  ;;  %v7444_v17 = vld [vmem:[#allocation27_spill] sm:$0xff]  ;;  %v7445_v1 = vld [vmem:[#allocation34_spill] sm:$0xff] }
 0x366   :  { %v7456_v19 = vld [vmem:[#allocation39_spill] sm:$0xff] }
 0x367   :  { %7430 = vst [vmem:[#allocation84_spill] sm:$0xff] %v6338_v25  ;;  %v2467_v7 = vrot.slane %v2463_v41, 7  ;;  %v2476_v26 = vpack.c.bf16 %v6338_v25, %v6338_v25  ;;  %v7447_v41 = vld [vmem:[#allocation29_spill] sm:$0xff] }
 0x369   :  { %v2471_v13 = vmul.f32 %v2467_v7, %v2426_v12  ;;  %v2480_v55 = vrot.slane %v2476_v26, 1  ;;  %v7449_v7 = vld [vmem:[#allocation38_spill] sm:$0xff]  ;;  %v7450_v26 = vld [vmem:[#allocation40_spill] sm:$0xff]  ;;  %v7451_v12 = vld [vmem:[#allocation33_spill] sm:$0xff] }
 0x36b   :  { %v6343_v48 = vadd.f32 %v5139_v34, %v2471_v13  ;;  %2504 = vmatmul.bf16.vlgmr.msra.gmra.mxu3 %v2480_v55  ;;  %2530 = vmatmul.bf16.vlgmr.msrb.gmra.mxu1 %v2480_v55  ;;  %v7440_v34 = vld [vmem:[#allocation23_spill] sm:$0xff] }
 0x36c   :  { %2600 = vmatpush.bf16.msra.mxu3 %v7292_v31  ;;  %2626 = vmatpush.bf16.msrb.mxu1 %v7294_v11  ;;  %v7452_v13 = vld [vmem:[#allocation35_spill] sm:$0xff] }
 0x36d   :  { %7431 = vst [vmem:[#allocation85_spill] sm:$0xff] %v6343_v48  ;;  %v2475_v27 = vpack.c.bf16 %v6343_v48, %v6343_v48 }
 0x36f   :  { %v2479_v51 = vrot.slane %v2475_v27, 1  ;;  %v7454_v27 = vld [vmem:[#allocation44_spill] sm:$0xff] }
 0x370   :  { %2601 = vmatpush.bf16.msra.mxu3 %v7296_v30  ;;  %2627 = vmatpush.bf16.msrb.mxu1 %v7298_v8 }
 0x371   :  { %2491 = vmatmul.bf16.vlgmr.msra.gmra.mxu2 %v2479_v51  ;;  %2517 = vmatmul.bf16.vlgmr.msrb.gmra.mxu0 %v2479_v51 }
 0x372   :  { %2587 = vmatpush.bf16.msra.mxu2 %v7291_v10  ;;  %2613 = vmatpush.bf16.msrb.mxu0 %v7293_v22 }
 0x374   :  { %2602 = vmatpush.bf16.msra.mxu3 %v7300_v37  ;;  %2628 = vmatpush.bf16.msrb.mxu1 %v7302_v60 }
 0x376   :  { %2588 = vmatpush.bf16.msra.mxu2 %v7295_v16  ;;  %2614 = vmatpush.bf16.msrb.mxu0 %v7297_v20 }
 0x378   :  { %2603 = vmatpush.bf16.msra.mxu3 %v7304_v47  ;;  %2629 = vmatpush.bf16.msrb.mxu1 %v7306_v23 }
 0x37a   :  { %2589 = vmatpush.bf16.msra.mxu2 %v7299_v21  ;;  %2615 = vmatpush.bf16.msrb.mxu0 %v7301_v9 }
 0x37b   :  { %2556 = vmatmul.bf16.vlgmr.msrb.gmra.mxu3 %v2480_v55  ;;  %2582 = vmatmul.bf16.vlgmr.msra.gmra.mxu1 %v2480_v55 }
 0x37c   :  { %2604 = vmatpush.bf16.msra.mxu3 %v7308_v6  ;;  %2630 = vmatpush.bf16.msrb.mxu1 %v7310_v63 }
 0x37e   :  { %2590 = vmatpush.bf16.msra.mxu2 %v7303_v44  ;;  %2616 = vmatpush.bf16.msrb.mxu0 %v7305_v43 }
 0x380   :  { %2605 = vmatpush.bf16.msra.mxu3 %v7312_v42  ;;  %2631 = vmatpush.bf16.msrb.mxu1 %v5901_v28 }
 0x381   :  { %2543 = vmatmul.bf16.vlgmr.msrb.gmra.mxu2 %v2479_v51  ;;  %2569 = vmatmul.bf16.vlgmr.msra.gmra.mxu0 %v2479_v51 }
 0x382   :  { %2591 = vmatpush.bf16.msra.mxu2 %v7307_v61  ;;  %2617 = vmatpush.bf16.msrb.mxu0 %v7309_v32 }
 0x384   :  { %2606 = vmatpush.bf16.msra.mxu3 %v5907_v14  ;;  %2632 = vmatpush.bf16.msrb.mxu1 %v5913_v59 }
 0x386   :  { %2592 = vmatpush.bf16.msra.mxu2 %v7311_v38  ;;  %2618 = vmatpush.bf16.msrb.mxu0 %v5899_v33 }
 0x388   :  { %2607 = vmatpush.bf16.msra.mxu3 %v5919_v46  ;;  %2633 = vmatpush.bf16.msrb.mxu1 %v5925_v62 }
 0x38a   :  { %2593 = vmatpush.bf16.msra.mxu2 %v5905_v58  ;;  %2619 = vmatpush.bf16.msrb.mxu0 %v5911_v45 }
 0x38b   :  { %2608 = vmatmul.bf16.vlgmr.msra.gmra.mxu3 %v2480_v55  ;;  %2634 = vmatmul.bf16.vlgmr.msrb.gmra.mxu1 %v2480_v55  ;;  %v7453_v55 = vld [vmem:[#allocation42_spill] sm:$0xff] }
 0x38c   :  { %2788 = vmatpush.bf16.msrb.mxu3 %v5625_v53  ;;  %2814 = vmatpush.bf16.msra.mxu1 %v5629_v57 }
 0x38e   :  { %2594 = vmatpush.bf16.msra.mxu2 %v7433_v56  ;;  %2620 = vmatpush.bf16.msrb.mxu0 %v7434_v0 }
 0x390   :  { %2789 = vmatpush.bf16.msrb.mxu3 %v7363_v29  ;;  %2815 = vmatpush.bf16.msra.mxu1 %v7432_v35 }
 0x391   :  { %2595 = vmatmul.bf16.vlgmr.msra.gmra.mxu2 %v2479_v51  ;;  %2621 = vmatmul.bf16.vlgmr.msrb.gmra.mxu0 %v2479_v51  ;;  %v7455_v51 = vld [vmem:[#allocation37_spill] sm:$0xff] }
 0x392   :  { %2775 = vmatpush.bf16.msrb.mxu2 %v7435_v39  ;;  %2801 = vmatpush.bf16.msra.mxu0 %v7436_v52 }
 0x394   :  { %2790 = vmatpush.bf16.msrb.mxu3 %v7437_v40  ;;  %2816 = vmatpush.bf16.msra.mxu1 %v7438_v5 }
 0x396   :  { %2776 = vmatpush.bf16.msrb.mxu2 %v7439_v49  ;;  %2802 = vmatpush.bf16.msra.mxu0 %v7440_v34  ;;  %v7496_v34 = vld [vmem:[#allocation107_spill] sm:$0xff] }
 0x398   :  { %2791 = vmatpush.bf16.msrb.mxu3 %v7441_v24  ;;  %2817 = vmatpush.bf16.msra.mxu1 %v7442_v36 }
 0x39a   :  { %2777 = vmatpush.bf16.msrb.mxu2 %v7443_v18  ;;  %2803 = vmatpush.bf16.msra.mxu0 %v7444_v17  ;;  %v7495_v17 = vld [vmem:[#allocation106_spill] sm:$0xff] }
 0x39c   :  { %2792 = vmatpush.bf16.msrb.mxu3 %v7445_v1  ;;  %2818 = vmatpush.bf16.msra.mxu1 %v7446_v3 }
 0x39e   :  { %2778 = vmatpush.bf16.msrb.mxu2 %v7447_v41  ;;  %2804 = vmatpush.bf16.msra.mxu0 %v7448_v4  ;;  %v7458_v41 = vld [vmem:[#allocation49_spill] sm:$0xff]  ;;  %v7459_v4 = vld [vmem:[#allocation51_spill] sm:$0xff] }
 0x3a0   :  { %2793 = vmatpush.bf16.msrb.mxu3 %v7449_v7  ;;  %2819 = vmatpush.bf16.msra.mxu1 %v7450_v26  ;;  %v7460_v7 = vld [vmem:[#allocation53_spill] sm:$0xff] }
 0x3a1   :  { %v7461_v26 = vld [vmem:[#allocation41_spill] sm:$0xff] }
 0x3a2   :  { %2779 = vmatpush.bf16.msrb.mxu2 %v7451_v12  ;;  %2805 = vmatpush.bf16.msra.mxu0 %v7452_v13  ;;  %v7462_v12 = vld [vmem:[#allocation43_spill] sm:$0xff] }
 0x3a3   :  { %v7463_v13 = vld [vmem:[#allocation55_spill] sm:$0xff] }
 0x3a4   :  { %2794 = vmatpush.bf16.msrb.mxu3 %v7453_v55  ;;  %2820 = vmatpush.bf16.msra.mxu1 %v7454_v27  ;;  %v7464_v55 = vld [vmem:[#allocation57_spill] sm:$0xff]  ;;  %v7465_v27 = vld [vmem:[#allocation46_spill] sm:$0xff] }
 0x3a6   :  { %2780 = vmatpush.bf16.msrb.mxu2 %v7455_v51  ;;  %2806 = vmatpush.bf16.msra.mxu0 %v7456_v19  ;;  %v7466_v51 = vld [vmem:[#allocation48_spill] sm:$0xff]  ;;  %v7467_v19 = vld [vmem:[#allocation50_spill] sm:$0xff] }
 0x3a8   :  { %2795 = vmatpush.bf16.msrb.mxu3 %v7457_v54  ;;  %2821 = vmatpush.bf16.msra.mxu1 %v7458_v41  ;;  %v7468_v54 = vld [vmem:[#allocation52_spill] sm:$0xff]  ;;  %v7469_v41 = vld [vmem:[#allocation59_spill] sm:$0xff] }
 0x3aa   :  { %2781 = vmatpush.bf16.msrb.mxu2 %v7461_v26  ;;  %2807 = vmatpush.bf16.msra.mxu0 %v7462_v12  ;;  %v7472_v26 = vld [vmem:[#allocation56_spill] sm:$0xff]  ;;  %v7473_v12 = vld [vmem:[#allocation63_spill] sm:$0xff] }
 0x3ac   :  { %2840 = vmatpush.bf16.msra.mxu3 %v7459_v4  ;;  %2866 = vmatpush.bf16.msrb.mxu1 %v7460_v7  ;;  %v7470_v4 = vld [vmem:[#allocation61_spill] sm:$0xff]  ;;  %v7471_v7 = vld [vmem:[#allocation54_spill] sm:$0xff] }
 0x3ae   :  { %2782 = vmatpush.bf16.msrb.mxu2 %v7465_v27  ;;  %2808 = vmatpush.bf16.msra.mxu0 %v7466_v51  ;;  %v7476_v27 = vld [vmem:[#allocation60_spill] sm:$0xff]  ;;  %v7477_v51 = vld [vmem:[#allocation67_spill] sm:$0xff] }
 0x3b0   :  { %2841 = vmatpush.bf16.msra.mxu3 %v7463_v13  ;;  %2867 = vmatpush.bf16.msrb.mxu1 %v7464_v55  ;;  %v7474_v13 = vld [vmem:[#allocation65_spill] sm:$0xff]  ;;  %v7475_v55 = vld [vmem:[#allocation58_spill] sm:$0xff] }
 0x3b2   :  { %2827 = vmatpush.bf16.msra.mxu2 %v7467_v19  ;;  %2853 = vmatpush.bf16.msrb.mxu0 %v7468_v54  ;;  %v7478_v19 = vld [vmem:[#allocation69_spill] sm:$0xff]  ;;  %v7479_v54 = vld [vmem:[#allocation62_spill] sm:$0xff] }
 0x3b4   :  { %2842 = vmatpush.bf16.msra.mxu3 %v7469_v41  ;;  %2868 = vmatpush.bf16.msrb.mxu1 %v7470_v4  ;;  %v7480_v41 = vld [vmem:[#allocation64_spill] sm:$0xff]  ;;  %v7481_v4 = vld [vmem:[#allocation71_spill] sm:$0xff] }
 0x3b6   :  { %2828 = vmatpush.bf16.msra.mxu2 %v7471_v7  ;;  %2854 = vmatpush.bf16.msrb.mxu0 %v7472_v26  ;;  %v7482_v7 = vld [vmem:[#allocation73_spill] sm:$0xff]  ;;  %v7483_v26 = vld [vmem:[#allocation66_spill] sm:$0xff] }
 0x3b8   :  { %2843 = vmatpush.bf16.msra.mxu3 %v7473_v12  ;;  %2869 = vmatpush.bf16.msrb.mxu1 %v7474_v13  ;;  %v7484_v12 = vld [vmem:[#allocation68_spill] sm:$0xff]  ;;  %v7485_v13 = vld [vmem:[#allocation75_spill] sm:$0xff] }
 0x3ba   :  { %2829 = vmatpush.bf16.msra.mxu2 %v7475_v55  ;;  %2855 = vmatpush.bf16.msrb.mxu0 %v7476_v27  ;;  %v7486_v55 = vld [vmem:[#allocation77_spill] sm:$0xff]  ;;  %v7487_v27 = vld [vmem:[#allocation70_spill] sm:$0xff] }
 0x3bc   :  { %2844 = vmatpush.bf16.msra.mxu3 %v7477_v51  ;;  %2870 = vmatpush.bf16.msrb.mxu1 %v7478_v19  ;;  %v7488_v51 = vld [vmem:[#allocation72_spill] sm:$0xff]  ;;  %v7489_v19 = vld [vmem:[#allocation79_spill] sm:$0xff] }
 0x3be   :  { %2830 = vmatpush.bf16.msra.mxu2 %v7479_v54  ;;  %2856 = vmatpush.bf16.msrb.mxu0 %v7480_v41  ;;  %v7490_v54 = vld [vmem:[#allocation81_spill] sm:$0xff]  ;;  %v7491_v41 = vld [vmem:[#allocation74_spill] sm:$0xff] }
 0x3c0   :  { %2845 = vmatpush.bf16.msra.mxu3 %v7481_v4  ;;  %2871 = vmatpush.bf16.msrb.mxu1 %v7482_v7  ;;  %v7492_v4 = vld [vmem:[#allocation76_spill] sm:$0xff]  ;;  %v7493_v7 = vld [vmem:[#allocation78_spill] sm:$0xff] }
 0x3c2   :  { %2831 = vmatpush.bf16.msra.mxu2 %v7483_v26  ;;  %2857 = vmatpush.bf16.msrb.mxu0 %v7484_v12  ;;  %v7494_v26 = vld [vmem:[#allocation80_spill] sm:$0xff] }
 0x3c4   :  { %2846 = vmatpush.bf16.msra.mxu3 %v7485_v13  ;;  %2872 = vmatpush.bf16.msrb.mxu1 %v7486_v55 }
 0x3c6   :  { %2832 = vmatpush.bf16.msra.mxu2 %v7487_v27  ;;  %2858 = vmatpush.bf16.msrb.mxu0 %v7488_v51 }
 0x3c8   :  { %2847 = vmatpush.bf16.msra.mxu3 %v7489_v19  ;;  %2873 = vmatpush.bf16.msrb.mxu1 %v7490_v54 }
 0x3ca   :  { %2833 = vmatpush.bf16.msra.mxu2 %v7491_v41  ;;  %2859 = vmatpush.bf16.msrb.mxu0 %v7492_v4 }
 0x3ce   :  { %2834 = vmatpush.bf16.msra.mxu2 %v7493_v7  ;;  %2860 = vmatpush.bf16.msrb.mxu0 %v7494_v26 }
 0x3e8   :  { %v2531_v12 = vpop.f32.mrf.mxu1 }
 0x3ee   :  { %v2505_v13 = vpop.f32.mrf.mxu3  ;;  %v2518_v3 = vpop.f32.mrf.mxu0 }
 0x3ef   :  { %v2532_v55 = vadd.f32 %v2531_v12, %v2518_v3 }
 0x3f0   :  { %v2533_v1 = vpop.f32.mrf.mxu1 }
 0x3f1   :  { %v2642_v27 = vrot.slane %v2532_v55, 5 }
 0x3f3   :  { %v2646_v51 = vadd.f32 %v2642_v27, %v7495_v17 }
 0x3f4   :  { %v2492_v18 = vpop.f32.mrf.mxu2 }
 0x3f5   :  { %v4833_v19 = vmul.f32 -1.442695, %v2646_v51  ;;  %v2506_v36 = vadd.f32 %v2505_v13, %v2492_v18  ;;  %v7497_v18 = vld [vmem:[#allocation108_spill] sm:$0xff] }
 0x3f6   :  { %v2507_v54 = vpop.f32.mrf.mxu3  ;;  %v2520_v24 = vpop.f32.mrf.mxu0 }
 0x3f7   :  { %5140 = vpow2.f32 %v4833_v19  ;;  %v2641_v41 = vrot.slane %v2506_v36, 5 }
 0x3f8   :  { %v2583_v4 = vpop.f32.mrf.mxu1 }
 0x3f9   :  { %v2645_v7 = vadd.f32 %v2641_v41, %v7496_v34 }
 0x3fb   :  { %v4832_v49 = vmul.f32 -1.442695, %v2645_v7 }
 0x3fc   :  { %v2494_v26 = vpop.f32.mrf.mxu2 }
 0x3fd   :  { %v5141_v5 = vpop.eup %5140  ;;  %5142 = vpow2.f32 %v4832_v49 }
 0x3fe   :  { %v2654_v40 = vadd.f32 1.0, %v5141_v5  ;;  %v2557_v3 = vpop.f32.mrf.mxu3  ;;  %v2570_v1 = vpop.f32.mrf.mxu0 }
 0x3ff   :  { %v2584_v12 = vadd.f32 %v2583_v4, %v2570_v1  ;;  %v7498_v1 = vld [vmem:[#allocation109_spill] sm:$0xff] }
 0x400   :  { %5144 = vrcp.f32 %v2654_v40  ;;  %v2585_v55 = vpop.f32.mrf.mxu1  ;;  %vm2675_vm7 = vweird.f32 %v2654_v40  ;;  %v2679_v52 = vand.u32 2147483647, %v2654_v40 }
 0x401   :  { %v2688_v27 = vrot.slane %v2584_v12, 5 }
 0x402   :  { %vm2680_vm11 = vcmp.eq.f32.partialorder %v2679_v52, 8.507059e+37 }
 0x403   :  { %v5143_v51 = vpop.eup %5142  ;;  %v2692_v54 = vadd.f32 %v2688_v27, %v7497_v18 }
 0x404   :  { %v6446_v24 = vadd.f32 1.0, %v5143_v51  ;;  %v2544_v19 = vpop.f32.mrf.mxu2 }
 0x405   :  { %v4835_v36 = vmul.f32 -1.442695, %v2692_v54  ;;  %v2558_v13 = vadd.f32 %v2557_v3, %v2544_v19 }
 0x406   :  { %v5145_v41 = vpop.eup %5144  ;;  %5146 = vrcp.f32 %v6446_v24  ;;  %v2559_v7 = vpop.f32.mrf.mxu3  ;;  %vm2660_vm13 = vweird.f32 %v6446_v24 }
 0x407   :  { %v2572_v49 = vpop.f32.mrf.mxu0  ;;  %5148 = vpow2.f32 %v4835_v36  ;;  %v2687_v5 = vrot.slane %v2558_v13, 5  ;;  %v2671_v26 = vmul.f32 %v5145_v41, %v2654_v40  ;;  %vm2676_vm6 = vweird.f32 %v5145_v41 }
 0x408   :  { %v2635_v4 = vpop.f32.mrf.mxu1  ;;  %v2681_v13 = vand.u32 2147483648, %v2654_v40  ;;  %vm2677_vm10 = vmor %vm2675_vm7, %vm2676_vm6 }
 0x409   :  { %v2691_v55 = vadd.f32 %v2687_v5, %v7498_v1  ;;  %v2672_v12 = vsub.f32 1.0, %v2671_v26 }
 0x40b   :  { %v4834_v34 = vmul.f32 -1.442695, %v2691_v55  ;;  %v2673_v17 = vmul.f32 %v5145_v41, %v2672_v12  ;;  %v7499_v12 = vld [vmem:[#allocation110_spill] sm:$0xff] }
 0x40c   :  { %v5147_v27 = vpop.eup %5146  ;;  %v2546_v51 = vpop.f32.mrf.mxu2 }
 0x40d   :  { %v5149_v18 = vpop.eup %5148  ;;  %5150 = vpow2.f32 %v4834_v34  ;;  %v2674_v54 = vadd.f32 %v5145_v41, %v2673_v17  ;;  %v2656_v3 = vmul.f32 %v5147_v27, %v6446_v24  ;;  %v2682_v51 = vor.u32 1.1754944e-38, %v2681_v13 }
 0x40e   :  { %v6451_v19 = vadd.f32 1.0, %v5149_v18  ;;  %v2609_v7 = vpop.f32.mrf.mxu3  ;;  %vm2661_vm12 = vweird.f32 %v5147_v27 }
 0x40f   :  { %v2622_v36 = vpop.f32.mrf.mxu0  ;;  %v2657_v5 = vsub.f32 1.0, %v2656_v3  ;;  %v2678_v55 = vsel %vm2677_vm10, %v5145_v41, %v2674_v54  ;;  %v2666_v3 = vand.u32 2147483648, %v6446_v24  ;;  %v2664_v41 = vand.u32 2147483647, %v6446_v24  ;;  %vm2662_vm14 = vmor %vm2660_vm13, %vm2661_vm12 }
 0x410   :  { %v2636_v49 = vadd.f32 %v2635_v4, %v2622_v36  ;;  %5152 = vrcp.f32 %v6451_v19  ;;  %v2637_v26 = vpop.f32.mrf.mxu1  ;;  %v2683_v0 = vsel %vm2680_vm11, %v2682_v51, %v2678_v55  ;;  %vm2721_vm2 = vweird.f32 %v6451_v19 }
 0x411   :  { %v2658_v17 = vmul.f32 %v5147_v27, %v2657_v5  ;;  %vm2665_vm15 = vcmp.eq.f32.partialorder %v2664_v41, 8.507059e+37 }
 0x412   :  { %v2732_v34 = vadd.f32 %v2636_v49, %v7499_v12 }
 0x413   :  { %v5151_v1 = vpop.eup %5150  ;;  %v2659_v35 = vadd.f32 %v5147_v27, %v2658_v17 }
 0x414   :  { %v2736_v18 = vrot.slane %v2732_v34, 5  ;;  %v2699_v39 = vadd.f32 1.0, %v5151_v1  ;;  %v2596_v56 = vpop.f32.mrf.mxu2 }
 0x415   :  { %v2610_v40 = vadd.f32 %v2609_v7, %v2596_v56  ;;  %v2663_v49 = vsel %vm2662_vm14, %v5147_v27, %v2659_v35  ;;  %v2667_v56 = vor.u32 1.1754944e-38, %v2666_v3  ;;  %v2727_v35 = vand.u32 2147483648, %v6451_v19 }
 0x416   :  { %v2740_v4 = vmul.f32 %v2736_v18, %v2683_v0  ;;  %v5153_v36 = vpop.eup %5152  ;;  %5154 = vrcp.f32 %v2699_v39  ;;  %v2611_v54 = vpop.f32.mrf.mxu3  ;;  %vm2706_vm7 = vweird.f32 %v2699_v39 }
 0x417   :  { %v2624_v13 = vpop.f32.mrf.mxu0  ;;  %v2717_v52 = vmul.f32 %v5153_v36, %v6451_v19  ;;  %v2731_v5 = vadd.f32 %v2610_v40, %v6037_v50  ;;  %v2668_v55 = vsel %vm2665_vm15, %v2667_v56, %v2663_v49  ;;  %vm2722_vm1 = vweird.f32 %v5153_v36 }
 0x418   :  { %v2742_v1 = vadd.f32 %v2740_v4, %v5995_v2  ;;  %v2725_v40 = vand.u32 2147483647, %v6451_v19  ;;  %vm2723_vm4 = vmor %vm2721_vm2, %vm2722_vm1 }
 0x419   :  { %v2718_v0 = vsub.f32 1.0, %v2717_v52  ;;  %v2735_v7 = vrot.slane %v2731_v5, 5 }
 0x41a   :  { %5156 = vtanh.f32 %v2742_v1  ;;  %v2728_v1 = vor.u32 1.1754944e-38, %v2727_v35  ;;  %vm2726_vm5 = vcmp.eq.f32.partialorder %v2725_v40, 8.507059e+37 }
 0x41b   :  { %v2719_v26 = vmul.f32 %v5153_v36, %v2718_v0  ;;  %v2739_v17 = vmul.f32 %v2735_v7, %v2668_v55  ;;  %v2712_v7 = vand.u32 2147483648, %v2699_v39  ;;  %v2710_v55 = vand.u32 2147483647, %v2699_v39 }
 0x41c   :  { %v5155_v34 = vpop.eup %5154  ;;  %v2598_v24 = vpop.f32.mrf.mxu2 }
 0x41d   :  { %v2702_v51 = vmul.f32 %v5155_v34, %v2699_v39  ;;  %v2720_v18 = vadd.f32 %v5153_v36, %v2719_v26  ;;  %v2741_v54 = vadd.f32 %v2739_v17, %v6003_v15  ;;  %vm2707_vm6 = vweird.f32 %v5155_v34 }
 0x41e   :  { %vm2708_vm10 = vmor %vm2706_vm7, %vm2707_vm6  ;;  %vm2711_vm11 = vcmp.eq.f32.partialorder %v2710_v55, 8.507059e+37  ;;  %v7511_v55 = vld [vmem:[#allocation30_spill] sm:$0xff] }
 0x41f   :  { %v2703_v27 = vsub.f32 1.0, %v2702_v51  ;;  %5158 = vtanh.f32 %v2741_v54  ;;  %v2724_v13 = vsel %vm2723_vm4, %v5153_v36, %v2720_v18  ;;  %v2713_v51 = vor.u32 1.1754944e-38, %v2712_v7  ;;  %v7509_v7 = vld [vmem:[#allocation21_spill] sm:$0xff] }
 0x420   :  { %v5157_v4 = vpop.eup %5156  ;;  %v2729_v0 = vsel %vm2726_vm5, %v2728_v1, %v2724_v13  ;;  %v7502_v13 = vld [vmem:[#allocation24_spill] sm:$0xff]  ;;  %v7504_v1 = vld [vmem:[#allocation105_spill] sm:$0xff] }
 0x421   :  { %v2748_v3 = vrot.slane %v5157_v4, 1  ;;  %v2704_v41 = vmul.f32 %v5155_v34, %v2703_v27 }
 0x423   :  { %v2752_v52 = vsub.f32 %v6338_v25, %v2748_v3  ;;  %v2705_v5 = vadd.f32 %v5155_v34, %v2704_v41  ;;  %v7526_v25 = vld [vmem:[#allocation39_spill] sm:$0xff] }
 0x425   :  { %v2756_v49 = vrot.slane %v2752_v52, 7  ;;  %v5159_v56 = vpop.eup %5158  ;;  %v2709_v24 = vsel %vm2708_vm10, %v5155_v34, %v2705_v5  ;;  %v7503_v52 = vld [vmem:[#allocation104_spill] sm:$0xff] }
 0x426   :  { %v2747_v17 = vrot.slane %v5159_v56, 1  ;;  %v2714_v35 = vsel %vm2711_vm11, %v2713_v51, %v2709_v24  ;;  %v7506_v5 = vld [vmem:[#allocation20_spill] sm:$0xff]  ;;  %v7513_v24 = vld [vmem:[#allocation25_spill] sm:$0xff]  ;;  %v7515_v51 = vld [vmem:[#allocation34_spill] sm:$0xff] }
 0x427   :  { %v2760_v26 = vmul.f32 %v2756_v49, %v2729_v0  ;;  %v7505_v49 = vld [vmem:[#allocation19_spill] sm:$0xff]  ;;  %v7507_v0 = vld [vmem:[#allocation26_spill] sm:$0xff] }
 0x428   :  { %v2751_v36 = vsub.f32 %v6343_v48, %v2747_v17  ;;  %v7512_v17 = vld [vmem:[#allocation32_spill] sm:$0xff]  ;;  %v7525_v48 = vld [vmem:[#allocation37_spill] sm:$0xff] }
 0x429   :  { %v6466_v19 = vadd.f32 %v5157_v4, %v2760_v26  ;;  %v7510_v26 = vld [vmem:[#allocation23_spill] sm:$0xff] }
 0x42a   :  { %v2755_v54 = vrot.slane %v2751_v36, 7  ;;  %v7514_v36 = vld [vmem:[#allocation27_spill] sm:$0xff] }
 0x42b   :  { %7500 = vst [vmem:[#allocation86_spill] sm:$0xff] %v6466_v19  ;;  %v2764_v18 = vpack.c.bf16 %v6466_v19, %v6466_v19 }
 0x42c   :  { %v2759_v40 = vmul.f32 %v2755_v54, %v2714_v35  ;;  %v7517_v54 = vld [vmem:[#allocation29_spill] sm:$0xff]  ;;  %v7518_v35 = vld [vmem:[#allocation31_spill] sm:$0xff] }
 0x42d   :  { %v2770_v27 = vshrl.u32 %v2764_v18, 16  ;;  %v7516_v18 = vld [vmem:[#allocation36_spill] sm:$0xff] }
 0x42e   :  { %v6471_v41 = vadd.f32 %v5159_v56, %v2759_v40  ;;  %v7508_v56 = vld [vmem:[#allocation28_spill] sm:$0xff] }
 0x42f   :  { %v2772_v3 = vrot.slane %v2770_v27, 1  ;;  %v7519_v27 = vld [vmem:[#allocation38_spill] sm:$0xff]  ;;  %v7520_v40 = vld [vmem:[#allocation40_spill] sm:$0xff] }
 0x430   :  { %7501 = vst [vmem:[#allocation87_spill] sm:$0xff] %v6471_v41  ;;  %v2763_v39 = vpack.c.bf16 %v6471_v41, %v6471_v41 }
 0x431   :  { %2796 = vmatmul.bf16.vlgmr.msrb.gmra.mxu3 %v2772_v3  ;;  %2822 = vmatmul.bf16.vlgmr.msra.gmra.mxu1 %v2772_v3 }
 0x432   :  { %2892 = vmatpush.bf16.msrb.mxu3 %v7292_v31  ;;  %2918 = vmatpush.bf16.msra.mxu1 %v7294_v11  ;;  %v2766_v34 = vshrl.u32 %v2763_v39, 16  ;;  %v7522_v39 = vld [vmem:[#allocation35_spill] sm:$0xff] }
 0x434   :  { %v2768_v4 = vrot.slane %v2766_v34, 1  ;;  %v7523_v34 = vld [vmem:[#allocation42_spill] sm:$0xff] }
 0x436   :  { %2893 = vmatpush.bf16.msrb.mxu3 %v7296_v30  ;;  %2919 = vmatpush.bf16.msra.mxu1 %v7298_v8 }
 0x437   :  { %2783 = vmatmul.bf16.vlgmr.msrb.gmra.mxu2 %v2768_v4  ;;  %2809 = vmatmul.bf16.vlgmr.msra.gmra.mxu0 %v2768_v4 }
 0x438   :  { %2879 = vmatpush.bf16.msrb.mxu2 %v7291_v10  ;;  %2905 = vmatpush.bf16.msra.mxu0 %v7293_v22 }
 0x43a   :  { %2894 = vmatpush.bf16.msrb.mxu3 %v7300_v37  ;;  %2920 = vmatpush.bf16.msra.mxu1 %v7302_v60 }
 0x43c   :  { %2880 = vmatpush.bf16.msrb.mxu2 %v7295_v16  ;;  %2906 = vmatpush.bf16.msra.mxu0 %v7297_v20 }
 0x43e   :  { %2895 = vmatpush.bf16.msrb.mxu3 %v7304_v47  ;;  %2921 = vmatpush.bf16.msra.mxu1 %v7306_v23 }
 0x440   :  { %2881 = vmatpush.bf16.msrb.mxu2 %v7299_v21  ;;  %2907 = vmatpush.bf16.msra.mxu0 %v7301_v9 }
 0x441   :  { %2848 = vmatmul.bf16.vlgmr.msra.gmra.mxu3 %v2772_v3  ;;  %2874 = vmatmul.bf16.vlgmr.msrb.gmra.mxu1 %v2772_v3 }
 0x442   :  { %2896 = vmatpush.bf16.msrb.mxu3 %v7308_v6  ;;  %2922 = vmatpush.bf16.msra.mxu1 %v7310_v63 }
 0x444   :  { %2882 = vmatpush.bf16.msrb.mxu2 %v7303_v44  ;;  %2908 = vmatpush.bf16.msra.mxu0 %v7305_v43 }
 0x446   :  { %2897 = vmatpush.bf16.msrb.mxu3 %v7312_v42  ;;  %2923 = vmatpush.bf16.msra.mxu1 %v5901_v28 }
 0x447   :  { %2835 = vmatmul.bf16.vlgmr.msra.gmra.mxu2 %v2768_v4  ;;  %2861 = vmatmul.bf16.vlgmr.msrb.gmra.mxu0 %v2768_v4 }
 0x448   :  { %2883 = vmatpush.bf16.msrb.mxu2 %v7307_v61  ;;  %2909 = vmatpush.bf16.msra.mxu0 %v7309_v32 }
 0x44a   :  { %2898 = vmatpush.bf16.msrb.mxu3 %v5907_v14  ;;  %2924 = vmatpush.bf16.msra.mxu1 %v5913_v59 }
 0x44c   :  { %2884 = vmatpush.bf16.msrb.mxu2 %v7311_v38  ;;  %2910 = vmatpush.bf16.msra.mxu0 %v5899_v33 }
 0x44e   :  { %2899 = vmatpush.bf16.msrb.mxu3 %v5919_v46  ;;  %2925 = vmatpush.bf16.msra.mxu1 %v5925_v62 }
 0x450   :  { %2885 = vmatpush.bf16.msrb.mxu2 %v5905_v58  ;;  %2911 = vmatpush.bf16.msra.mxu0 %v5911_v45 }
 0x451   :  { %2900 = vmatmul.bf16.vlgmr.msrb.gmra.mxu3 %v2772_v3  ;;  %2926 = vmatmul.bf16.vlgmr.msra.gmra.mxu1 %v2772_v3  ;;  %v7521_v3 = vld [vmem:[#allocation33_spill] sm:$0xff] }
 0x452   :  { %3076 = vmatpush.bf16.msra.mxu3 %v5625_v53  ;;  %3102 = vmatpush.bf16.msrb.mxu1 %v5629_v57 }
 0x454   :  { %2886 = vmatpush.bf16.msrb.mxu2 %v7503_v52  ;;  %2912 = vmatpush.bf16.msra.mxu0 %v7504_v1 }
 0x456   :  { %3077 = vmatpush.bf16.msra.mxu3 %v7363_v29  ;;  %3103 = vmatpush.bf16.msrb.mxu1 %v7502_v13 }
 0x457   :  { %2887 = vmatmul.bf16.vlgmr.msrb.gmra.mxu2 %v2768_v4  ;;  %2913 = vmatmul.bf16.vlgmr.msra.gmra.mxu0 %v2768_v4  ;;  %v7524_v4 = vld [vmem:[#allocation44_spill] sm:$0xff] }
 0x458   :  { %3063 = vmatpush.bf16.msra.mxu2 %v7505_v49  ;;  %3089 = vmatpush.bf16.msrb.mxu0 %v7506_v5 }
 0x45a   :  { %3078 = vmatpush.bf16.msra.mxu3 %v7507_v0  ;;  %3104 = vmatpush.bf16.msrb.mxu1 %v7508_v56 }
 0x45c   :  { %3064 = vmatpush.bf16.msra.mxu2 %v7509_v7  ;;  %3090 = vmatpush.bf16.msrb.mxu0 %v7510_v26  ;;  %v7566_v7 = vld [vmem:[#allocation107_spill] sm:$0xff] }
 0x45e   :  { %3079 = vmatpush.bf16.msra.mxu3 %v7511_v55  ;;  %3105 = vmatpush.bf16.msrb.mxu1 %v7512_v17 }
 0x460   :  { %3065 = vmatpush.bf16.msra.mxu2 %v7513_v24  ;;  %3091 = vmatpush.bf16.msrb.mxu0 %v7514_v36  ;;  %v7565_v24 = vld [vmem:[#allocation106_spill] sm:$0xff] }
 0x462   :  { %3080 = vmatpush.bf16.msra.mxu3 %v7515_v51  ;;  %3106 = vmatpush.bf16.msrb.mxu1 %v7516_v18  ;;  %v7527_v18 = vld [vmem:[#allocation47_spill] sm:$0xff] }
 0x464   :  { %3066 = vmatpush.bf16.msra.mxu2 %v7517_v54  ;;  %3092 = vmatpush.bf16.msrb.mxu0 %v7518_v35  ;;  %v7528_v54 = vld [vmem:[#allocation49_spill] sm:$0xff]  ;;  %v7529_v35 = vld [vmem:[#allocation51_spill] sm:$0xff] }
 0x466   :  { %3081 = vmatpush.bf16.msra.mxu3 %v7519_v27  ;;  %3107 = vmatpush.bf16.msrb.mxu1 %v7520_v40  ;;  %v7530_v27 = vld [vmem:[#allocation53_spill] sm:$0xff] }
 0x467   :  { %v7531_v40 = vld [vmem:[#allocation41_spill] sm:$0xff] }
 0x468   :  { %3067 = vmatpush.bf16.msra.mxu2 %v7521_v3  ;;  %3093 = vmatpush.bf16.msrb.mxu0 %v7522_v39  ;;  %v7532_v3 = vld [vmem:[#allocation43_spill] sm:$0xff] }
 0x469   :  { %v7533_v39 = vld [vmem:[#allocation55_spill] sm:$0xff] }
 0x46a   :  { %3082 = vmatpush.bf16.msra.mxu3 %v7523_v34  ;;  %3108 = vmatpush.bf16.msrb.mxu1 %v7524_v4  ;;  %v7534_v34 = vld [vmem:[#allocation57_spill] sm:$0xff]  ;;  %v7535_v4 = vld [vmem:[#allocation46_spill] sm:$0xff] }
 0x46c   :  { %3068 = vmatpush.bf16.msra.mxu2 %v7525_v48  ;;  %3094 = vmatpush.bf16.msrb.mxu0 %v7526_v25  ;;  %v7536_v48 = vld [vmem:[#allocation48_spill] sm:$0xff]  ;;  %v7537_v25 = vld [vmem:[#allocation50_spill] sm:$0xff] }
 0x46e   :  { %3083 = vmatpush.bf16.msra.mxu3 %v7527_v18  ;;  %3109 = vmatpush.bf16.msrb.mxu1 %v7528_v54  ;;  %v7538_v18 = vld [vmem:[#allocation52_spill] sm:$0xff]  ;;  %v7539_v54 = vld [vmem:[#allocation59_spill] sm:$0xff] }
 0x470   :  { %3069 = vmatpush.bf16.msra.mxu2 %v7531_v40  ;;  %3095 = vmatpush.bf16.msrb.mxu0 %v7532_v3  ;;  %v7542_v40 = vld [vmem:[#allocation56_spill] sm:$0xff]  ;;  %v7543_v3 = vld [vmem:[#allocation63_spill] sm:$0xff] }
 0x472   :  { %3128 = vmatpush.bf16.msrb.mxu3 %v7529_v35  ;;  %3154 = vmatpush.bf16.msra.mxu1 %v7530_v27  ;;  %v7540_v35 = vld [vmem:[#allocation61_spill] sm:$0xff]  ;;  %v7541_v27 = vld [vmem:[#allocation54_spill] sm:$0xff] }
 0x474   :  { %3070 = vmatpush.bf16.msra.mxu2 %v7535_v4  ;;  %3096 = vmatpush.bf16.msrb.mxu0 %v7536_v48  ;;  %v7546_v4 = vld [vmem:[#allocation60_spill] sm:$0xff]  ;;  %v7547_v48 = vld [vmem:[#allocation67_spill] sm:$0xff] }
 0x476   :  { %3129 = vmatpush.bf16.msrb.mxu3 %v7533_v39  ;;  %3155 = vmatpush.bf16.msra.mxu1 %v7534_v34  ;;  %v7544_v39 = vld [vmem:[#allocation65_spill] sm:$0xff]  ;;  %v7545_v34 = vld [vmem:[#allocation58_spill] sm:$0xff] }
 0x478   :  { %3115 = vmatpush.bf16.msrb.mxu2 %v7537_v25  ;;  %3141 = vmatpush.bf16.msra.mxu0 %v7538_v18  ;;  %v7548_v25 = vld [vmem:[#allocation69_spill] sm:$0xff]  ;;  %v7549_v18 = vld [vmem:[#allocation62_spill] sm:$0xff] }
 0x47a   :  { %3130 = vmatpush.bf16.msrb.mxu3 %v7539_v54  ;;  %3156 = vmatpush.bf16.msra.mxu1 %v7540_v35  ;;  %v7550_v54 = vld [vmem:[#allocation64_spill] sm:$0xff]  ;;  %v7551_v35 = vld [vmem:[#allocation71_spill] sm:$0xff] }
 0x47c   :  { %3116 = vmatpush.bf16.msrb.mxu2 %v7541_v27  ;;  %3142 = vmatpush.bf16.msra.mxu0 %v7542_v40  ;;  %v7552_v27 = vld [vmem:[#allocation73_spill] sm:$0xff]  ;;  %v7553_v40 = vld [vmem:[#allocation66_spill] sm:$0xff] }
 0x47e   :  { %3131 = vmatpush.bf16.msrb.mxu3 %v7543_v3  ;;  %3157 = vmatpush.bf16.msra.mxu1 %v7544_v39  ;;  %v7554_v3 = vld [vmem:[#allocation68_spill] sm:$0xff]  ;;  %v7555_v39 = vld [vmem:[#allocation75_spill] sm:$0xff] }
 0x480   :  { %3117 = vmatpush.bf16.msrb.mxu2 %v7545_v34  ;;  %3143 = vmatpush.bf16.msra.mxu0 %v7546_v4  ;;  %v7556_v34 = vld [vmem:[#allocation77_spill] sm:$0xff]  ;;  %v7557_v4 = vld [vmem:[#allocation70_spill] sm:$0xff] }
 0x482   :  { %3132 = vmatpush.bf16.msrb.mxu3 %v7547_v48  ;;  %3158 = vmatpush.bf16.msra.mxu1 %v7548_v25  ;;  %v7558_v48 = vld [vmem:[#allocation72_spill] sm:$0xff]  ;;  %v7559_v25 = vld [vmem:[#allocation79_spill] sm:$0xff] }
 0x484   :  { %3118 = vmatpush.bf16.msrb.mxu2 %v7549_v18  ;;  %3144 = vmatpush.bf16.msra.mxu0 %v7550_v54  ;;  %v7560_v18 = vld [vmem:[#allocation81_spill] sm:$0xff]  ;;  %v7561_v54 = vld [vmem:[#allocation74_spill] sm:$0xff] }
 0x486   :  { %3133 = vmatpush.bf16.msrb.mxu3 %v7551_v35  ;;  %3159 = vmatpush.bf16.msra.mxu1 %v7552_v27  ;;  %v7562_v35 = vld [vmem:[#allocation76_spill] sm:$0xff]  ;;  %v7563_v27 = vld [vmem:[#allocation78_spill] sm:$0xff] }
 0x488   :  { %3119 = vmatpush.bf16.msrb.mxu2 %v7553_v40  ;;  %3145 = vmatpush.bf16.msra.mxu0 %v7554_v3  ;;  %v7564_v40 = vld [vmem:[#allocation80_spill] sm:$0xff] }
 0x48a   :  { %3134 = vmatpush.bf16.msrb.mxu3 %v7555_v39  ;;  %3160 = vmatpush.bf16.msra.mxu1 %v7556_v34 }
 0x48c   :  { %3120 = vmatpush.bf16.msrb.mxu2 %v7557_v4  ;;  %3146 = vmatpush.bf16.msra.mxu0 %v7558_v48 }
 0x48e   :  { %3135 = vmatpush.bf16.msrb.mxu3 %v7559_v25  ;;  %3161 = vmatpush.bf16.msra.mxu1 %v7560_v18 }
 0x490   :  { %3121 = vmatpush.bf16.msrb.mxu2 %v7561_v54  ;;  %3147 = vmatpush.bf16.msra.mxu0 %v7562_v35 }
 0x494   :  { %3122 = vmatpush.bf16.msrb.mxu2 %v7563_v27  ;;  %3148 = vmatpush.bf16.msra.mxu0 %v7564_v40 }
 0x4ae   :  { %v2823_v3 = vpop.f32.mrf.mxu1 }
 0x4b4   :  { %v2797_v39 = vpop.f32.mrf.mxu3  ;;  %v2810_v51 = vpop.f32.mrf.mxu0 }
 0x4b5   :  { %v2824_v34 = vadd.f32 %v2823_v3, %v2810_v51 }
 0x4b6   :  { %v2825_v36 = vpop.f32.mrf.mxu1 }
 0x4b7   :  { %v2934_v4 = vrot.slane %v2824_v34, 4 }
 0x4b9   :  { %v2938_v48 = vadd.f32 %v2934_v4, %v7565_v24 }
 0x4ba   :  { %v2784_v17 = vpop.f32.mrf.mxu2 }
 0x4bb   :  { %v4837_v25 = vmul.f32 -1.442695, %v2938_v48  ;;  %v2798_v55 = vadd.f32 %v2797_v39, %v2784_v17  ;;  %v7567_v17 = vld [vmem:[#allocation108_spill] sm:$0xff] }
 0x4bc   :  { %v2799_v18 = vpop.f32.mrf.mxu3  ;;  %v2812_v26 = vpop.f32.mrf.mxu0 }
 0x4bd   :  { %5160 = vpow2.f32 %v4837_v25  ;;  %v2933_v54 = vrot.slane %v2798_v55, 4 }
 0x4be   :  { %v2875_v35 = vpop.f32.mrf.mxu1 }
 0x4bf   :  { %v2937_v27 = vadd.f32 %v2933_v54, %v7566_v7 }
 0x4c1   :  { %v4836_v56 = vmul.f32 -1.442695, %v2937_v27 }
 0x4c2   :  { %v2786_v40 = vpop.f32.mrf.mxu2 }
 0x4c3   :  { %v5161_v0 = vpop.eup %5160  ;;  %5162 = vpow2.f32 %v4836_v56 }
 0x4c4   :  { %v2946_v5 = vadd.f32 1.0, %v5161_v0  ;;  %v2849_v51 = vpop.f32.mrf.mxu3  ;;  %v2862_v36 = vpop.f32.mrf.mxu0 }
 0x4c5   :  { %v2876_v3 = vadd.f32 %v2875_v35, %v2862_v36  ;;  %v7568_v36 = vld [vmem:[#allocation109_spill] sm:$0xff] }
 0x4c6   :  { %5164 = vrcp.f32 %v2946_v5  ;;  %v2877_v34 = vpop.f32.mrf.mxu1  ;;  %vm2967_vm13 = vweird.f32 %v2946_v5  ;;  %v2971_v49 = vand.u32 2147483647, %v2946_v5 }
 0x4c7   :  { %v2980_v4 = vrot.slane %v2876_v3, 4 }
 0x4c8   :  { %vm2972_vm15 = vcmp.eq.f32.partialorder %v2971_v49, 8.507059e+37 }
 0x4c9   :  { %v5163_v48 = vpop.eup %5162  ;;  %v2984_v18 = vadd.f32 %v2980_v4, %v7567_v17 }
 0x4ca   :  { %v6574_v26 = vadd.f32 1.0, %v5163_v48  ;;  %v2836_v25 = vpop.f32.mrf.mxu2 }
 0x4cb   :  { %v4839_v55 = vmul.f32 -1.442695, %v2984_v18  ;;  %v2850_v39 = vadd.f32 %v2849_v51, %v2836_v25 }
 0x4cc   :  { %v5165_v54 = vpop.eup %5164  ;;  %5166 = vrcp.f32 %v6574_v26  ;;  %v2851_v27 = vpop.f32.mrf.mxu3  ;;  %vm2952_vm2 = vweird.f32 %v6574_v26 }
 0x4cd   :  { %v2864_v56 = vpop.f32.mrf.mxu0  ;;  %5168 = vpow2.f32 %v4839_v55  ;;  %v2979_v0 = vrot.slane %v2850_v39, 4  ;;  %v2963_v40 = vmul.f32 %v5165_v54, %v2946_v5  ;;  %vm2968_vm12 = vweird.f32 %v5165_v54 }
 0x4ce   :  { %v2927_v35 = vpop.f32.mrf.mxu1  ;;  %v2973_v39 = vand.u32 2147483648, %v2946_v5  ;;  %vm2969_vm14 = vmor %vm2967_vm13, %vm2968_vm12 }
 0x4cf   :  { %v2983_v34 = vadd.f32 %v2979_v0, %v7568_v36  ;;  %v2964_v3 = vsub.f32 1.0, %v2963_v40 }
 0x4d1   :  { %v4838_v7 = vmul.f32 -1.442695, %v2983_v34  ;;  %v2965_v24 = vmul.f32 %v5165_v54, %v2964_v3  ;;  %v2974_v3 = vor.u32 1.1754944e-38, %v2973_v39 }
 0x4d2   :  { %v5167_v4 = vpop.eup %5166  ;;  %v2838_v48 = vpop.f32.mrf.mxu2 }
 0x4d3   :  { %v5169_v17 = vpop.eup %5168  ;;  %5170 = vpow2.f32 %v4838_v7  ;;  %v2966_v18 = vadd.f32 %v5165_v54, %v2965_v24  ;;  %v2948_v51 = vmul.f32 %v5167_v4, %v6574_v26  ;;  %vm2953_vm1 = vweird.f32 %v5167_v4 }
 0x4d4   :  { %v6579_v25 = vadd.f32 1.0, %v5169_v17  ;;  %v2901_v27 = vpop.f32.mrf.mxu3  ;;  %vm2954_vm4 = vmor %vm2952_vm2, %vm2953_vm1 }
 0x4d5   :  { %v2914_v55 = vpop.f32.mrf.mxu0  ;;  %v2949_v0 = vsub.f32 1.0, %v2948_v51  ;;  %v2970_v34 = vsel %vm2969_vm14, %v5165_v54, %v2966_v18  ;;  %v2958_v51 = vand.u32 2147483648, %v6574_v26  ;;  %v2956_v54 = vand.u32 2147483647, %v6574_v26 }
 0x4d6   :  { %v2928_v56 = vadd.f32 %v2927_v35, %v2914_v55  ;;  %5172 = vrcp.f32 %v6579_v25  ;;  %v2929_v40 = vpop.f32.mrf.mxu1  ;;  %v2975_v1 = vsel %vm2972_vm15, %v2974_v3, %v2970_v34  ;;  %vm3013_vm7 = vweird.f32 %v6579_v25 }
 0x4d7   :  { %v2950_v24 = vmul.f32 %v5167_v4, %v2949_v0  ;;  %vm2957_vm5 = vcmp.eq.f32.partialorder %v2956_v54, 8.507059e+37 }
 0x4d8   :  { %v3024_v7 = vadd.f32 %v2928_v56, %v7499_v12 }
 0x4d9   :  { %v5171_v48 = vpop.eup %5170  ;;  %v2951_v13 = vadd.f32 %v5167_v4, %v2950_v24 }
 0x4da   :  { %v3028_v17 = vrot.slane %v3024_v7, 4  ;;  %v2991_v36 = vadd.f32 1.0, %v5171_v48  ;;  %v2888_v52 = vpop.f32.mrf.mxu2 }
 0x4db   :  { %v2902_v5 = vadd.f32 %v2901_v27, %v2888_v52  ;;  %v2955_v0 = vsel %vm2954_vm4, %v5167_v4, %v2951_v13  ;;  %v2959_v52 = vor.u32 1.1754944e-38, %v2958_v51  ;;  %v3019_v13 = vand.u32 2147483648, %v6579_v25 }
 0x4dc   :  { %v3032_v35 = vmul.f32 %v3028_v17, %v2975_v1  ;;  %v5173_v55 = vpop.eup %5172  ;;  %5174 = vrcp.f32 %v2991_v36  ;;  %v2903_v18 = vpop.f32.mrf.mxu3  ;;  %vm2998_vm13 = vweird.f32 %v2991_v36 }
 0x4dd   :  { %v2916_v39 = vpop.f32.mrf.mxu0  ;;  %v3009_v49 = vmul.f32 %v5173_v55, %v6579_v25  ;;  %v3023_v40 = vadd.f32 %v2902_v5, %v6037_v50  ;;  %v2960_v7 = vsel %vm2957_vm5, %v2959_v52, %v2955_v0  ;;  %vm3014_vm6 = vweird.f32 %v5173_v55 }
 0x4de   :  { %v3034_v56 = vadd.f32 %v3032_v35, %v5995_v2  ;;  %v3017_v5 = vand.u32 2147483647, %v6579_v25  ;;  %vm3015_vm10 = vmor %vm3013_vm7, %vm3014_vm6 }
 0x4df   :  { %v3010_v1 = vsub.f32 1.0, %v3009_v49  ;;  %v3027_v27 = vrot.slane %v3023_v40, 4 }
 0x4e0   :  { %5176 = vtanh.f32 %v3034_v56  ;;  %v3020_v56 = vor.u32 1.1754944e-38, %v3019_v13  ;;  %vm3018_vm11 = vcmp.eq.f32.partialorder %v3017_v5, 8.507059e+37 }
 0x4e1   :  { %v3011_v34 = vmul.f32 %v5173_v55, %v3010_v1  ;;  %v3031_v3 = vmul.f32 %v3027_v27, %v2960_v7  ;;  %v3004_v27 = vand.u32 2147483648, %v2991_v36  ;;  %v3002_v7 = vand.u32 2147483647, %v2991_v36 }
 0x4e2   :  { %v5175_v24 = vpop.eup %5174  ;;  %v2890_v26 = vpop.f32.mrf.mxu2 }
 0x4e3   :  { %v2994_v48 = vmul.f32 %v5175_v24, %v2991_v36  ;;  %v3012_v17 = vadd.f32 %v5173_v55, %v3011_v34  ;;  %v3033_v18 = vadd.f32 %v3031_v3, %v6003_v15  ;;  %vm2999_vm12 = vweird.f32 %v5175_v24 }
 0x4e4   :  { %vm3000_vm14 = vmor %vm2998_vm13, %vm2999_vm12  ;;  %vm3003_vm15 = vcmp.eq.f32.partialorder %v3002_v7, 8.507059e+37  ;;  %v7582_v7 = vld [vmem:[#allocation25_spill] sm:$0xff] }
 0x4e5   :  { %v2995_v4 = vsub.f32 1.0, %v2994_v48  ;;  %5178 = vtanh.f32 %v3033_v18  ;;  %v3016_v39 = vsel %vm3015_vm10, %v5173_v55, %v3012_v17  ;;  %v3005_v48 = vor.u32 1.1754944e-38, %v3004_v27  ;;  %v7580_v27 = vld [vmem:[#allocation30_spill] sm:$0xff] }
 0x4e6   :  { %v5177_v35 = vpop.eup %5176  ;;  %v3021_v1 = vsel %vm3018_vm11, %v3020_v56, %v3016_v39  ;;  %v7573_v39 = vld [vmem:[#allocation105_spill] sm:$0xff]  ;;  %v7575_v56 = vld [vmem:[#allocation20_spill] sm:$0xff] }
 0x4e7   :  { %v3040_v51 = vrot.slane %v5177_v35, 1  ;;  %v2996_v54 = vmul.f32 %v5175_v24, %v2995_v4 }
 0x4e9   :  { %v3044_v49 = vsub.f32 %v6466_v19, %v3040_v51  ;;  %v2997_v40 = vadd.f32 %v5175_v24, %v2996_v54  ;;  %v7572_v54 = vld [vmem:[#allocation104_spill] sm:$0xff]  ;;  %v7595_v19 = vld [vmem:[#allocation39_spill] sm:$0xff] }
 0x4eb   :  { %v3048_v0 = vrot.slane %v3044_v49, 7  ;;  %v5179_v52 = vpop.eup %5178  ;;  %v3001_v26 = vsel %vm3000_vm14, %v5175_v24, %v2997_v40  ;;  %v7574_v49 = vld [vmem:[#allocation19_spill] sm:$0xff]  ;;  %v7577_v40 = vld [vmem:[#allocation28_spill] sm:$0xff] }
 0x4ec   :  { %v3039_v3 = vrot.slane %v5179_v52, 1  ;;  %v3006_v13 = vsel %vm3003_vm15, %v3005_v48, %v3001_v26  ;;  %v7584_v26 = vld [vmem:[#allocation34_spill] sm:$0xff]  ;;  %v7586_v48 = vld [vmem:[#allocation29_spill] sm:$0xff] }
 0x4ed   :  { %v3052_v34 = vmul.f32 %v3048_v0, %v3021_v1  ;;  %v7576_v0 = vld [vmem:[#allocation26_spill] sm:$0xff]  ;;  %v7578_v1 = vld [vmem:[#allocation21_spill] sm:$0xff] }
 0x4ee   :  { %v3043_v55 = vsub.f32 %v6471_v41, %v3039_v3  ;;  %v7583_v3 = vld [vmem:[#allocation27_spill] sm:$0xff]  ;;  %v7594_v41 = vld [vmem:[#allocation37_spill] sm:$0xff] }
 0x4ef   :  { %v6594_v25 = vadd.f32 %v5177_v35, %v3052_v34  ;;  %v7571_v35 = vld [vmem:[#allocation24_spill] sm:$0xff] }
 0x4f0   :  { %v3047_v18 = vrot.slane %v3043_v55, 7  ;;  %v7581_v34 = vld [vmem:[#allocation32_spill] sm:$0xff] }
 0x4f1   :  { %7569 = vst [vmem:[#allocation88_spill] sm:$0xff] %v6594_v25  ;;  %v3056_v17 = vpack.c.bf16 %v6594_v25, %v6594_v25  ;;  %v7585_v55 = vld [vmem:[#allocation36_spill] sm:$0xff] }
 0x4f2   :  { %v3051_v5 = vmul.f32 %v3047_v18, %v3006_v13  ;;  %v7588_v18 = vld [vmem:[#allocation38_spill] sm:$0xff]  ;;  %v7589_v13 = vld [vmem:[#allocation40_spill] sm:$0xff] }
 0x4f3   :  { %v3060_v4 = vrot.slane %v3056_v17, 2  ;;  %v7587_v17 = vld [vmem:[#allocation31_spill] sm:$0xff] }
 0x4f4   :  { %v6599_v51 = vadd.f32 %v5179_v52, %v3051_v5  ;;  %v7579_v52 = vld [vmem:[#allocation23_spill] sm:$0xff] }
 0x4f5   :  { %3084 = vmatmul.bf16.vlgmr.msra.gmra.mxu3 %v3060_v4  ;;  %3110 = vmatmul.bf16.vlgmr.msrb.gmra.mxu1 %v3060_v4  ;;  %v7591_v5 = vld [vmem:[#allocation35_spill] sm:$0xff] }
 0x4f6   :  { %7570 = vst [vmem:[#allocation89_spill] sm:$0xff] %v6599_v51  ;;  %3180 = vmatpush.bf16.msra.mxu3 %v7292_v31  ;;  %3206 = vmatpush.bf16.msrb.mxu1 %v7294_v11  ;;  %v3055_v36 = vpack.c.bf16 %v6599_v51, %v6599_v51 }
 0x4f8   :  { %v3059_v24 = vrot.slane %v3055_v36, 2  ;;  %v7592_v36 = vld [vmem:[#allocation42_spill] sm:$0xff] }
 0x4fa   :  { %3181 = vmatpush.bf16.msra.mxu3 %v7296_v30  ;;  %3207 = vmatpush.bf16.msrb.mxu1 %v7298_v8 }
 0x4fb   :  { %3071 = vmatmul.bf16.vlgmr.msra.gmra.mxu2 %v3059_v24  ;;  %3097 = vmatmul.bf16.vlgmr.msrb.gmra.mxu0 %v3059_v24 }
 0x4fc   :  { %3167 = vmatpush.bf16.msra.mxu2 %v7291_v10  ;;  %3193 = vmatpush.bf16.msrb.mxu0 %v7293_v22 }
 0x4fe   :  { %3182 = vmatpush.bf16.msra.mxu3 %v7300_v37  ;;  %3208 = vmatpush.bf16.msrb.mxu1 %v7302_v60 }
 0x500   :  { %3168 = vmatpush.bf16.msra.mxu2 %v7295_v16  ;;  %3194 = vmatpush.bf16.msrb.mxu0 %v7297_v20 }
 0x502   :  { %3183 = vmatpush.bf16.msra.mxu3 %v7304_v47  ;;  %3209 = vmatpush.bf16.msrb.mxu1 %v7306_v23 }
 0x504   :  { %3169 = vmatpush.bf16.msra.mxu2 %v7299_v21  ;;  %3195 = vmatpush.bf16.msrb.mxu0 %v7301_v9 }
 0x505   :  { %3136 = vmatmul.bf16.vlgmr.msrb.gmra.mxu3 %v3060_v4  ;;  %3162 = vmatmul.bf16.vlgmr.msra.gmra.mxu1 %v3060_v4 }
 0x506   :  { %3184 = vmatpush.bf16.msra.mxu3 %v7308_v6  ;;  %3210 = vmatpush.bf16.msrb.mxu1 %v7310_v63 }
 0x508   :  { %3170 = vmatpush.bf16.msra.mxu2 %v7303_v44  ;;  %3196 = vmatpush.bf16.msrb.mxu0 %v7305_v43 }
 0x50a   :  { %3185 = vmatpush.bf16.msra.mxu3 %v7312_v42  ;;  %3211 = vmatpush.bf16.msrb.mxu1 %v5901_v28 }
 0x50b   :  { %3123 = vmatmul.bf16.vlgmr.msrb.gmra.mxu2 %v3059_v24  ;;  %3149 = vmatmul.bf16.vlgmr.msra.gmra.mxu0 %v3059_v24 }
 0x50c   :  { %3171 = vmatpush.bf16.msra.mxu2 %v7307_v61  ;;  %3197 = vmatpush.bf16.msrb.mxu0 %v7309_v32 }
 0x50e   :  { %3186 = vmatpush.bf16.msra.mxu3 %v5907_v14  ;;  %3212 = vmatpush.bf16.msrb.mxu1 %v5913_v59 }
 0x510   :  { %3172 = vmatpush.bf16.msra.mxu2 %v7311_v38  ;;  %3198 = vmatpush.bf16.msrb.mxu0 %v5899_v33 }
 0x512   :  { %3187 = vmatpush.bf16.msra.mxu3 %v5919_v46  ;;  %3213 = vmatpush.bf16.msrb.mxu1 %v5925_v62 }
 0x514   :  { %3173 = vmatpush.bf16.msra.mxu2 %v5905_v58  ;;  %3199 = vmatpush.bf16.msrb.mxu0 %v5911_v45 }
 0x515   :  { %3188 = vmatmul.bf16.vlgmr.msra.gmra.mxu3 %v3060_v4  ;;  %3214 = vmatmul.bf16.vlgmr.msrb.gmra.mxu1 %v3060_v4  ;;  %v7590_v4 = vld [vmem:[#allocation33_spill] sm:$0xff] }
 0x516   :  { %3368 = vmatpush.bf16.msrb.mxu3 %v5625_v53  ;;  %3394 = vmatpush.bf16.msra.mxu1 %v5629_v57 }
 0x518   :  { %3174 = vmatpush.bf16.msra.mxu2 %v7572_v54  ;;  %3200 = vmatpush.bf16.msrb.mxu0 %v7573_v39 }
 0x51a   :  { %3369 = vmatpush.bf16.msrb.mxu3 %v7363_v29  ;;  %3395 = vmatpush.bf16.msra.mxu1 %v7571_v35 }
 0x51b   :  { %3175 = vmatmul.bf16.vlgmr.msra.gmra.mxu2 %v3059_v24  ;;  %3201 = vmatmul.bf16.vlgmr.msrb.gmra.mxu0 %v3059_v24  ;;  %v7593_v24 = vld [vmem:[#allocation44_spill] sm:$0xff] }
 0x51c   :  { %3355 = vmatpush.bf16.msrb.mxu2 %v7574_v49  ;;  %3381 = vmatpush.bf16.msra.mxu0 %v7575_v56 }
 0x51e   :  { %3370 = vmatpush.bf16.msrb.mxu3 %v7576_v0  ;;  %3396 = vmatpush.bf16.msra.mxu1 %v7577_v40 }
 0x520   :  { %3356 = vmatpush.bf16.msrb.mxu2 %v7578_v1  ;;  %3382 = vmatpush.bf16.msra.mxu0 %v7579_v52  ;;  %v7635_v1 = vld [vmem:[#allocation107_spill] sm:$0xff] }
 0x522   :  { %3371 = vmatpush.bf16.msrb.mxu3 %v7580_v27  ;;  %3397 = vmatpush.bf16.msra.mxu1 %v7581_v34 }
 0x524   :  { %3357 = vmatpush.bf16.msrb.mxu2 %v7582_v7  ;;  %3383 = vmatpush.bf16.msra.mxu0 %v7583_v3  ;;  %v7634_v7 = vld [vmem:[#allocation106_spill] sm:$0xff] }
 0x526   :  { %3372 = vmatpush.bf16.msrb.mxu3 %v7584_v26  ;;  %3398 = vmatpush.bf16.msra.mxu1 %v7585_v55  ;;  %v7596_v55 = vld [vmem:[#allocation47_spill] sm:$0xff] }
 0x528   :  { %3358 = vmatpush.bf16.msrb.mxu2 %v7586_v48  ;;  %3384 = vmatpush.bf16.msra.mxu0 %v7587_v17  ;;  %v7597_v48 = vld [vmem:[#allocation49_spill] sm:$0xff]  ;;  %v7598_v17 = vld [vmem:[#allocation51_spill] sm:$0xff] }
 0x52a   :  { %3373 = vmatpush.bf16.msrb.mxu3 %v7588_v18  ;;  %3399 = vmatpush.bf16.msra.mxu1 %v7589_v13  ;;  %v7599_v18 = vld [vmem:[#allocation53_spill] sm:$0xff] }
 0x52b   :  { %v7600_v13 = vld [vmem:[#allocation41_spill] sm:$0xff] }
 0x52c   :  { %3359 = vmatpush.bf16.msrb.mxu2 %v7590_v4  ;;  %3385 = vmatpush.bf16.msra.mxu0 %v7591_v5  ;;  %v7601_v4 = vld [vmem:[#allocation43_spill] sm:$0xff] }
 0x52d   :  { %v7602_v5 = vld [vmem:[#allocation55_spill] sm:$0xff] }
 0x52e   :  { %3374 = vmatpush.bf16.msrb.mxu3 %v7592_v36  ;;  %3400 = vmatpush.bf16.msra.mxu1 %v7593_v24  ;;  %v7603_v36 = vld [vmem:[#allocation57_spill] sm:$0xff]  ;;  %v7604_v24 = vld [vmem:[#allocation46_spill] sm:$0xff] }
 0x530   :  { %3360 = vmatpush.bf16.msrb.mxu2 %v7594_v41  ;;  %3386 = vmatpush.bf16.msra.mxu0 %v7595_v19  ;;  %v7605_v41 = vld [vmem:[#allocation48_spill] sm:$0xff]  ;;  %v7606_v19 = vld [vmem:[#allocation50_spill] sm:$0xff] }
 0x532   :  { %3375 = vmatpush.bf16.msrb.mxu3 %v7596_v55  ;;  %3401 = vmatpush.bf16.msra.mxu1 %v7597_v48  ;;  %v7607_v55 = vld [vmem:[#allocation52_spill] sm:$0xff]  ;;  %v7608_v48 = vld [vmem:[#allocation59_spill] sm:$0xff] }
 0x534   :  { %3361 = vmatpush.bf16.msrb.mxu2 %v7600_v13  ;;  %3387 = vmatpush.bf16.msra.mxu0 %v7601_v4  ;;  %v7611_v13 = vld [vmem:[#allocation56_spill] sm:$0xff]  ;;  %v7612_v4 = vld [vmem:[#allocation63_spill] sm:$0xff] }
 0x536   :  { %3420 = vmatpush.bf16.msra.mxu3 %v7598_v17  ;;  %3446 = vmatpush.bf16.msrb.mxu1 %v7599_v18  ;;  %v7609_v17 = vld [vmem:[#allocation61_spill] sm:$0xff]  ;;  %v7610_v18 = vld [vmem:[#allocation54_spill] sm:$0xff] }
 0x538   :  { %3362 = vmatpush.bf16.msrb.mxu2 %v7604_v24  ;;  %3388 = vmatpush.bf16.msra.mxu0 %v7605_v41  ;;  %v7615_v24 = vld [vmem:[#allocation60_spill] sm:$0xff]  ;;  %v7616_v41 = vld [vmem:[#allocation67_spill] sm:$0xff] }
 0x53a   :  { %3421 = vmatpush.bf16.msra.mxu3 %v7602_v5  ;;  %3447 = vmatpush.bf16.msrb.mxu1 %v7603_v36  ;;  %v7613_v5 = vld [vmem:[#allocation65_spill] sm:$0xff]  ;;  %v7614_v36 = vld [vmem:[#allocation58_spill] sm:$0xff] }
 0x53c   :  { %3407 = vmatpush.bf16.msra.mxu2 %v7606_v19  ;;  %3433 = vmatpush.bf16.msrb.mxu0 %v7607_v55  ;;  %v7617_v19 = vld [vmem:[#allocation69_spill] sm:$0xff]  ;;  %v7618_v55 = vld [vmem:[#allocation62_spill] sm:$0xff] }
 0x53e   :  { %3422 = vmatpush.bf16.msra.mxu3 %v7608_v48  ;;  %3448 = vmatpush.bf16.msrb.mxu1 %v7609_v17  ;;  %v7619_v48 = vld [vmem:[#allocation64_spill] sm:$0xff]  ;;  %v7620_v17 = vld [vmem:[#allocation71_spill] sm:$0xff] }
 0x540   :  { %3408 = vmatpush.bf16.msra.mxu2 %v7610_v18  ;;  %3434 = vmatpush.bf16.msrb.mxu0 %v7611_v13  ;;  %v7621_v18 = vld [vmem:[#allocation73_spill] sm:$0xff]  ;;  %v7622_v13 = vld [vmem:[#allocation66_spill] sm:$0xff] }
 0x542   :  { %3423 = vmatpush.bf16.msra.mxu3 %v7612_v4  ;;  %3449 = vmatpush.bf16.msrb.mxu1 %v7613_v5  ;;  %v7623_v4 = vld [vmem:[#allocation68_spill] sm:$0xff]  ;;  %v7624_v5 = vld [vmem:[#allocation75_spill] sm:$0xff] }
 0x544   :  { %3409 = vmatpush.bf16.msra.mxu2 %v7614_v36  ;;  %3435 = vmatpush.bf16.msrb.mxu0 %v7615_v24  ;;  %v7625_v36 = vld [vmem:[#allocation77_spill] sm:$0xff]  ;;  %v7626_v24 = vld [vmem:[#allocation70_spill] sm:$0xff] }
 0x546   :  { %3424 = vmatpush.bf16.msra.mxu3 %v7616_v41  ;;  %3450 = vmatpush.bf16.msrb.mxu1 %v7617_v19  ;;  %v7627_v41 = vld [vmem:[#allocation72_spill] sm:$0xff]  ;;  %v7628_v19 = vld [vmem:[#allocation79_spill] sm:$0xff] }
 0x548   :  { %3410 = vmatpush.bf16.msra.mxu2 %v7618_v55  ;;  %3436 = vmatpush.bf16.msrb.mxu0 %v7619_v48  ;;  %v7629_v55 = vld [vmem:[#allocation81_spill] sm:$0xff]  ;;  %v7630_v48 = vld [vmem:[#allocation74_spill] sm:$0xff] }
 0x54a   :  { %3425 = vmatpush.bf16.msra.mxu3 %v7620_v17  ;;  %3451 = vmatpush.bf16.msrb.mxu1 %v7621_v18  ;;  %v7631_v17 = vld [vmem:[#allocation76_spill] sm:$0xff]  ;;  %v7632_v18 = vld [vmem:[#allocation78_spill] sm:$0xff] }
 0x54c   :  { %3411 = vmatpush.bf16.msra.mxu2 %v7622_v13  ;;  %3437 = vmatpush.bf16.msrb.mxu0 %v7623_v4  ;;  %v7633_v13 = vld [vmem:[#allocation80_spill] sm:$0xff] }
 0x54e   :  { %3426 = vmatpush.bf16.msra.mxu3 %v7624_v5  ;;  %3452 = vmatpush.bf16.msrb.mxu1 %v7625_v36 }
 0x550   :  { %3412 = vmatpush.bf16.msra.mxu2 %v7626_v24  ;;  %3438 = vmatpush.bf16.msrb.mxu0 %v7627_v41 }
 0x552   :  { %3427 = vmatpush.bf16.msra.mxu3 %v7628_v19  ;;  %3453 = vmatpush.bf16.msrb.mxu1 %v7629_v55 }
 0x554   :  { %3413 = vmatpush.bf16.msra.mxu2 %v7630_v48  ;;  %3439 = vmatpush.bf16.msrb.mxu0 %v7631_v17 }
 0x558   :  { %3414 = vmatpush.bf16.msra.mxu2 %v7632_v18  ;;  %3440 = vmatpush.bf16.msrb.mxu0 %v7633_v13 }
 0x572   :  { %v3111_v4 = vpop.f32.mrf.mxu1 }
 0x578   :  { %v3085_v5 = vpop.f32.mrf.mxu3  ;;  %v3098_v26 = vpop.f32.mrf.mxu0 }
 0x579   :  { %v3112_v36 = vadd.f32 %v3111_v4, %v3098_v26 }
 0x57a   :  { %v3113_v3 = vpop.f32.mrf.mxu1 }
 0x57b   :  { %v3222_v24 = vrot.slane %v3112_v36, 3 }
 0x57d   :  { %v3226_v41 = vadd.f32 %v3222_v24, %v7634_v7 }
 0x57e   :  { %v3072_v34 = vpop.f32.mrf.mxu2 }
 0x57f   :  { %v4841_v19 = vmul.f32 -1.442695, %v3226_v41  ;;  %v3086_v27 = vadd.f32 %v3085_v5, %v3072_v34  ;;  %v7636_v34 = vld [vmem:[#allocation108_spill] sm:$0xff] }
 0x580   :  { %v3087_v55 = vpop.f32.mrf.mxu3  ;;  %v3100_v52 = vpop.f32.mrf.mxu0 }
 0x581   :  { %5180 = vpow2.f32 %v4841_v19  ;;  %v3221_v48 = vrot.slane %v3086_v27, 3 }
 0x582   :  { %v3163_v17 = vpop.f32.mrf.mxu1 }
 0x583   :  { %v3225_v18 = vadd.f32 %v3221_v48, %v7635_v1 }
 0x585   :  { %v4840_v40 = vmul.f32 -1.442695, %v3225_v18 }
 0x586   :  { %v3074_v13 = vpop.f32.mrf.mxu2 }
 0x587   :  { %v5181_v0 = vpop.eup %5180  ;;  %5182 = vpow2.f32 %v4840_v40 }
 0x588   :  { %v3234_v56 = vadd.f32 1.0, %v5181_v0  ;;  %v3137_v26 = vpop.f32.mrf.mxu3  ;;  %v3150_v3 = vpop.f32.mrf.mxu0 }
 0x589   :  { %v3164_v4 = vadd.f32 %v3163_v17, %v3150_v3  ;;  %v7637_v3 = vld [vmem:[#allocation109_spill] sm:$0xff] }
 0x58a   :  { %5184 = vrcp.f32 %v3234_v56  ;;  %v3165_v36 = vpop.f32.mrf.mxu1  ;;  %vm3255_vm2 = vweird.f32 %v3234_v56  ;;  %v3259_v49 = vand.u32 2147483647, %v3234_v56 }
 0x58b   :  { %v3268_v24 = vrot.slane %v3164_v4, 3 }
 0x58c   :  { %vm3260_vm5 = vcmp.eq.f32.partialorder %v3259_v49, 8.507059e+37 }
 0x58d   :  { %v5183_v41 = vpop.eup %5182  ;;  %v3272_v55 = vadd.f32 %v3268_v24, %v7636_v34 }
 0x58e   :  { %v6702_v52 = vadd.f32 1.0, %v5183_v41  ;;  %v3124_v19 = vpop.f32.mrf.mxu2 }
 0x58f   :  { %v4843_v27 = vmul.f32 -1.442695, %v3272_v55  ;;  %v3138_v5 = vadd.f32 %v3137_v26, %v3124_v19 }
 0x590   :  { %v5185_v48 = vpop.eup %5184  ;;  %5186 = vrcp.f32 %v6702_v52  ;;  %v3139_v18 = vpop.f32.mrf.mxu3  ;;  %vm3240_vm7 = vweird.f32 %v6702_v52 }
 0x591   :  { %v3152_v40 = vpop.f32.mrf.mxu0  ;;  %5188 = vpow2.f32 %v4843_v27  ;;  %v3267_v0 = vrot.slane %v3138_v5, 3  ;;  %v3251_v13 = vmul.f32 %v5185_v48, %v3234_v56  ;;  %vm3256_vm1 = vweird.f32 %v5185_v48 }
 0x592   :  { %v3215_v17 = vpop.f32.mrf.mxu1  ;;  %v3261_v5 = vand.u32 2147483648, %v3234_v56  ;;  %vm3257_vm4 = vmor %vm3255_vm2, %vm3256_vm1 }
 0x593   :  { %v3271_v36 = vadd.f32 %v3267_v0, %v7637_v3  ;;  %v3252_v4 = vsub.f32 1.0, %v3251_v13 }
 0x595   :  { %v4842_v1 = vmul.f32 -1.442695, %v3271_v36  ;;  %v3253_v7 = vmul.f32 %v5185_v48, %v3252_v4  ;;  %v3262_v4 = vor.u32 1.1754944e-38, %v3261_v5 }
 0x596   :  { %v5187_v24 = vpop.eup %5186  ;;  %v3126_v41 = vpop.f32.mrf.mxu2 }
 0x597   :  { %v5189_v34 = vpop.eup %5188  ;;  %5190 = vpow2.f32 %v4842_v1  ;;  %v3254_v55 = vadd.f32 %v5185_v48, %v3253_v7  ;;  %v3236_v26 = vmul.f32 %v5187_v24, %v6702_v52  ;;  %vm3241_vm6 = vweird.f32 %v5187_v24 }
 0x598   :  { %v6707_v19 = vadd.f32 1.0, %v5189_v34  ;;  %v3189_v18 = vpop.f32.mrf.mxu3  ;;  %vm3242_vm10 = vmor %vm3240_vm7, %vm3241_vm6 }
 0x599   :  { %v3202_v27 = vpop.f32.mrf.mxu0  ;;  %v3237_v0 = vsub.f32 1.0, %v3236_v26  ;;  %v3258_v36 = vsel %vm3257_vm4, %v5185_v48, %v3254_v55  ;;  %v3246_v26 = vand.u32 2147483648, %v6702_v52  ;;  %v3244_v48 = vand.u32 2147483647, %v6702_v52 }
 0x59a   :  { %v3216_v40 = vadd.f32 %v3215_v17, %v3202_v27  ;;  %5192 = vrcp.f32 %v6707_v19  ;;  %v3217_v13 = vpop.f32.mrf.mxu1  ;;  %v3263_v39 = vsel %vm3260_vm5, %v3262_v4, %v3258_v36  ;;  %vm3301_vm13 = vweird.f32 %v6707_v19 }
 0x59b   :  { %v3238_v7 = vmul.f32 %v5187_v24, %v3237_v0  ;;  %vm3245_vm11 = vcmp.eq.f32.partialorder %v3244_v48, 8.507059e+37 }
 0x59c   :  { %v3312_v1 = vadd.f32 %v3216_v40, %v7499_v12 }
 0x59d   :  { %v5191_v41 = vpop.eup %5190  ;;  %v3239_v35 = vadd.f32 %v5187_v24, %v3238_v7 }
 0x59e   :  { %v3316_v34 = vrot.slane %v3312_v1, 3  ;;  %v3279_v3 = vadd.f32 1.0, %v5191_v41  ;;  %v3176_v54 = vpop.f32.mrf.mxu2 }
 0x59f   :  { %v3190_v56 = vadd.f32 %v3189_v18, %v3176_v54  ;;  %v3243_v0 = vsel %vm3242_vm10, %v5187_v24, %v3239_v35  ;;  %v3247_v54 = vor.u32 1.1754944e-38, %v3246_v26  ;;  %v3307_v35 = vand.u32 2147483648, %v6707_v19 }
 0x5a0   :  { %v3320_v17 = vmul.f32 %v3316_v34, %v3263_v39  ;;  %v5193_v27 = vpop.eup %5192  ;;  %5194 = vrcp.f32 %v3279_v3  ;;  %v3191_v55 = vpop.f32.mrf.mxu3  ;;  %vm3286_vm2 = vweird.f32 %v3279_v3 }
 0x5a1   :  { %v3204_v5 = vpop.f32.mrf.mxu0  ;;  %v3297_v49 = vmul.f32 %v5193_v27, %v6707_v19  ;;  %v3311_v13 = vadd.f32 %v3190_v56, %v6037_v50  ;;  %v3248_v1 = vsel %vm3245_vm11, %v3247_v54, %v3243_v0  ;;  %vm3302_vm12 = vweird.f32 %v5193_v27 }
 0x5a2   :  { %v3322_v40 = vadd.f32 %v3320_v17, %v5995_v2  ;;  %v3305_v56 = vand.u32 2147483647, %v6707_v19  ;;  %vm3303_vm14 = vmor %vm3301_vm13, %vm3302_vm12 }
 0x5a3   :  { %v3298_v39 = vsub.f32 1.0, %v3297_v49  ;;  %v3315_v18 = vrot.slane %v3311_v13, 3 }
 0x5a4   :  { %5196 = vtanh.f32 %v3322_v40  ;;  %v3308_v40 = vor.u32 1.1754944e-38, %v3307_v35  ;;  %vm3306_vm15 = vcmp.eq.f32.partialorder %v3305_v56, 8.507059e+37 }
 0x5a5   :  { %v3299_v36 = vmul.f32 %v5193_v27, %v3298_v39  ;;  %v3319_v4 = vmul.f32 %v3315_v18, %v3248_v1  ;;  %v3292_v18 = vand.u32 2147483648, %v3279_v3  ;;  %v3290_v1 = vand.u32 2147483647, %v3279_v3 }
 0x5a6   :  { %v5195_v7 = vpop.eup %5194  ;;  %v3178_v52 = vpop.f32.mrf.mxu2 }
 0x5a7   :  { %v3282_v41 = vmul.f32 %v5195_v7, %v3279_v3  ;;  %v3300_v34 = vadd.f32 %v5193_v27, %v3299_v36  ;;  %v3321_v55 = vadd.f32 %v3319_v4, %v6003_v15  ;;  %vm3287_vm1 = vweird.f32 %v5195_v7 }
 0x5a8   :  { %vm3288_vm4 = vmor %vm3286_vm2, %vm3287_vm1  ;;  %vm3291_vm5 = vcmp.eq.f32.partialorder %v3290_v1, 8.507059e+37  ;;  %v7650_v1 = vld [vmem:[#allocation27_spill] sm:$0xff] }
 0x5a9   :  { %v3283_v24 = vsub.f32 1.0, %v3282_v41  ;;  %5198 = vtanh.f32 %v3321_v55  ;;  %v3304_v5 = vsel %vm3303_vm14, %v5193_v27, %v3300_v34  ;;  %v3293_v41 = vor.u32 1.1754944e-38, %v3292_v18  ;;  %v7648_v18 = vld [vmem:[#allocation32_spill] sm:$0xff] }
 0x5aa   :  { %v5197_v17 = vpop.eup %5196  ;;  %v3309_v39 = vsel %vm3306_vm15, %v3308_v40, %v3304_v5  ;;  %v7638_v5 = vld [vmem:[#allocation24_spill] sm:$0xff]  ;;  %v7640_v40 = vld [vmem:[#allocation105_spill] sm:$0xff] }
 0x5ab   :  { %v3328_v26 = vrot.slane %v5197_v17, 1  ;;  %v3284_v48 = vmul.f32 %v5195_v7, %v3283_v24 }
 0x5ad   :  { %v3332_v49 = vsub.f32 %v6594_v25, %v3328_v26  ;;  %v3285_v13 = vadd.f32 %v5195_v7, %v3284_v48 }
 0x5af   :  { %v3336_v0 = vrot.slane %v3332_v49, 7  ;;  %v5199_v54 = vpop.eup %5198  ;;  %v3289_v52 = vsel %vm3288_vm4, %v5195_v7, %v3285_v13  ;;  %v7639_v49 = vld [vmem:[#allocation104_spill] sm:$0xff] }
 0x5b0   :  { %v3327_v4 = vrot.slane %v5199_v54, 1  ;;  %v3294_v35 = vsel %vm3291_vm5, %v3293_v41, %v3289_v52  ;;  %v7642_v13 = vld [vmem:[#allocation20_spill] sm:$0xff]  ;;  %v7654_v41 = vld [vmem:[#allocation31_spill] sm:$0xff] }
 0x5b1   :  { %v3340_v36 = vmul.f32 %v3336_v0, %v3309_v39  ;;  %v7641_v0 = vld [vmem:[#allocation19_spill] sm:$0xff]  ;;  %v7645_v39 = vld [vmem:[#allocation21_spill] sm:$0xff]  ;;  %v7652_v52 = vld [vmem:[#allocation36_spill] sm:$0xff] }
 0x5b2   :  { %v3331_v27 = vsub.f32 %v6599_v51, %v3327_v4  ;;  %v7651_v4 = vld [vmem:[#allocation34_spill] sm:$0xff] }
 0x5b3   :  { %v6722_v19 = vadd.f32 %v5197_v17, %v3340_v36  ;;  %v7649_v36 = vld [vmem:[#allocation25_spill] sm:$0xff] }
 0x5b4   :  { %v3335_v55 = vrot.slane %v3331_v27, 7  ;;  %v7653_v27 = vld [vmem:[#allocation29_spill] sm:$0xff] }
 0x5b5   :  { %v3344_v34 = vpack.c.bf16 %v6722_v19, %v6722_v19 }
 0x5b6   :  { %v3339_v56 = vmul.f32 %v3335_v55, %v3294_v35  ;;  %v7656_v55 = vld [vmem:[#allocation40_spill] sm:$0xff]  ;;  %v7657_v35 = vld [vmem:[#allocation33_spill] sm:$0xff] }
 0x5b7   :  { %v3350_v24 = vshrl.u32 %v3344_v34, 16  ;;  %v7655_v34 = vld [vmem:[#allocation38_spill] sm:$0xff] }
 0x5b8   :  { %v6727_v48 = vadd.f32 %v5199_v54, %v3339_v56  ;;  %v7646_v54 = vld [vmem:[#allocation23_spill] sm:$0xff]  ;;  %v7659_v56 = vld [vmem:[#allocation42_spill] sm:$0xff] }
 0x5b9   :  { %v3352_v26 = vrot.slane %v3350_v24, 2  ;;  %v7658_v24 = vld [vmem:[#allocation35_spill] sm:$0xff] }
 0x5ba   :  { %v3343_v3 = vpack.c.bf16 %v6727_v48, %v6727_v48 }
 0x5bb   :  { %3376 = vmatmul.bf16.vlgmr.msrb.gmra.mxu3 %v3352_v26  ;;  %3402 = vmatmul.bf16.vlgmr.msra.gmra.mxu1 %v3352_v26 }
 0x5bc   :  { %3472 = vmatpush.bf16.msrb.mxu3 %v7292_v31  ;;  %3498 = vmatpush.bf16.msra.mxu1 %v7294_v11  ;;  %v3346_v7 = vshrl.u32 %v3343_v3, 16  ;;  %v7661_v3 = vld [vmem:[#allocation37_spill] sm:$0xff] }
 0x5be   :  { %v3348_v17 = vrot.slane %v3346_v7, 2  ;;  %v7662_v7 = vld [vmem:[#allocation39_spill] sm:$0xff] }
 0x5c0   :  { %3473 = vmatpush.bf16.msrb.mxu3 %v7296_v30  ;;  %3499 = vmatpush.bf16.msra.mxu1 %v7298_v8 }
 0x5c1   :  { %3363 = vmatmul.bf16.vlgmr.msrb.gmra.mxu2 %v3348_v17  ;;  %3389 = vmatmul.bf16.vlgmr.msra.gmra.mxu0 %v3348_v17 }
 0x5c2   :  { %3459 = vmatpush.bf16.msrb.mxu2 %v7291_v10  ;;  %3485 = vmatpush.bf16.msra.mxu0 %v7293_v22 }
 0x5c4   :  { %3474 = vmatpush.bf16.msrb.mxu3 %v7300_v37  ;;  %3500 = vmatpush.bf16.msra.mxu1 %v7302_v60 }
 0x5c6   :  { %3460 = vmatpush.bf16.msrb.mxu2 %v7295_v16  ;;  %3486 = vmatpush.bf16.msra.mxu0 %v7297_v20 }
 0x5c8   :  { %3475 = vmatpush.bf16.msrb.mxu3 %v7304_v47  ;;  %3501 = vmatpush.bf16.msra.mxu1 %v7306_v23 }
 0x5ca   :  { %3461 = vmatpush.bf16.msrb.mxu2 %v7299_v21  ;;  %3487 = vmatpush.bf16.msra.mxu0 %v7301_v9 }
 0x5cb   :  { %3428 = vmatmul.bf16.vlgmr.msra.gmra.mxu3 %v3352_v26  ;;  %3454 = vmatmul.bf16.vlgmr.msrb.gmra.mxu1 %v3352_v26 }
 0x5cc   :  { %3476 = vmatpush.bf16.msrb.mxu3 %v7308_v6  ;;  %3502 = vmatpush.bf16.msra.mxu1 %v7310_v63 }
 0x5ce   :  { %3462 = vmatpush.bf16.msrb.mxu2 %v7303_v44  ;;  %3488 = vmatpush.bf16.msra.mxu0 %v7305_v43 }
 0x5d0   :  { %3477 = vmatpush.bf16.msrb.mxu3 %v7312_v42  ;;  %3503 = vmatpush.bf16.msra.mxu1 %v5901_v28 }
 0x5d1   :  { %3415 = vmatmul.bf16.vlgmr.msra.gmra.mxu2 %v3348_v17  ;;  %3441 = vmatmul.bf16.vlgmr.msrb.gmra.mxu0 %v3348_v17 }
 0x5d2   :  { %3463 = vmatpush.bf16.msrb.mxu2 %v7307_v61  ;;  %3489 = vmatpush.bf16.msra.mxu0 %v7309_v32 }
 0x5d4   :  { %3478 = vmatpush.bf16.msrb.mxu3 %v5907_v14  ;;  %3504 = vmatpush.bf16.msra.mxu1 %v5913_v59 }
 0x5d6   :  { %3464 = vmatpush.bf16.msrb.mxu2 %v7311_v38  ;;  %3490 = vmatpush.bf16.msra.mxu0 %v5899_v33 }
 0x5d8   :  { %3479 = vmatpush.bf16.msrb.mxu3 %v5919_v46  ;;  %3505 = vmatpush.bf16.msra.mxu1 %v5925_v62 }
 0x5da   :  { %3465 = vmatpush.bf16.msrb.mxu2 %v5905_v58  ;;  %3491 = vmatpush.bf16.msra.mxu0 %v5911_v45 }
 0x5db   :  { %3480 = vmatmul.bf16.vlgmr.msrb.gmra.mxu3 %v3352_v26  ;;  %3506 = vmatmul.bf16.vlgmr.msra.gmra.mxu1 %v3352_v26  ;;  %v7660_v26 = vld [vmem:[#allocation44_spill] sm:$0xff] }
 0x5dc   :  { %3656 = vmatpush.bf16.msra.mxu3 %v5625_v53  ;;  %3682 = vmatpush.bf16.msrb.mxu1 %v5629_v57  ;;  %v7643_v53 = vld [vmem:[#allocation26_spill] sm:$0xff]  ;;  %v7644_v57 = vld [vmem:[#allocation28_spill] sm:$0xff] }
 0x5de   :  { %3466 = vmatpush.bf16.msrb.mxu2 %v7639_v49  ;;  %3492 = vmatpush.bf16.msra.mxu0 %v7640_v40 }
 0x5e0   :  { %3657 = vmatpush.bf16.msra.mxu3 %v7363_v29  ;;  %3683 = vmatpush.bf16.msrb.mxu1 %v7638_v5  ;;  %v7647_v29 = vld [vmem:[#allocation30_spill] sm:$0xff]  ;;  %v7664_v5 = vld [vmem:[#allocation49_spill] sm:$0xff] }
 0x5e1   :  { %3467 = vmatmul.bf16.vlgmr.msrb.gmra.mxu2 %v3348_v17  ;;  %3493 = vmatmul.bf16.vlgmr.msra.gmra.mxu0 %v3348_v17  ;;  %v7663_v17 = vld [vmem:[#allocation47_spill] sm:$0xff] }
 0x5e2   :  { %3643 = vmatpush.bf16.msra.mxu2 %v7641_v0  ;;  %3669 = vmatpush.bf16.msrb.mxu0 %v7642_v13  ;;  %v7665_v0 = vld [vmem:[#allocation51_spill] sm:$0xff]  ;;  %v7666_v13 = vld [vmem:[#allocation53_spill] sm:$0xff] }
 0x5e4   :  { %3658 = vmatpush.bf16.msra.mxu3 %v7643_v53  ;;  %3684 = vmatpush.bf16.msrb.mxu1 %v7644_v57  ;;  %v7667_v53 = vld [vmem:[#allocation41_spill] sm:$0xff]  ;;  %v7668_v57 = vld [vmem:[#allocation43_spill] sm:$0xff] }
 0x5e6   :  { %3644 = vmatpush.bf16.msra.mxu2 %v7645_v39  ;;  %3670 = vmatpush.bf16.msrb.mxu0 %v7646_v54  ;;  %v7669_v39 = vld [vmem:[#allocation55_spill] sm:$0xff]  ;;  %v7670_v54 = vld [vmem:[#allocation57_spill] sm:$0xff] }
 0x5e8   :  { %3659 = vmatpush.bf16.msra.mxu3 %v7647_v29  ;;  %3685 = vmatpush.bf16.msrb.mxu1 %v7648_v18  ;;  %v7671_v29 = vld [vmem:[#allocation46_spill] sm:$0xff]  ;;  %v7672_v18 = vld [vmem:[#allocation48_spill] sm:$0xff] }
 0x5ea   :  { %3645 = vmatpush.bf16.msra.mxu2 %v7649_v36  ;;  %3671 = vmatpush.bf16.msrb.mxu0 %v7650_v1  ;;  %v7673_v36 = vld [vmem:[#allocation50_spill] sm:$0xff]  ;;  %v7674_v1 = vld [vmem:[#allocation52_spill] sm:$0xff] }
 0x5ec   :  { %3660 = vmatpush.bf16.msra.mxu3 %v7651_v4  ;;  %3686 = vmatpush.bf16.msrb.mxu1 %v7652_v52  ;;  %v7675_v4 = vld [vmem:[#allocation59_spill] sm:$0xff]  ;;  %v7676_v52 = vld [vmem:[#allocation61_spill] sm:$0xff] }
 0x5ee   :  { %3646 = vmatpush.bf16.msra.mxu2 %v7653_v27  ;;  %3672 = vmatpush.bf16.msrb.mxu0 %v7654_v41  ;;  %v7677_v27 = vld [vmem:[#allocation54_spill] sm:$0xff]  ;;  %v7678_v41 = vld [vmem:[#allocation56_spill] sm:$0xff] }
 0x5f0   :  { %3661 = vmatpush.bf16.msra.mxu3 %v7655_v34  ;;  %3687 = vmatpush.bf16.msrb.mxu1 %v7656_v55  ;;  %v7679_v34 = vld [vmem:[#allocation63_spill] sm:$0xff]  ;;  %v7680_v55 = vld [vmem:[#allocation65_spill] sm:$0xff] }
 0x5f2   :  { %3647 = vmatpush.bf16.msra.mxu2 %v7657_v35  ;;  %3673 = vmatpush.bf16.msrb.mxu0 %v7658_v24  ;;  %v7681_v35 = vld [vmem:[#allocation58_spill] sm:$0xff]  ;;  %v7682_v24 = vld [vmem:[#allocation60_spill] sm:$0xff] }
 0x5f4   :  { %3662 = vmatpush.bf16.msra.mxu3 %v7659_v56  ;;  %3688 = vmatpush.bf16.msrb.mxu1 %v7660_v26  ;;  %v7683_v56 = vld [vmem:[#allocation67_spill] sm:$0xff]  ;;  %v7684_v26 = vld [vmem:[#allocation69_spill] sm:$0xff] }
 0x5f6   :  { %3648 = vmatpush.bf16.msra.mxu2 %v7661_v3  ;;  %3674 = vmatpush.bf16.msrb.mxu0 %v7662_v7  ;;  %v7685_v3 = vld [vmem:[#allocation62_spill] sm:$0xff]  ;;  %v7686_v7 = vld [vmem:[#allocation64_spill] sm:$0xff] }
 0x5f8   :  { %3663 = vmatpush.bf16.msra.mxu3 %v7663_v17  ;;  %3689 = vmatpush.bf16.msrb.mxu1 %v7664_v5  ;;  %v7687_v17 = vld [vmem:[#allocation71_spill] sm:$0xff]  ;;  %v7688_v5 = vld [vmem:[#allocation73_spill] sm:$0xff] }
 0x5fa   :  { %3649 = vmatpush.bf16.msra.mxu2 %v7667_v53  ;;  %3675 = vmatpush.bf16.msrb.mxu0 %v7668_v57  ;;  %v7691_v53 = vld [vmem:[#allocation75_spill] sm:$0xff]  ;;  %v7692_v57 = vld [vmem:[#allocation77_spill] sm:$0xff] }
 0x5fc   :  { %3708 = vmatpush.bf16.msrb.mxu3 %v7665_v0  ;;  %3734 = vmatpush.bf16.msra.mxu1 %v7666_v13  ;;  %v7689_v0 = vld [vmem:[#allocation66_spill] sm:$0xff]  ;;  %v7690_v13 = vld [vmem:[#allocation68_spill] sm:$0xff] }
 0x5fe   :  { %3650 = vmatpush.bf16.msra.mxu2 %v7671_v29  ;;  %3676 = vmatpush.bf16.msrb.mxu0 %v7672_v18  ;;  %v7695_v29 = vld [vmem:[#allocation79_spill] sm:$0xff]  ;;  %v7696_v18 = vld [vmem:[#allocation81_spill] sm:$0xff] }
 0x600   :  { %3709 = vmatpush.bf16.msrb.mxu3 %v7669_v39  ;;  %3735 = vmatpush.bf16.msra.mxu1 %v7670_v54  ;;  %v7693_v39 = vld [vmem:[#allocation70_spill] sm:$0xff]  ;;  %v7694_v54 = vld [vmem:[#allocation72_spill] sm:$0xff] }
 0x602   :  { %3695 = vmatpush.bf16.msrb.mxu2 %v7673_v36  ;;  %3721 = vmatpush.bf16.msra.mxu0 %v7674_v1  ;;  %v7697_v36 = vld [vmem:[#allocation74_spill] sm:$0xff]  ;;  %v7698_v1 = vld [vmem:[#allocation76_spill] sm:$0xff] }
 0x604   :  { %3710 = vmatpush.bf16.msrb.mxu3 %v7675_v4  ;;  %3736 = vmatpush.bf16.msra.mxu1 %v7676_v52  ;;  %v7699_v4 = vld [vmem:[#allocation78_spill] sm:$0xff]  ;;  %v7700_v52 = vld [vmem:[#allocation80_spill] sm:$0xff] }
 0x606   :  { %3696 = vmatpush.bf16.msrb.mxu2 %v7677_v27  ;;  %3722 = vmatpush.bf16.msra.mxu0 %v7678_v41 }
 0x608   :  { %3711 = vmatpush.bf16.msrb.mxu3 %v7679_v34  ;;  %3737 = vmatpush.bf16.msra.mxu1 %v7680_v55 }
 0x60a   :  { %3697 = vmatpush.bf16.msrb.mxu2 %v7681_v35  ;;  %3723 = vmatpush.bf16.msra.mxu0 %v7682_v24 }
 0x60c   :  { %3712 = vmatpush.bf16.msrb.mxu3 %v7683_v56  ;;  %3738 = vmatpush.bf16.msra.mxu1 %v7684_v26  ;;  %v7701_v56 = vld [vmem:[#allocation106_spill] sm:$0xff] }
 0x60e   :  { %3698 = vmatpush.bf16.msrb.mxu2 %v7685_v3  ;;  %3724 = vmatpush.bf16.msra.mxu0 %v7686_v7 }
 0x610   :  { %3713 = vmatpush.bf16.msrb.mxu3 %v7687_v17  ;;  %3739 = vmatpush.bf16.msra.mxu1 %v7688_v5 }
 0x612   :  { %3699 = vmatpush.bf16.msrb.mxu2 %v7689_v0  ;;  %3725 = vmatpush.bf16.msra.mxu0 %v7690_v13 }
 0x614   :  { %3714 = vmatpush.bf16.msrb.mxu3 %v7691_v53  ;;  %3740 = vmatpush.bf16.msra.mxu1 %v7692_v57  ;;  %v7702_v57 = vld [vmem:[#allocation107_spill] sm:$0xff] }
 0x616   :  { %3700 = vmatpush.bf16.msrb.mxu2 %v7693_v39  ;;  %3726 = vmatpush.bf16.msra.mxu0 %v7694_v54 }
 0x618   :  { %3715 = vmatpush.bf16.msrb.mxu3 %v7695_v29  ;;  %3741 = vmatpush.bf16.msra.mxu1 %v7696_v18 }
 0x61a   :  { %3701 = vmatpush.bf16.msrb.mxu2 %v7697_v36  ;;  %3727 = vmatpush.bf16.msra.mxu0 %v7698_v1 }
 0x61e   :  { %3702 = vmatpush.bf16.msrb.mxu2 %v7699_v4  ;;  %3728 = vmatpush.bf16.msra.mxu0 %v7700_v52 }
 0x638   :  { %v3403_v27 = vpop.f32.mrf.mxu1 }
 0x63e   :  { %v3377_v41 = vpop.f32.mrf.mxu3  ;;  %v3390_v34 = vpop.f32.mrf.mxu0 }
 0x63f   :  { %v3404_v55 = vadd.f32 %v3403_v27, %v3390_v34 }
 0x640   :  { %v3405_v35 = vpop.f32.mrf.mxu1 }
 0x641   :  { %v3514_v24 = vrot.slane %v3404_v55, 2 }
 0x643   :  { %v3518_v26 = vadd.f32 %v3514_v24, %v7701_v56 }
 0x644   :  { %v3364_v3 = vpop.f32.mrf.mxu2 }
 0x645   :  { %v4845_v7 = vmul.f32 -1.442695, %v3518_v26  ;;  %v3378_v17 = vadd.f32 %v3377_v41, %v3364_v3  ;;  %v7703_v41 = vld [vmem:[#allocation108_spill] sm:$0xff] }
 0x646   :  { %v3379_v5 = vpop.f32.mrf.mxu3  ;;  %v3392_v0 = vpop.f32.mrf.mxu0 }
 0x647   :  { %5200 = vpow2.f32 %v4845_v7  ;;  %v3513_v13 = vrot.slane %v3378_v17, 2 }
 0x648   :  { %v3455_v53 = vpop.f32.mrf.mxu1 }
 0x649   :  { %v3517_v39 = vadd.f32 %v3513_v13, %v7702_v57 }
 0x64b   :  { %v4844_v54 = vmul.f32 -1.442695, %v3517_v39 }
 0x64c   :  { %v3366_v29 = vpop.f32.mrf.mxu2 }
 0x64d   :  { %v5201_v18 = vpop.eup %5200  ;;  %5202 = vpow2.f32 %v4844_v54  ;;  %v7704_v54 = vld [vmem:[#allocation109_spill] sm:$0xff] }
 0x64e   :  { %v3526_v36 = vadd.f32 1.0, %v5201_v18  ;;  %v3429_v1 = vpop.f32.mrf.mxu3  ;;  %v3442_v4 = vpop.f32.mrf.mxu0 }
 0x64f   :  { %v3456_v52 = vadd.f32 %v3455_v53, %v3442_v4 }
 0x650   :  { %5204 = vrcp.f32 %v3526_v36  ;;  %v3457_v27 = vpop.f32.mrf.mxu1  ;;  %vm3547_vm7 = vweird.f32 %v3526_v36  ;;  %v3551_v51 = vand.u32 2147483647, %v3526_v36 }
 0x651   :  { %v3560_v34 = vrot.slane %v3456_v52, 2 }
 0x652   :  { %vm3552_vm11 = vcmp.eq.f32.partialorder %v3551_v51, 8.507059e+37 }
 0x653   :  { %v5203_v55 = vpop.eup %5202  ;;  %v3564_v35 = vadd.f32 %v3560_v34, %v7703_v41 }
 0x654   :  { %v6830_v24 = vadd.f32 1.0, %v5203_v55  ;;  %v3416_v26 = vpop.f32.mrf.mxu2 }
 0x655   :  { %v4847_v3 = vmul.f32 -1.442695, %v3564_v35  ;;  %v3430_v7 = vadd.f32 %v3429_v1, %v3416_v26 }
 0x656   :  { %v5205_v17 = vpop.eup %5204  ;;  %5206 = vrcp.f32 %v6830_v24  ;;  %v3431_v5 = vpop.f32.mrf.mxu3  ;;  %vm3532_vm13 = vweird.f32 %v6830_v24 }
 0x657   :  { %v3444_v0 = vpop.f32.mrf.mxu0  ;;  %5208 = vpow2.f32 %v4847_v3  ;;  %v3559_v13 = vrot.slane %v3430_v7, 2  ;;  %v3543_v39 = vmul.f32 %v5205_v17, %v3526_v36  ;;  %vm3548_vm6 = vweird.f32 %v5205_v17 }
 0x658   :  { %v3507_v53 = vpop.f32.mrf.mxu1  ;;  %v3553_v7 = vand.u32 2147483648, %v3526_v36  ;;  %vm3549_vm10 = vmor %vm3547_vm7, %vm3548_vm6 }
 0x659   :  { %v3563_v29 = vadd.f32 %v3559_v13, %v7704_v54  ;;  %v3544_v18 = vsub.f32 1.0, %v3543_v39 }
 0x65b   :  { %v4846_v4 = vmul.f32 -1.442695, %v3563_v29  ;;  %v3545_v52 = vmul.f32 %v5205_v17, %v3544_v18 }
 0x65c   :  { %v5207_v27 = vpop.eup %5206  ;;  %v3418_v34 = vpop.f32.mrf.mxu2 }
 0x65d   :  { %v5209_v55 = vpop.eup %5208  ;;  %5210 = vpow2.f32 %v4846_v4  ;;  %v3546_v35 = vadd.f32 %v5205_v17, %v3545_v52  ;;  %v3528_v1 = vmul.f32 %v5207_v27, %v6830_v24  ;;  %v3554_v52 = vor.u32 1.1754944e-38, %v3553_v7 }
 0x65e   :  { %v6835_v26 = vadd.f32 1.0, %v5209_v55  ;;  %v3481_v5 = vpop.f32.mrf.mxu3  ;;  %vm3533_vm12 = vweird.f32 %v5207_v27 }
 0x65f   :  { %v3494_v3 = vpop.f32.mrf.mxu0  ;;  %v3529_v13 = vsub.f32 1.0, %v3528_v1  ;;  %v3550_v29 = vsel %vm3549_vm10, %v5205_v17, %v3546_v35  ;;  %v3538_v1 = vand.u32 2147483648, %v6830_v24  ;;  %v3536_v17 = vand.u32 2147483647, %v6830_v24  ;;  %vm3534_vm14 = vmor %vm3532_vm13, %vm3533_vm12 }
 0x660   :  { %v3508_v0 = vadd.f32 %v3507_v53, %v3494_v3  ;;  %5212 = vrcp.f32 %v6835_v26  ;;  %v3509_v39 = vpop.f32.mrf.mxu1  ;;  %v3555_v54 = vsel %vm3552_vm11, %v3554_v52, %v3550_v29  ;;  %vm3593_vm2 = vweird.f32 %v6835_v26 }
 0x661   :  { %v3530_v4 = vmul.f32 %v5207_v27, %v3529_v13  ;;  %vm3537_vm15 = vcmp.eq.f32.partialorder %v3536_v17, 8.507059e+37 }
 0x662   :  { %v3604_v18 = vadd.f32 %v3508_v0, %v7499_v12 }
 0x663   :  { %v5211_v34 = vpop.eup %5210  ;;  %v3531_v57 = vadd.f32 %v5207_v27, %v3530_v4 }
 0x664   :  { %v3608_v55 = vrot.slane %v3604_v18, 2  ;;  %v3571_v25 = vadd.f32 1.0, %v5211_v34  ;;  %v3468_v41 = vpop.f32.mrf.mxu2 }
 0x665   :  { %v3482_v36 = vadd.f32 %v3481_v5, %v3468_v41  ;;  %v3535_v13 = vsel %vm3534_vm14, %v5207_v27, %v3531_v57  ;;  %v3539_v41 = vor.u32 1.1754944e-38, %v3538_v1  ;;  %v3599_v57 = vand.u32 2147483648, %v6835_v26 }
 0x666   :  { %v3612_v53 = vmul.f32 %v3608_v55, %v3555_v54  ;;  %v5213_v3 = vpop.eup %5212  ;;  %5214 = vrcp.f32 %v3571_v25  ;;  %v3483_v35 = vpop.f32.mrf.mxu3  ;;  %vm3578_vm7 = vweird.f32 %v3571_v25 }
 0x667   :  { %v3496_v7 = vpop.f32.mrf.mxu0  ;;  %v3589_v51 = vmul.f32 %v5213_v3, %v6835_v26  ;;  %v3603_v39 = vadd.f32 %v3482_v36, %v6037_v50  ;;  %v3540_v18 = vsel %vm3537_vm15, %v3539_v41, %v3535_v13  ;;  %vm3594_vm1 = vweird.f32 %v5213_v3 }
 0x668   :  { %v3614_v0 = vadd.f32 %v3612_v53, %v5995_v2  ;;  %v3597_v36 = vand.u32 2147483647, %v6835_v26  ;;  %vm3595_vm4 = vmor %vm3593_vm2, %vm3594_vm1 }
 0x669   :  { %v3590_v54 = vsub.f32 1.0, %v3589_v51  ;;  %v3607_v5 = vrot.slane %v3603_v39, 2 }
 0x66a   :  { %5216 = vtanh.f32 %v3614_v0  ;;  %v3600_v0 = vor.u32 1.1754944e-38, %v3599_v57  ;;  %vm3598_vm5 = vcmp.eq.f32.partialorder %v3597_v36, 8.507059e+37 }
 0x66b   :  { %v3591_v29 = vmul.f32 %v5213_v3, %v3590_v54  ;;  %v3611_v52 = vmul.f32 %v3607_v5, %v3540_v18  ;;  %v3584_v5 = vand.u32 2147483648, %v3571_v25  ;;  %v3582_v18 = vand.u32 2147483647, %v3571_v25 }
 0x66c   :  { %v5215_v4 = vpop.eup %5214  ;;  %v3470_v24 = vpop.f32.mrf.mxu2 }
 0x66d   :  { %v3574_v34 = vmul.f32 %v5215_v4, %v3571_v25  ;;  %v3592_v55 = vadd.f32 %v5213_v3, %v3591_v29  ;;  %v3613_v35 = vadd.f32 %v3611_v52, %v6003_v15  ;;  %vm3579_vm6 = vweird.f32 %v5215_v4 }
 0x66e   :  { %vm3580_vm10 = vmor %vm3578_vm7, %vm3579_vm6  ;;  %vm3583_vm11 = vcmp.eq.f32.partialorder %v3582_v18, 8.507059e+37 }
 0x66f   :  { %v3575_v27 = vsub.f32 1.0, %v3574_v34  ;;  %5218 = vtanh.f32 %v3613_v35  ;;  %v3596_v7 = vsel %vm3595_vm4, %v5213_v3, %v3592_v55  ;;  %v3585_v34 = vor.u32 1.1754944e-38, %v3584_v5 }
 0x670   :  { %v5217_v53 = vpop.eup %5216  ;;  %v3601_v54 = vsel %vm3598_vm5, %v3600_v0, %v3596_v7 }
 0x671   :  { %v3620_v1 = vrot.slane %v5217_v53, 1  ;;  %v3576_v17 = vmul.f32 %v5215_v4, %v3575_v27 }
 0x673   :  { %v3624_v51 = vsub.f32 %v6722_v19, %v3620_v1  ;;  %v3577_v39 = vadd.f32 %v5215_v4, %v3576_v17 }
 0x675   :  { %v3628_v13 = vrot.slane %v3624_v51, 7  ;;  %v5219_v41 = vpop.eup %5218  ;;  %v3581_v24 = vsel %vm3580_vm10, %v5215_v4, %v3577_v39 }
 0x676   :  { %v3619_v52 = vrot.slane %v5219_v41, 1  ;;  %v3586_v57 = vsel %vm3583_vm11, %v3585_v34, %v3581_v24 }
 0x677   :  { %v3632_v29 = vmul.f32 %v3628_v13, %v3601_v54  ;;  %v7707_v13 = vld [vmem:[#allocation109_spill] sm:$0xff] }
 0x678   :  { %v3623_v3 = vsub.f32 %v6727_v48, %v3619_v52 }
 0x679   :  { %v6850_v26 = vadd.f32 %v5217_v53, %v3632_v29 }
 0x67a   :  { %v3627_v35 = vrot.slane %v3623_v3, 7 }
 0x67b   :  { %v3636_v55 = vpack.c.bf16 %v6850_v26, %v6850_v26 }
 0x67c   :  { %v3631_v36 = vmul.f32 %v3627_v35, %v3586_v57 }
 0x67d   :  { %v3640_v27 = vrot.slane %v3636_v55, 3 }
 0x67e   :  { %v6855_v1 = vadd.f32 %v5219_v41, %v3631_v36 }
 0x67f   :  { %3664 = vmatmul.bf16.vlgmr.msra.gmra.mxu3 %v3640_v27  ;;  %3690 = vmatmul.bf16.vlgmr.msrb.gmra.mxu1 %v3640_v27 }
 0x680   :  { %3760 = vmatpush.bf16.msra.mxu3 %v7292_v31  ;;  %3786 = vmatpush.bf16.msrb.mxu1 %v7294_v11  ;;  %v3635_v25 = vpack.c.bf16 %v6855_v1, %v6855_v1 }
 0x682   :  { %v3639_v4 = vrot.slane %v3635_v25, 3 }
 0x684   :  { %3761 = vmatpush.bf16.msra.mxu3 %v7296_v30  ;;  %3787 = vmatpush.bf16.msrb.mxu1 %v7298_v8 }
 0x685   :  { %3651 = vmatmul.bf16.vlgmr.msra.gmra.mxu2 %v3639_v4  ;;  %3677 = vmatmul.bf16.vlgmr.msrb.gmra.mxu0 %v3639_v4 }
 0x686   :  { %3747 = vmatpush.bf16.msra.mxu2 %v7291_v10  ;;  %3773 = vmatpush.bf16.msrb.mxu0 %v7293_v22 }
 0x688   :  { %3762 = vmatpush.bf16.msra.mxu3 %v7300_v37  ;;  %3788 = vmatpush.bf16.msrb.mxu1 %v7302_v60 }
 0x68a   :  { %3748 = vmatpush.bf16.msra.mxu2 %v7295_v16  ;;  %3774 = vmatpush.bf16.msrb.mxu0 %v7297_v20  ;;  %v7705_v20 = vld [vmem:[#allocation107_spill] sm:$0xff] }
 0x68c   :  { %3763 = vmatpush.bf16.msra.mxu3 %v7304_v47  ;;  %3789 = vmatpush.bf16.msrb.mxu1 %v7306_v23 }
 0x68e   :  { %3749 = vmatpush.bf16.msra.mxu2 %v7299_v21  ;;  %3775 = vmatpush.bf16.msrb.mxu0 %v7301_v9 }
 0x68f   :  { %3716 = vmatmul.bf16.vlgmr.msrb.gmra.mxu3 %v3640_v27  ;;  %3742 = vmatmul.bf16.vlgmr.msra.gmra.mxu1 %v3640_v27 }
 0x690   :  { %3764 = vmatpush.bf16.msra.mxu3 %v7308_v6  ;;  %3790 = vmatpush.bf16.msrb.mxu1 %v7310_v63 }
 0x692   :  { %3750 = vmatpush.bf16.msra.mxu2 %v7303_v44  ;;  %3776 = vmatpush.bf16.msrb.mxu0 %v7305_v43 }
 0x694   :  { %3765 = vmatpush.bf16.msra.mxu3 %v7312_v42  ;;  %3791 = vmatpush.bf16.msrb.mxu1 %v5901_v28 }
 0x695   :  { %3703 = vmatmul.bf16.vlgmr.msrb.gmra.mxu2 %v3639_v4  ;;  %3729 = vmatmul.bf16.vlgmr.msra.gmra.mxu0 %v3639_v4 }
 0x696   :  { %3751 = vmatpush.bf16.msra.mxu2 %v7307_v61  ;;  %3777 = vmatpush.bf16.msrb.mxu0 %v7309_v32  ;;  %v7706_v32 = vld [vmem:[#allocation108_spill] sm:$0xff] }
 0x698   :  { %3766 = vmatpush.bf16.msra.mxu3 %v5907_v14  ;;  %3792 = vmatpush.bf16.msrb.mxu1 %v5913_v59 }
 0x69a   :  { %3752 = vmatpush.bf16.msra.mxu2 %v7311_v38  ;;  %3778 = vmatpush.bf16.msrb.mxu0 %v5899_v33 }
 0x69c   :  { %3767 = vmatpush.bf16.msra.mxu3 %v5919_v46  ;;  %3793 = vmatpush.bf16.msrb.mxu1 %v5925_v62 }
 0x69e   :  { %3753 = vmatpush.bf16.msra.mxu2 %v5905_v58  ;;  %3779 = vmatpush.bf16.msrb.mxu0 %v5911_v45 }
 0x69f   :  { %3768 = vmatmul.bf16.vlgmr.msra.gmra.mxu3 %v3640_v27  ;;  %3794 = vmatmul.bf16.vlgmr.msrb.gmra.mxu1 %v3640_v27 }
 0x6a2   :  { %3754 = vmatpush.bf16.msra.mxu2 %v7639_v49  ;;  %3780 = vmatpush.bf16.msrb.mxu0 %v7640_v40 }
 0x6a5   :  { %3755 = vmatmul.bf16.vlgmr.msra.gmra.mxu2 %v3639_v4  ;;  %3781 = vmatmul.bf16.vlgmr.msrb.gmra.mxu0 %v3639_v4 }
 0x6fc   :  { %v3691_v28 = vpop.f32.mrf.mxu1 }
 0x702   :  { %v3665_v14 = vpop.f32.mrf.mxu3  ;;  %v3678_v59 = vpop.f32.mrf.mxu0 }
 0x703   :  { %v3692_v33 = vadd.f32 %v3691_v28, %v3678_v59 }
 0x704   :  { %v3693_v10 = vpop.f32.mrf.mxu1 }
 0x705   :  { %v3802_v46 = vrot.slane %v3692_v33, 1 }
 0x707   :  { %v3806_v62 = vadd.f32 %v3802_v46, %v7701_v56 }
 0x708   :  { %v3652_v31 = vpop.f32.mrf.mxu2 }
 0x709   :  { %v4849_v58 = vmul.f32 -1.442695, %v3806_v62  ;;  %v3666_v22 = vadd.f32 %v3665_v14, %v3652_v31 }
 0x70a   :  { %v3667_v45 = vpop.f32.mrf.mxu3  ;;  %v3680_v11 = vpop.f32.mrf.mxu0 }
 0x70b   :  { %5220 = vpow2.f32 %v4849_v58  ;;  %v3801_v16 = vrot.slane %v3666_v22, 1 }
 0x70c   :  { %v3743_v30 = vpop.f32.mrf.mxu1 }
 0x70d   :  { %v3805_v8 = vadd.f32 %v3801_v16, %v7705_v20 }
 0x70f   :  { %v4848_v21 = vmul.f32 -1.442695, %v3805_v8 }
 0x710   :  { %v3654_v37 = vpop.f32.mrf.mxu2 }
 0x711   :  { %v5221_v9 = vpop.eup %5220  ;;  %5222 = vpow2.f32 %v4848_v21 }
 0x712   :  { %v3814_v60 = vadd.f32 1.0, %v5221_v9  ;;  %v3717_v44 = vpop.f32.mrf.mxu3  ;;  %v3730_v47 = vpop.f32.mrf.mxu0 }
 0x713   :  { %v3744_v43 = vadd.f32 %v3743_v30, %v3730_v47 }
 0x714   :  { %5224 = vrcp.f32 %v3814_v60  ;;  %v3745_v23 = vpop.f32.mrf.mxu1  ;;  %v3841_v57 = vand.u32 2147483648, %v3814_v60  ;;  %vm3835_vm13 = vweird.f32 %v3814_v60  ;;  %v3839_v36 = vand.u32 2147483647, %v3814_v60 }
 0x715   :  { %v3848_v61 = vrot.slane %v3744_v43, 1 }
 0x716   :  { %v3842_v33 = vor.u32 1.1754944e-38, %v3841_v57  ;;  %vm3840_vm15 = vcmp.eq.f32.partialorder %v3839_v36, 8.507059e+37 }
 0x717   :  { %v5223_v6 = vpop.eup %5222  ;;  %v3852_v63 = vadd.f32 %v3848_v61, %v7706_v32 }
 0x718   :  { %v6894_v38 = vadd.f32 1.0, %v5223_v6  ;;  %v3704_v42 = vpop.f32.mrf.mxu2 }
 0x719   :  { %v4851_v49 = vmul.f32 -1.442695, %v3852_v63  ;;  %v3718_v40 = vadd.f32 %v3717_v44, %v3704_v42 }
 0x71a   :  { %v5225_v56 = vpop.eup %5224  ;;  %5226 = vrcp.f32 %v6894_v38  ;;  %v3719_v53 = vpop.f32.mrf.mxu3  ;;  %v3826_v45 = vand.u32 2147483648, %v6894_v38  ;;  %vm3820_vm2 = vweird.f32 %v6894_v38  ;;  %v3824_v30 = vand.u32 2147483647, %v6894_v38 }
 0x71b   :  { %v3732_v17 = vpop.f32.mrf.mxu0  ;;  %5228 = vpow2.f32 %v4851_v49  ;;  %v3847_v7 = vrot.slane %v3718_v40, 1  ;;  %v3831_v51 = vmul.f32 %v5225_v56, %v3814_v60  ;;  %vm3836_vm12 = vweird.f32 %v5225_v56 }
 0x71c   :  { %v3795_v0 = vpop.f32.mrf.mxu1  ;;  %vm3837_vm14 = vmor %vm3835_vm13, %vm3836_vm12  ;;  %v3827_v44 = vor.u32 1.1754944e-38, %v3826_v45  ;;  %vm3825_vm5 = vcmp.eq.f32.partialorder %v3824_v30, 8.507059e+37  ;;  %vm3932_vm13 = vcmask 1044480   ;;  %v7715_v45 = vld [vmem:[#allocation85_spill] sm:$0xff]  ;;  %v7716_v30 = vld [vmem:[#allocation87_spill] sm:$0xff] }
 0x71d   :  { %v3851_v39 = vadd.f32 %v3847_v7, %v7707_v13  ;;  %v3832_v54 = vsub.f32 1.0, %v3831_v51  ;;  %v7708_v7 = vld [vmem:[#allocation82_spill] sm:$0xff]  ;;  %v7709_v51 = vld [vmem:[#allocation111_spill] sm:$0xff] }
 0x71f   :  { %v4850_v41 = vmul.f32 -1.442695, %v3851_v39  ;;  %v3833_v5 = vmul.f32 %v5225_v56, %v3832_v54  ;;  %v7710_v39 = vld [vmem:[#allocation84_spill] sm:$0xff] }
 0x720   :  { %v5227_v29 = vpop.eup %5226  ;;  %v3706_v18 = vpop.f32.mrf.mxu2 }
 0x721   :  { %v5229_v52 = vpop.eup %5228  ;;  %5230 = vpow2.f32 %v4850_v41  ;;  %v3834_v24 = vadd.f32 %v5225_v56, %v3833_v5  ;;  %v3816_v3 = vmul.f32 %v5227_v29, %v6894_v38  ;;  %vm3821_vm1 = vweird.f32 %v5227_v29  ;;  %v7711_v5 = vld [vmem:[#allocation86_spill] sm:$0xff] }
 0x722   :  { %v6899_v34 = vadd.f32 1.0, %v5229_v52  ;;  %v3769_v55 = vpop.f32.mrf.mxu3  ;;  %vm3822_vm4 = vmor %vm3820_vm2, %vm3821_vm1  ;;  %vm3938_vm2 = vcmask 1046528  }
 0x723   :  { %v3782_v35 = vpop.f32.mrf.mxu0  ;;  %v3817_v25 = vsub.f32 1.0, %v3816_v3  ;;  %v3838_v28 = vsel %vm3837_vm14, %v5225_v56, %v3834_v24  ;;  %vm3935_vm14 = vcmask 1045504  }
 0x724   :  { %v3796_v27 = vadd.f32 %v3795_v0, %v3782_v35  ;;  %5232 = vrcp.f32 %v6899_v34  ;;  %v3797_v4 = vpop.f32.mrf.mxu1  ;;  %v3843_v58 = vsel %vm3840_vm15, %v3842_v33, %v3838_v28  ;;  %vm3881_vm7 = vweird.f32 %v6899_v34 }
 0x725   :  { %v3818_v59 = vmul.f32 %v5227_v29, %v3817_v25  ;;  %v3885_v53 = vand.u32 2147483647, %v6899_v34  ;;  %v3924_v0 = vsel %vm197_vm3, %v7709_v51, %v7708_v7 }
 0x726   :  { %v3892_v14 = vadd.f32 %v3796_v27, %v7499_v12  ;;  %v3926_v54 = vsel %vm206_vm8, %v3924_v0, %v7710_v39  ;;  %v7712_v27 = vld [vmem:[#allocation88_spill] sm:$0xff] }
 0x727   :  { %v5231_v10 = vpop.eup %5230  ;;  %v3819_v62 = vadd.f32 %v5227_v29, %v3818_v59  ;;  %vm3886_vm12 = vcmp.eq.f32.partialorder %v3885_v53, 8.507059e+37 }
 0x728   :  { %v3896_v46 = vrot.slane %v3892_v14, 1  ;;  %v6903_v31 = vadd.f32 1.0, %v5231_v10  ;;  %v3756_v22 = vpop.f32.mrf.mxu2 }
 0x729   :  { %v3770_v16 = vadd.f32 %v3769_v55, %v3756_v22  ;;  %v3823_v9 = vsel %vm3822_vm4, %v5227_v29, %v3819_v62  ;;  %v3928_v29 = vsel %vm215_vm9, %v3926_v54, %v7711_v5  ;;  %v7714_v62 = vld [vmem:[#allocation45_spill] sm:$0xff] }
 0x72a   :  { %v3900_v11 = vmul.f32 %v3896_v46, %v3843_v58  ;;  %v5233_v12 = vpop.eup %5232  ;;  %5234 = vrcp.f32 %v6903_v31  ;;  %v3771_v20 = vpop.f32.mrf.mxu3  ;;  %v3828_v23 = vsel %vm3825_vm5, %v3827_v44, %v3823_v9  ;;  %v3872_v3 = vand.u32 2147483648, %v6903_v31  ;;  %v7713_v46 = vld [vmem:[#allocation83_spill] sm:$0xff] }
 0x72b   :  { %v3784_v8 = vpop.f32.mrf.mxu0  ;;  %v3877_v21 = vmul.f32 %v5233_v12, %v6899_v34  ;;  %v3891_v60 = vadd.f32 %v3770_v16, %v6037_v50  ;;  %vm3882_vm6 = vweird.f32 %v5233_v12  ;;  %v3887_v50 = vand.u32 2147483648, %v6899_v34 }
 0x72c   :  { %v3902_v37 = vadd.f32 %v3900_v11, %v5995_v2  ;;  %vm3883_vm10 = vmor %vm3881_vm7, %vm3882_vm6  ;;  %vm3866_vm15 = vweird.f32 %v6903_v31  ;;  %v3870_v35 = vand.u32 2147483647, %v6903_v31  ;;  %v3931_v36 = vsel %vm224_vm0, %v3928_v29, %v7712_v27 }
 0x72d   :  { %v3878_v47 = vsub.f32 1.0, %v3877_v21  ;;  %v3895_v43 = vrot.slane %v3891_v60, 1  ;;  %v3888_v41 = vor.u32 1.1754944e-38, %v3887_v50  ;;  %v3934_v14 = vsel %vm3932_vm13, %v3931_v36, %v6722_v19 }
 0x72e   :  { %5236 = vtanh.f32 %v3902_v37  ;;  %v3873_v59 = vor.u32 1.1754944e-38, %v3872_v3  ;;  %v3937_v33 = vsel %vm3935_vm14, %v3934_v14, %v6850_v26  ;;  %vm3871_vm4 = vcmp.eq.f32.partialorder %v3870_v35, 8.507059e+37 }
 0x72f   :  { %v3899_v61 = vmul.f32 %v3895_v43, %v3828_v23  ;;  %v3879_v6 = vmul.f32 %v5233_v12, %v3878_v47 }
 0x730   :  { %v5235_v32 = vpop.eup %5234  ;;  %v3758_v63 = vpop.f32.mrf.mxu2 }
 0x731   :  { %v3862_v38 = vmul.f32 %v5235_v32, %v6903_v31  ;;  %v3901_v42 = vadd.f32 %v3899_v61, %v6003_v15  ;;  %v3880_v49 = vadd.f32 %v5233_v12, %v3879_v6  ;;  %vm3867_vm11 = vweird.f32 %v5235_v32 }
 0x732   :  { %vm3868_vm1 = vmor %vm3866_vm15, %vm3867_vm11  ;;  %v3923_v31 = vsel %vm197_vm3, %v7714_v62, %v7713_v46 }
 0x733   :  { %v3863_v40 = vsub.f32 1.0, %v3862_v38  ;;  %5238 = vtanh.f32 %v3901_v42  ;;  %v3884_v13 = vsel %vm3883_vm10, %v5233_v12, %v3880_v49  ;;  %v3925_v11 = vsel %vm206_vm8, %v3923_v31, %v7715_v45 }
 0x734   :  { %v5237_v2 = vpop.eup %5236  ;;  %v3889_v34 = vsel %vm3886_vm12, %v3888_v41, %v3884_v13  ;;  %v3927_v19 = vsel %vm215_vm9, %v3925_v11, %v7716_v30 }
 0x735   :  { %v3908_v56 = vrot.slane %v5237_v2, 1  ;;  %v3864_v17 = vmul.f32 %v5235_v32, %v3863_v40 }
 0x737   :  { %v3912_v15 = vsub.f32 %v6850_v26, %v3908_v56  ;;  %v3865_v18 = vadd.f32 %v5235_v32, %v3864_v17  ;;  %v7717_v26 = vld [vmem:[#allocation89_spill] sm:$0xff] }
 0x738   :  { %v3930_v12 = vsel %vm224_vm0, %v3927_v19, %v7717_v26 }
 0x739   :  { %v3916_v52 = vrot.slane %v3912_v15, 7  ;;  %v5239_v24 = vpop.eup %5238  ;;  %v3869_v25 = vsel %vm3868_vm1, %v5235_v32, %v3865_v18  ;;  %v3933_v8 = vsel %vm3932_vm13, %v3930_v12, %v6727_v48 }
 0x73a   :  { %v3907_v55 = vrot.slane %v5239_v24, 1  ;;  %v3874_v22 = vsel %vm3871_vm4, %v3873_v59, %v3869_v25  ;;  %v3936_v21 = vsel %vm3935_vm14, %v3933_v8, %v6855_v1 }
 0x73b   :  { %v3920_v57 = vmul.f32 %v3916_v52, %v3889_v34 }
 0x73c   :  { %v3911_v4 = vsub.f32 %v6855_v1, %v3907_v55 }
 0x73d   :  { %v3922_v28 = vadd.f32 %v5237_v2, %v3920_v57 }
 0x73e   :  { %v3915_v10 = vrot.slane %v3911_v4, 7 }
 0x73f   :  { %v3940_v58 = vsel %vm3938_vm2, %v3937_v33, %v3922_v28 }
 0x740   :  { %3942 = vst [vmem:[#allocation13 + $0x8] sm:$0xff] %v3940_v58  ;;  %v3919_v16 = vmul.f32 %v3915_v10, %v3874_v22 }
 0x742   :  { %v3921_v20 = vadd.f32 %v5239_v24, %v3919_v16 }
 0x744   :  { %v3939_v37 = vsel %vm3938_vm2, %v3936_v21, %v3921_v20 }
 0x745   :  { %3941 = vst [vmem:[#allocation13] sm:$0xff] %v3939_v37 }
 0x746   :  { %3953 = dma.vmem_to_hbm [thread:$0]  %s3949_s19, 256, %s3951_s22, [#allocation4]  }
 0x747   :  { %5404 = dma.done.wait [#allocation4], 256  }
 0x748   :  { %5405 = vsyncadd [#allocation4], 4294967040 }
 0x749   :  { %3958 = vsyncpa [#allocation3], 1 }
 0x74a   :  { %3959 = vsyncpa [#allocation8], 1 }
 0x74b   :  { %3960 = vsyncpa [#allocation11], 1 }
 0x74c   :  { %3961 = vsyncpa [#allocation4], 1 }
 0x74d   :  { %3962 = vsyncpa [#allocation5], 1 }

</bundles_post_ra>
